<compile_context>
chip_gen: v5e
topology: v5e:2x2
jax: 0.10.0
libtpu: 0.0.40
codegen_flags: <defaults>
</compile_context>

<pallas_src>
import functools
import math

import jax
import jax.numpy as jnp
from jax.experimental import pallas as pl
from jax.experimental.pallas import tpu as pltpu

# ----------------------------- config (small) -----------------------------
B = 2
N_VIDEO = 16
N_TEXT = 8
VIDEO_DIM = 24
TEXT_DIM = 12
HIDDEN = 32
NUM_HEADS = 4
N_LAYERS = 3
LN_EPS = 1e-5
NEG_BIG = -1e30  # large finite negative instead of -inf (avoids inf-inf NaN)


# --------------------------- fused Pallas kernel ---------------------------
def _fused_forward_kernel(video_ref, text_ref, bias_ref, colmask_ref,
                          wvp_ref, bvp_ref, wtp_ref, btp_ref,
                          wq_ref, bq_ref, wkv_ref, bkv_ref,
                          wo_ref, bo_ref, gamma_ref, beta_ref,
                          vout_ref, tout_ref,
                          *, num_heads, n_layers):
    """Whole CrossModalFusion forward for all batches in one invocation.

    video_ref  : [B*Nv, Dv]        text_ref : [B*Nt, Dt]
    bias_ref   : [nH*B*Nv, B*Nt]   additive mask bias (0 keep / NEG_BIG drop),
                                   heads tiled on sublanes
    colmask_ref: [nH*B*Nv, H]      block h keeps lanes [h*d_k, (h+1)*d_k)
    wq_ref     : [L, H, H]  bq_ref: [L, 1, H]
    wkv_ref    : [H, 2*L*H] bkv   : [1, 2*L*H]   layout [K_0..K_{L-1} | V_0..V_{L-1}]
    wo_ref     : [L, H, H]  bo_ref: [L, 1, H]
    gamma/beta : [L, 1, H]
    """
    xv = video_ref[...]                      # [B*Nv, Dv]
    xt = text_ref[...]                       # [B*Nt, Dt]
    bias = bias_ref[...]                     # [nH*Mv, Mt]  (hoisted, reused L times)
    colmask = colmask_ref[...]               # [nH*Mv, H]

    # Input projections: one MXU push each, covering both batch elements.
    v = jnp.dot(xv, wvp_ref[...], preferred_element_type=jnp.float32) + bvp_ref[...]
    t = jnp.dot(xt, wtp_ref[...], preferred_element_type=jnp.float32) + btp_ref[...]
    tout_ref[...] = t.astype(tout_ref.dtype)

    Mv, H = v.shape
    d_k = H // num_heads
    scale = 1.0 / math.sqrt(d_k)

    # K/V for ALL layers in one lane-dense matmul (text is layer-invariant).
    kv_all = jnp.dot(t, wkv_ref[...], preferred_element_type=jnp.float32) + bkv_ref[...]  # [Mt, 2*L*H]

    for l in range(n_layers):                # static layer loop, all in VMEM
        wq = wq_ref[l]                       # [H, H]
        bq = bq_ref[l]                       # [1, H]
        wo = wo_ref[l]                       # [H, H]
        bo = bo_ref[l]                       # [1, H]
        gamma = gamma_ref[l]                 # [1, H]
        beta = beta_ref[l]                   # [1, H]
        k = kv_all[:, l * H:(l + 1) * H]                              # [Mt, H]
        val = kv_all[:, (n_layers + l) * H:(n_layers + l + 1) * H]    # [Mt, H]

        # Q projection, then stack heads on the SUBLANE axis: block h keeps
        # only its d_k columns, so one dot_general below yields all per-head
        # score matrices at once.
        q = jnp.dot(v, wq, preferred_element_type=jnp.float32) + bq   # [Mv, H]
        q_stk = jnp.concatenate([q] * num_heads, axis=0) * colmask    # [nH*Mv, H]

        # ONE score matmul, ONE softmax, ONE context matmul for all heads.
        s = jax.lax.dot_general(
            q_stk, k, (((1,), (1,)), ((), ())),
            preferred_element_type=jnp.float32) * scale + bias        # [nH*Mv, Mt]
        s = s - jnp.max(s, axis=-1, keepdims=True)
        p = jnp.exp(s)
        inv = pl.reciprocal(jnp.sum(p, axis=-1, keepdims=True), approx=False)
        attn = p * inv                                                # [nH*Mv, Mt]

        ctx_stk = jnp.dot(attn, val,
                          preferred_element_type=jnp.float32) * colmask  # [nH*Mv, H]
        # Fold heads back: block h only carries its own d_k lanes, so the
        # concatenated multi-head context is the sum over sublane blocks.
        ctx = ctx_stk[0:Mv, :]
        for h in range(1, num_heads):
            ctx = ctx + ctx_stk[h * Mv:(h + 1) * Mv, :]               # [Mv, H]

        attended = jnp.dot(ctx, wo, preferred_element_type=jnp.float32) + bo

        # Residual + LayerNorm
        y = v + attended
        mu = jnp.mean(y, axis=-1, keepdims=True)
        var = jnp.mean((y - mu) * (y - mu), axis=-1, keepdims=True)
        v = (y - mu) * jax.lax.rsqrt(var + LN_EPS) * gamma + beta

    vout_ref[...] = v.astype(vout_ref.dtype)


# --------------------------- model wrapper ---------------------------------
def cross_modal_fusion_forward(video_feats, text_feats, mask_text, params):
    """Returns (language_guided_video [B,Nv,H], text_proj [B,Nt,H])."""
    if video_feats.ndim == 2:
        video_feats = video_feats[None]
    if text_feats.ndim == 2:
        text_feats = text_feats[None]
    Bsz, Nv, Dv = video_feats.shape
    Bt, Nt, Dt = text_feats.shape
    assert Bsz == Bt, "batch size mismatch"
    H = params["Wv_proj"].shape[1]
    L = params["Wq"].shape[0]
    nH = NUM_HEADS
    d_k = H // nH

    video2d = video_feats.reshape(Bsz * Nv, Dv)
    text2d = text_feats.reshape(Bsz * Nt, Dt)

    # Additive attention-mask bias (same-batch AND text-token-kept), tiled
    # over heads on the sublane axis: [nH*B*Nv, B*Nt].
    row_b = jnp.arange(Bsz * Nv, dtype=jnp.int32)[:, None] // Nv
    col_b = jnp.arange(Bsz * Nt, dtype=jnp.int32)[None, :] // Nt
    tkeep = (mask_text.reshape(Bsz * Nt) != 0)[None, :]
    keep = (row_b == col_b) & tkeep
    bias = jnp.where(keep, 0.0, NEG_BIG).astype(jnp.float32)
    bias_stk = jnp.tile(bias, (nH, 1))                      # [nH*B*Nv, B*Nt]

    # Head-column mask: sublane block h keeps lanes [h*d_k, (h+1)*d_k).
    blk = jnp.arange(nH * Bsz * Nv, dtype=jnp.int32)[:, None] // (Bsz * Nv)
    lane = jnp.arange(H, dtype=jnp.int32)[None, :] // d_k
    colmask = (blk == lane).astype(jnp.float32)             # [nH*B*Nv, H]

    def full(shape):
        return pl.BlockSpec(shape, lambda i, _n=len(shape): (0,) * _n)

    kernel = functools.partial(_fused_forward_kernel, num_heads=nH, n_layers=L)

    vout, tout = pl.pallas_call(
        kernel,
        out_shape=(jax.ShapeDtypeStruct((Bsz * Nv, H), video_feats.dtype),
                   jax.ShapeDtypeStruct((Bsz * Nt, H), text_feats.dtype)),
        grid=(1,),
        in_specs=[
            full((Bsz * Nv, Dv)),                  # video (batch on sublanes)
            full((Bsz * Nt, Dt)),                  # text
            full((nH * Bsz * Nv, Bsz * Nt)),       # additive mask bias
            full((nH * Bsz * Nv, H)),              # head-column mask
            full((Dv, H)), full((1, H)),           # video proj
            full((Dt, H)), full((1, H)),           # text proj
            full((L, H, H)), full((L, 1, H)),      # Wq, bq (stacked layers)
            full((H, 2 * L * H)), full((1, 2 * L * H)),  # Wkv_all, bkv_all
            full((L, H, H)), full((L, 1, H)),      # Wo, bo
            full((L, 1, H)), full((L, 1, H)),      # gamma, beta
        ],
        out_specs=(full((Bsz * Nv, H)), full((Bsz * Nt, H))),
        compiler_params=pltpu.CompilerParams(dimension_semantics=("arbitrary",)),
    )(video2d, text2d, bias_stk, colmask,
      params["Wv_proj"], params["bv_proj"].reshape(1, H),
      params["Wt_proj"], params["bt_proj"].reshape(1, H),
      params["Wq"], params["bq"], params["Wkv_all"], params["bkv_all"],
      params["Wo"], params["bo"], params["gamma"], params["beta"])

    return vout.reshape(Bsz, Nv, H), tout.reshape(Bsz, Nt, H)


# --------------------------- deterministic init -----------------------------
def init_params(key):
    def linear_init(key, fan_in, fan_out):
        kw, kb = jax.random.split(key)
        bound = 1.0 / jnp.sqrt(jnp.float32(fan_in))
        w = jax.random.uniform(kw, (fan_in, fan_out), jnp.float32, -bound, bound)
        b = jax.random.uniform(kb, (fan_out,), jnp.float32, -bound, bound)
        return w, b

    keys = jax.random.split(key, 2 + 4 * N_LAYERS)
    Wv_proj, bv_proj = linear_init(keys[0], VIDEO_DIM, HIDDEN)
    Wt_proj, bt_proj = linear_init(keys[1], TEXT_DIM, HIDDEN)

    Wq_l, bq_l, Wo_l, bo_l = [], [], [], []
    Wk_l, bk_l, Wvv_l, bvv_l = [], [], [], []
    for i in range(N_LAYERS):
        kq, kk, kv, ko = keys[2 + 4 * i: 2 + 4 * (i + 1)]
        Wq, bq = linear_init(kq, HIDDEN, HIDDEN)
        Wk, bk = linear_init(kk, HIDDEN, HIDDEN)
        Wv, bv = linear_init(kv, HIDDEN, HIDDEN)
        Wo, bo = linear_init(ko, HIDDEN, HIDDEN)
        Wq_l.append(Wq)
        bq_l.append(bq.reshape(1, HIDDEN))
        Wk_l.append(Wk)
        bk_l.append(bk)
        Wvv_l.append(Wv)
        bvv_l.append(bv)
        Wo_l.append(Wo)
        bo_l.append(bo.reshape(1, HIDDEN))

    # All-layer K/V weights packed lane-dense: [H, 2*L*H] = [K_0..K_{L-1} | V_0..V_{L-1}].
    Wkv_all = jnp.concatenate(Wk_l + Wvv_l, axis=1)
    bkv_all = jnp.concatenate(bk_l + bvv_l).reshape(1, 2 * N_LAYERS * HIDDEN)

    return dict(
        Wv_proj=Wv_proj, bv_proj=bv_proj,
        Wt_proj=Wt_proj, bt_proj=bt_proj,
        Wq=jnp.stack(Wq_l), bq=jnp.stack(bq_l),
        Wkv_all=Wkv_all, bkv_all=bkv_all,
        Wo=jnp.stack(Wo_l), bo=jnp.stack(bo_l),
        gamma=jnp.ones((N_LAYERS, 1, HIDDEN), jnp.float32),
        beta=jnp.zeros((N_LAYERS, 1, HIDDEN), jnp.float32),
    )


# --------------------------- pure-JAX reference -----------------------------
def ref_forward(video, text, mask, params):
    v = video @ params["Wv_proj"] + params["bv_proj"]
    t = text @ params["Wt_proj"] + params["bt_proj"]
    Bsz, Nv, H = v.shape
    Nt = t.shape[1]
    dk = H // NUM_HEADS
    L = params["Wq"].shape[0]
    Wkv = params["Wkv_all"]
    bkv = params["bkv_all"][0]
    for l in range(L):
        Wq, bq = params["Wq"][l], params["bq"][l, 0]
        Wk, bk = Wkv[:, l * H:(l + 1) * H], bkv[l * H:(l + 1) * H]
        Wv_, bv_ = Wkv[:, (L + l) * H:(L + l + 1) * H], bkv[(L + l) * H:(L + l + 1) * H]
        Wo, bo = params["Wo"][l], params["bo"][l, 0]
        gamma, beta = params["gamma"][l, 0], params["beta"][l, 0]
        q = (v @ Wq + bq).reshape(Bsz, Nv, NUM_HEADS, dk).transpose(0, 2, 1, 3)
        k = (t @ Wk + bk).reshape(Bsz, Nt, NUM_HEADS, dk).transpose(0, 2, 1, 3)
        vv = (t @ Wv_ + bv_).reshape(Bsz, Nt, NUM_HEADS, dk).transpose(0, 2, 1, 3)
        s = jnp.einsum("bhqd,bhkd->bhqk", q, k) / jnp.sqrt(jnp.float32(dk))
        s = jnp.where(mask[:, None, None, :] == 0, -jnp.inf, s)
        a = jax.nn.softmax(s, axis=-1)
        ctx = jnp.einsum("bhqk,bhkd->bhqd", a, vv).transpose(0, 2, 1, 3).reshape(Bsz, Nv, H)
        attended = ctx @ Wo + bo
        y = v + attended
        mu = y.mean(-1, keepdims=True)
        var = ((y - mu) ** 2).mean(-1, keepdims=True)
        v = (y - mu) / jnp.sqrt(var + LN_EPS) * gamma + beta
    return v, t


# ------------------------------- main ---------------------------------------
if __name__ == "__main__":
    key = jax.random.PRNGKey(0)
    k_v, k_t, k_m, k_p = jax.random.split(key, 4)

    video_feats = jax.random.normal(k_v, (B, N_VIDEO, VIDEO_DIM), jnp.float32)
    text_feats = jax.random.normal(k_t, (B, N_TEXT, TEXT_DIM), jnp.float32)
    # mask_text: 1 = keep, 0 = masked (last two text tokens of batch 1 masked)
    mask_text = jnp.ones((B, N_TEXT), jnp.float32).at[1, -2:].set(0.0)

    params = init_params(k_p)

    v_out, t_out = cross_modal_fusion_forward(video_feats, text_feats, mask_text, params)
    jax.block_until_ready((v_out, t_out))

    v_ref, t_ref = ref_forward(video_feats, text_feats, mask_text, params)
    assert v_out.shape == (B, N_VIDEO, HIDDEN) and t_out.shape == (B, N_TEXT, HIDDEN)
    assert jnp.allclose(v_out, v_ref, atol=5e-3, rtol=5e-3)
    assert jnp.allclose(t_out, t_ref, atol=5e-3, rtol=5e-3)

    print("KERNEL_OK")
</pallas_src>

<mosaic_0001>
module attributes {stable_mosaic.version = 11 : i64} {
  func.func @_fused_forward_kernel(%arg0: i32, %arg1: memref<32x24xf32, #tpu.memory_space<vmem>>, %arg2: memref<16x12xf32, #tpu.memory_space<vmem>>, %arg3: memref<128x16xf32, #tpu.memory_space<vmem>>, %arg4: memref<128x32xf32, #tpu.memory_space<vmem>>, %arg5: memref<24x32xf32, #tpu.memory_space<vmem>>, %arg6: memref<1x32xf32, #tpu.memory_space<vmem>>, %arg7: memref<12x32xf32, #tpu.memory_space<vmem>>, %arg8: memref<1x32xf32, #tpu.memory_space<vmem>>, %arg9: memref<3x32x32xf32, #tpu.memory_space<vmem>>, %arg10: memref<3x1x32xf32, #tpu.memory_space<vmem>>, %arg11: memref<32x192xf32, #tpu.memory_space<vmem>>, %arg12: memref<1x192xf32, #tpu.memory_space<vmem>>, %arg13: memref<3x32x32xf32, #tpu.memory_space<vmem>>, %arg14: memref<3x1x32xf32, #tpu.memory_space<vmem>>, %arg15: memref<3x1x32xf32, #tpu.memory_space<vmem>>, %arg16: memref<3x1x32xf32, #tpu.memory_space<vmem>>, %arg17: memref<32x32xf32, #tpu.memory_space<vmem>>, %arg18: memref<16x32xf32, #tpu.memory_space<vmem>>) attributes {dimension_semantics = [#tpu.dimension_semantics<arbitrary>], iteration_bounds = array<i64: 1>, scalar_prefetch = 0 : i64, scratch_operands = 0 : i64, tpu.core_type = #tpu.core_type<tc>, window_params = [{pipeline_mode = #tpu.pipeline_mode<synchronous>, transform_indices = @transform_0, window_bounds = array<i64: 32, 24>}, {pipeline_mode = #tpu.pipeline_mode<synchronous>, transform_indices = @transform_1, window_bounds = array<i64: 16, 12>}, {pipeline_mode = #tpu.pipeline_mode<synchronous>, transform_indices = @transform_2, window_bounds = array<i64: 128, 16>}, {pipeline_mode = #tpu.pipeline_mode<synchronous>, transform_indices = @transform_3, window_bounds = array<i64: 128, 32>}, {pipeline_mode = #tpu.pipeline_mode<synchronous>, transform_indices = @transform_4, window_bounds = array<i64: 24, 32>}, {pipeline_mode = #tpu.pipeline_mode<synchronous>, transform_indices = @transform_5, window_bounds = array<i64: 1, 32>}, {pipeline_mode = #tpu.pipeline_mode<synchronous>, transform_indices = @transform_6, window_bounds = array<i64: 12, 32>}, {pipeline_mode = #tpu.pipeline_mode<synchronous>, transform_indices = @transform_7, window_bounds = array<i64: 1, 32>}, {pipeline_mode = #tpu.pipeline_mode<synchronous>, transform_indices = @transform_8, window_bounds = array<i64: 3, 32, 32>}, {pipeline_mode = #tpu.pipeline_mode<synchronous>, transform_indices = @transform_9, window_bounds = array<i64: 3, 1, 32>}, {pipeline_mode = #tpu.pipeline_mode<synchronous>, transform_indices = @transform_10, window_bounds = array<i64: 32, 192>}, {pipeline_mode = #tpu.pipeline_mode<synchronous>, transform_indices = @transform_11, window_bounds = array<i64: 1, 192>}, {pipeline_mode = #tpu.pipeline_mode<synchronous>, transform_indices = @transform_12, window_bounds = array<i64: 3, 32, 32>}, {pipeline_mode = #tpu.pipeline_mode<synchronous>, transform_indices = @transform_13, window_bounds = array<i64: 3, 1, 32>}, {pipeline_mode = #tpu.pipeline_mode<synchronous>, transform_indices = @transform_14, window_bounds = array<i64: 3, 1, 32>}, {pipeline_mode = #tpu.pipeline_mode<synchronous>, transform_indices = @transform_15, window_bounds = array<i64: 3, 1, 32>}, {pipeline_mode = #tpu.pipeline_mode<synchronous>, transform_indices = @transform_16, window_bounds = array<i64: 32, 32>}, {pipeline_mode = #tpu.pipeline_mode<synchronous>, transform_indices = @transform_17, window_bounds = array<i64: 16, 32>}]} {
    %c0 = arith.constant 0 : index
    %c0_0 = arith.constant 0 : index
    %0 = vector.load %arg1[%c0, %c0_0] : memref<32x24xf32, #tpu.memory_space<vmem>>, vector<32x24xf32>
    %c0_1 = arith.constant 0 : index
    %c0_2 = arith.constant 0 : index
    %1 = vector.load %arg2[%c0_1, %c0_2] : memref<16x12xf32, #tpu.memory_space<vmem>>, vector<16x12xf32>
    %c0_3 = arith.constant 0 : index
    %c0_4 = arith.constant 0 : index
    %2 = vector.load %arg3[%c0_3, %c0_4] : memref<128x16xf32, #tpu.memory_space<vmem>>, vector<128x16xf32>
    %c0_5 = arith.constant 0 : index
    %c0_6 = arith.constant 0 : index
    %3 = vector.load %arg4[%c0_5, %c0_6] : memref<128x32xf32, #tpu.memory_space<vmem>>, vector<128x32xf32>
    %c0_7 = arith.constant 0 : index
    %c0_8 = arith.constant 0 : index
    %4 = vector.load %arg5[%c0_7, %c0_8] : memref<24x32xf32, #tpu.memory_space<vmem>>, vector<24x32xf32>
    %cst = arith.constant dense<0.000000e+00> : vector<32x32xf32>
    %5 = tpu.matmul %0, %4, %cst {dimension_numbers = #tpu.dot_dimension_numbers<[1], [0], [0], [1], [0, 0, 1, 1], [], []>} : vector<32x24xf32>, vector<24x32xf32>, vector<32x32xf32> -> vector<32x32xf32>
    %c0_9 = arith.constant 0 : index
    %c0_10 = arith.constant 0 : index
    %6 = vector.load %arg6[%c0_9, %c0_10] : memref<1x32xf32, #tpu.memory_space<vmem>>, vector<1x32xf32>
    %7 = vector.broadcast %6 : vector<1x32xf32> to vector<32x32xf32>
    %8 = arith.addf %5, %7 : vector<32x32xf32>
    %c0_11 = arith.constant 0 : index
    %c0_12 = arith.constant 0 : index
    %9 = vector.load %arg7[%c0_11, %c0_12] : memref<12x32xf32, #tpu.memory_space<vmem>>, vector<12x32xf32>
    %cst_13 = arith.constant dense<0.000000e+00> : vector<16x32xf32>
    %10 = tpu.matmul %1, %9, %cst_13 {dimension_numbers = #tpu.dot_dimension_numbers<[1], [0], [0], [1], [0, 0, 1, 1], [], []>} : vector<16x12xf32>, vector<12x32xf32>, vector<16x32xf32> -> vector<16x32xf32>
    %c0_14 = arith.constant 0 : index
    %c0_15 = arith.constant 0 : index
    %11 = vector.load %arg8[%c0_14, %c0_15] : memref<1x32xf32, #tpu.memory_space<vmem>>, vector<1x32xf32>
    %12 = vector.broadcast %11 : vector<1x32xf32> to vector<16x32xf32>
    %13 = arith.addf %10, %12 : vector<16x32xf32>
    %c0_16 = arith.constant 0 : index
    %c0_17 = arith.constant 0 : index
    %14 = vector.load %arg18[%c0_16, %c0_17] : memref<16x32xf32, #tpu.memory_space<vmem>>, vector<16x32xf32>
    tpu.vector_store %arg18[%c0_16, %c0_17], %13 {strides = array<i32>} : memref<16x32xf32, #tpu.memory_space<vmem>>, vector<16x32xf32>,
    %c0_18 = arith.constant 0 : index
    %c0_19 = arith.constant 0 : index
    %15 = vector.load %arg11[%c0_18, %c0_19] : memref<32x192xf32, #tpu.memory_space<vmem>>, vector<32x192xf32>
    %cst_20 = arith.constant dense<0.000000e+00> : vector<16x192xf32>
    %16 = tpu.matmul %13, %15, %cst_20 {dimension_numbers = #tpu.dot_dimension_numbers<[1], [0], [0], [1], [0, 0, 1, 1], [], []>} : vector<16x32xf32>, vector<32x192xf32>, vector<16x192xf32> -> vector<16x192xf32>
    %c0_21 = arith.constant 0 : index
    %c0_22 = arith.constant 0 : index
    %17 = vector.load %arg12[%c0_21, %c0_22] : memref<1x192xf32, #tpu.memory_space<vmem>>, vector<1x192xf32>
    %18 = vector.broadcast %17 : vector<1x192xf32> to vector<16x192xf32>
    %19 = arith.addf %16, %18 : vector<16x192xf32>
    %c0_23 = arith.constant 0 : index
    %c0_24 = arith.constant 0 : index
    %c0_25 = arith.constant 0 : index
    %20 = vector.load %arg9[%c0_23, %c0_24, %c0_25] : memref<3x32x32xf32, #tpu.memory_space<vmem>>, vector<1x32x32xf32>
    %21 = vector.shape_cast %20 : vector<1x32x32xf32> to vector<32x32xf32>
    %c0_26 = arith.constant 0 : index
    %c0_27 = arith.constant 0 : index
    %c0_28 = arith.constant 0 : index
    %22 = vector.load %arg10[%c0_26, %c0_27, %c0_28] : memref<3x1x32xf32, #tpu.memory_space<vmem>>, vector<1x1x32xf32>
    %23 = vector.shape_cast %22 : vector<1x1x32xf32> to vector<1x32xf32>
    %c0_29 = arith.constant 0 : index
    %c0_30 = arith.constant 0 : index
    %c0_31 = arith.constant 0 : index
    %24 = vector.load %arg13[%c0_29, %c0_30, %c0_31] : memref<3x32x32xf32, #tpu.memory_space<vmem>>, vector<1x32x32xf32>
    %25 = vector.shape_cast %24 : vector<1x32x32xf32> to vector<32x32xf32>
    %c0_32 = arith.constant 0 : index
    %c0_33 = arith.constant 0 : index
    %c0_34 = arith.constant 0 : index
    %26 = vector.load %arg14[%c0_32, %c0_33, %c0_34] : memref<3x1x32xf32, #tpu.memory_space<vmem>>, vector<1x1x32xf32>
    %27 = vector.shape_cast %26 : vector<1x1x32xf32> to vector<1x32xf32>
    %c0_35 = arith.constant 0 : index
    %c0_36 = arith.constant 0 : index
    %c0_37 = arith.constant 0 : index
    %28 = vector.load %arg15[%c0_35, %c0_36, %c0_37] : memref<3x1x32xf32, #tpu.memory_space<vmem>>, vector<1x1x32xf32>
    %29 = vector.shape_cast %28 : vector<1x1x32xf32> to vector<1x32xf32>
    %c0_38 = arith.constant 0 : index
    %c0_39 = arith.constant 0 : index
    %c0_40 = arith.constant 0 : index
    %30 = vector.load %arg16[%c0_38, %c0_39, %c0_40] : memref<3x1x32xf32, #tpu.memory_space<vmem>>, vector<1x1x32xf32>
    %31 = vector.shape_cast %30 : vector<1x1x32xf32> to vector<1x32xf32>
    %32 = vector.extract_strided_slice %19 {offsets = [0, 0], sizes = [16, 32], strides = [1, 1]} : vector<16x192xf32> to vector<16x32xf32>
    %33 = vector.extract_strided_slice %19 {offsets = [0, 96], sizes = [16, 32], strides = [1, 1]} : vector<16x192xf32> to vector<16x32xf32>
    %cst_41 = arith.constant dense<0.000000e+00> : vector<32x32xf32>
    %34 = tpu.matmul %8, %21, %cst_41 {dimension_numbers = #tpu.dot_dimension_numbers<[1], [0], [0], [1], [0, 0, 1, 1], [], []>} : vector<32x32xf32>, vector<32x32xf32>, vector<32x32xf32> -> vector<32x32xf32>
    %35 = vector.broadcast %23 : vector<1x32xf32> to vector<32x32xf32>
    %36 = arith.addf %34, %35 : vector<32x32xf32>
    %37 = tpu.concatenate %36, %36, %36, %36 in 0 : vector<32x32xf32>, vector<32x32xf32>, vector<32x32xf32>, vector<32x32xf32> -> vector<128x32xf32>
    %38 = arith.mulf %37, %3 : vector<128x32xf32>
    %cst_42 = arith.constant dense<0.000000e+00> : vector<128x16xf32>
    %39 = tpu.matmul %38, %32, %cst_42 {dimension_numbers = #tpu.dot_dimension_numbers<[1], [1], [0], [0], [0, 0, 1, 0], [], []>} : vector<128x32xf32>, vector<16x32xf32>, vector<128x16xf32> -> vector<128x16xf32>
    %cst_43 = arith.constant 0.353553385 : f32
    %40 = vector.broadcast %cst_43 : f32 to vector<128x16xf32>
    %41 = arith.mulf %39, %40 : vector<128x16xf32>
    %42 = arith.addf %41, %2 : vector<128x16xf32>
    %cst_44 = arith.constant dense<0xFF800000> : vector<128xf32>
    %43 = vector.multi_reduction <maximumf>, %42, %cst_44 [1] : vector<128x16xf32> to vector<128xf32>
    %44 = vector.shape_cast %43 : vector<128xf32> to vector<128x1xf32>
    %45 = vector.broadcast %44 : vector<128x1xf32> to vector<128x16xf32>
    %46 = arith.subf %42, %45 : vector<128x16xf32>
    %47 = math.exp %46 : vector<128x16xf32>
    %cst_45 = arith.constant dense<0.000000e+00> : vector<128xf32>
    %48 = vector.multi_reduction <add>, %47, %cst_45 [1] : vector<128x16xf32> to vector<128xf32>
    %49 = vector.shape_cast %48 : vector<128xf32> to vector<128x1xf32>
    %50 = tpu.reciprocal %49 : vector<128x1xf32> -> vector<128x1xf32>
    %51 = vector.broadcast %50 : vector<128x1xf32> to vector<128x16xf32>
    %52 = arith.mulf %47, %51 : vector<128x16xf32>
    %cst_46 = arith.constant dense<0.000000e+00> : vector<128x32xf32>
    %53 = tpu.matmul %52, %33, %cst_46 {dimension_numbers = #tpu.dot_dimension_numbers<[1], [0], [0], [1], [0, 0, 1, 1], [], []>} : vector<128x16xf32>, vector<16x32xf32>, vector<128x32xf32> -> vector<128x32xf32>
    %54 = arith.mulf %53, %3 : vector<128x32xf32>
    %55 = vector.extract_strided_slice %54 {offsets = [0, 0], sizes = [32, 32], strides = [1, 1]} : vector<128x32xf32> to vector<32x32xf32>
    %56 = vector.extract_strided_slice %54 {offsets = [32, 0], sizes = [32, 32], strides = [1, 1]} : vector<128x32xf32> to vector<32x32xf32>
    %57 = arith.addf %55, %56 : vector<32x32xf32>
    %58 = vector.extract_strided_slice %54 {offsets = [64, 0], sizes = [32, 32], strides = [1, 1]} : vector<128x32xf32> to vector<32x32xf32>
    %59 = arith.addf %57, %58 : vector<32x32xf32>
    %60 = vector.extract_strided_slice %54 {offsets = [96, 0], sizes = [32, 32], strides = [1, 1]} : vector<128x32xf32> to vector<32x32xf32>
    %61 = arith.addf %59, %60 : vector<32x32xf32>
    %cst_47 = arith.constant dense<0.000000e+00> : vector<32x32xf32>
    %62 = tpu.matmul %61, %25, %cst_47 {dimension_numbers = #tpu.dot_dimension_numbers<[1], [0], [0], [1], [0, 0, 1, 1], [], []>} : vector<32x32xf32>, vector<32x32xf32>, vector<32x32xf32> -> vector<32x32xf32>
    %63 = vector.broadcast %27 : vector<1x32xf32> to vector<32x32xf32>
    %64 = arith.addf %62, %63 : vector<32x32xf32>
    %65 = arith.addf %8, %64 : vector<32x32xf32>
    %cst_48 = arith.constant dense<0.000000e+00> : vector<32xf32>
    %66 = vector.multi_reduction <add>, %65, %cst_48 [1] : vector<32x32xf32> to vector<32xf32>
    %67 = vector.shape_cast %66 : vector<32xf32> to vector<32x1xf32>
    %cst_49 = arith.constant 3.200000e+01 : f32
    %68 = vector.broadcast %cst_49 : f32 to vector<32x1xf32>
    %69 = arith.divf %67, %68 : vector<32x1xf32>
    %70 = vector.broadcast %69 : vector<32x1xf32> to vector<32x32xf32>
    %71 = arith.subf %65, %70 : vector<32x32xf32>
    %72 = vector.broadcast %69 : vector<32x1xf32> to vector<32x32xf32>
    %73 = arith.subf %65, %72 : vector<32x32xf32>
    %74 = arith.mulf %71, %73 : vector<32x32xf32>
    %cst_50 = arith.constant dense<0.000000e+00> : vector<32xf32>
    %75 = vector.multi_reduction <add>, %74, %cst_50 [1] : vector<32x32xf32> to vector<32xf32>
    %76 = vector.shape_cast %75 : vector<32xf32> to vector<32x1xf32>
    %cst_51 = arith.constant 3.200000e+01 : f32
    %77 = vector.broadcast %cst_51 : f32 to vector<32x1xf32>
    %78 = arith.divf %76, %77 : vector<32x1xf32>
    %79 = vector.broadcast %69 : vector<32x1xf32> to vector<32x32xf32>
    %80 = arith.subf %65, %79 : vector<32x32xf32>
    %cst_52 = arith.constant 9.99999974E-6 : f32
    %81 = vector.broadcast %cst_52 : f32 to vector<32x1xf32>
    %82 = arith.addf %78, %81 : vector<32x1xf32>
    %83 = math.rsqrt %82 : vector<32x1xf32>
    %84 = vector.broadcast %83 : vector<32x1xf32> to vector<32x32xf32>
    %85 = arith.mulf %80, %84 : vector<32x32xf32>
    %86 = vector.broadcast %29 : vector<1x32xf32> to vector<32x32xf32>
    %87 = arith.mulf %85, %86 : vector<32x32xf32>
    %88 = vector.broadcast %31 : vector<1x32xf32> to vector<32x32xf32>
    %89 = arith.addf %87, %88 : vector<32x32xf32>
    %c1 = arith.constant 1 : index
    %c0_53 = arith.constant 0 : index
    %c0_54 = arith.constant 0 : index
    %90 = vector.load %arg9[%c1, %c0_53, %c0_54] : memref<3x32x32xf32, #tpu.memory_space<vmem>>, vector<1x32x32xf32>
    %91 = vector.shape_cast %90 : vector<1x32x32xf32> to vector<32x32xf32>
    %c1_55 = arith.constant 1 : index
    %c0_56 = arith.constant 0 : index
    %c0_57 = arith.constant 0 : index
    %92 = vector.load %arg10[%c1_55, %c0_56, %c0_57] : memref<3x1x32xf32, #tpu.memory_space<vmem>>, vector<1x1x32xf32>
    %93 = vector.shape_cast %92 : vector<1x1x32xf32> to vector<1x32xf32>
    %c1_58 = arith.constant 1 : index
    %c0_59 = arith.constant 0 : index
    %c0_60 = arith.constant 0 : index
    %94 = vector.load %arg13[%c1_58, %c0_59, %c0_60] : memref<3x32x32xf32, #tpu.memory_space<vmem>>, vector<1x32x32xf32>
    %95 = vector.shape_cast %94 : vector<1x32x32xf32> to vector<32x32xf32>
    %c1_61 = arith.constant 1 : index
    %c0_62 = arith.constant 0 : index
    %c0_63 = arith.constant 0 : index
    %96 = vector.load %arg14[%c1_61, %c0_62, %c0_63] : memref<3x1x32xf32, #tpu.memory_space<vmem>>, vector<1x1x32xf32>
    %97 = vector.shape_cast %96 : vector<1x1x32xf32> to vector<1x32xf32>
    %c1_64 = arith.constant 1 : index
    %c0_65 = arith.constant 0 : index
    %c0_66 = arith.constant 0 : index
    %98 = vector.load %arg15[%c1_64, %c0_65, %c0_66] : memref<3x1x32xf32, #tpu.memory_space<vmem>>, vector<1x1x32xf32>
    %99 = vector.shape_cast %98 : vector<1x1x32xf32> to vector<1x32xf32>
    %c1_67 = arith.constant 1 : index
    %c0_68 = arith.constant 0 : index
    %c0_69 = arith.constant 0 : index
    %100 = vector.load %arg16[%c1_67, %c0_68, %c0_69] : memref<3x1x32xf32, #tpu.memory_space<vmem>>, vector<1x1x32xf32>
    %101 = vector.shape_cast %100 : vector<1x1x32xf32> to vector<1x32xf32>
    %102 = vector.extract_strided_slice %19 {offsets = [0, 32], sizes = [16, 32], strides = [1, 1]} : vector<16x192xf32> to vector<16x32xf32>
    %103 = vector.extract_strided_slice %19 {offsets = [0, 128], sizes = [16, 32], strides = [1, 1]} : vector<16x192xf32> to vector<16x32xf32>
    %cst_70 = arith.constant dense<0.000000e+00> : vector<32x32xf32>
    %104 = tpu.matmul %89, %91, %cst_70 {dimension_numbers = #tpu.dot_dimension_numbers<[1], [0], [0], [1], [0, 0, 1, 1], [], []>} : vector<32x32xf32>, vector<32x32xf32>, vector<32x32xf32> -> vector<32x32xf32>
    %105 = vector.broadcast %93 : vector<1x32xf32> to vector<32x32xf32>
    %106 = arith.addf %104, %105 : vector<32x32xf32>
    %107 = tpu.concatenate %106, %106, %106, %106 in 0 : vector<32x32xf32>, vector<32x32xf32>, vector<32x32xf32>, vector<32x32xf32> -> vector<128x32xf32>
    %108 = arith.mulf %107, %3 : vector<128x32xf32>
    %cst_71 = arith.constant dense<0.000000e+00> : vector<128x16xf32>
    %109 = tpu.matmul %108, %102, %cst_71 {dimension_numbers = #tpu.dot_dimension_numbers<[1], [1], [0], [0], [0, 0, 1, 0], [], []>} : vector<128x32xf32>, vector<16x32xf32>, vector<128x16xf32> -> vector<128x16xf32>
    %cst_72 = arith.constant 0.353553385 : f32
    %110 = vector.broadcast %cst_72 : f32 to vector<128x16xf32>
    %111 = arith.mulf %109, %110 : vector<128x16xf32>
    %112 = arith.addf %111, %2 : vector<128x16xf32>
    %cst_73 = arith.constant dense<0xFF800000> : vector<128xf32>
    %113 = vector.multi_reduction <maximumf>, %112, %cst_73 [1] : vector<128x16xf32> to vector<128xf32>
    %114 = vector.shape_cast %113 : vector<128xf32> to vector<128x1xf32>
    %115 = vector.broadcast %114 : vector<128x1xf32> to vector<128x16xf32>
    %116 = arith.subf %112, %115 : vector<128x16xf32>
    %117 = math.exp %116 : vector<128x16xf32>
    %cst_74 = arith.constant dense<0.000000e+00> : vector<128xf32>
    %118 = vector.multi_reduction <add>, %117, %cst_74 [1] : vector<128x16xf32> to vector<128xf32>
    %119 = vector.shape_cast %118 : vector<128xf32> to vector<128x1xf32>
    %120 = tpu.reciprocal %119 : vector<128x1xf32> -> vector<128x1xf32>
    %121 = vector.broadcast %120 : vector<128x1xf32> to vector<128x16xf32>
    %122 = arith.mulf %117, %121 : vector<128x16xf32>
    %cst_75 = arith.constant dense<0.000000e+00> : vector<128x32xf32>
    %123 = tpu.matmul %122, %103, %cst_75 {dimension_numbers = #tpu.dot_dimension_numbers<[1], [0], [0], [1], [0, 0, 1, 1], [], []>} : vector<128x16xf32>, vector<16x32xf32>, vector<128x32xf32> -> vector<128x32xf32>
    %124 = arith.mulf %123, %3 : vector<128x32xf32>
    %125 = vector.extract_strided_slice %124 {offsets = [0, 0], sizes = [32, 32], strides = [1, 1]} : vector<128x32xf32> to vector<32x32xf32>
    %126 = vector.extract_strided_slice %124 {offsets = [32, 0], sizes = [32, 32], strides = [1, 1]} : vector<128x32xf32> to vector<32x32xf32>
    %127 = arith.addf %125, %126 : vector<32x32xf32>
    %128 = vector.extract_strided_slice %124 {offsets = [64, 0], sizes = [32, 32], strides = [1, 1]} : vector<128x32xf32> to vector<32x32xf32>
    %129 = arith.addf %127, %128 : vector<32x32xf32>
    %130 = vector.extract_strided_slice %124 {offsets = [96, 0], sizes = [32, 32], strides = [1, 1]} : vector<128x32xf32> to vector<32x32xf32>
    %131 = arith.addf %129, %130 : vector<32x32xf32>
    %cst_76 = arith.constant dense<0.000000e+00> : vector<32x32xf32>
    %132 = tpu.matmul %131, %95, %cst_76 {dimension_numbers = #tpu.dot_dimension_numbers<[1], [0], [0], [1], [0, 0, 1, 1], [], []>} : vector<32x32xf32>, vector<32x32xf32>, vector<32x32xf32> -> vector<32x32xf32>
    %133 = vector.broadcast %97 : vector<1x32xf32> to vector<32x32xf32>
    %134 = arith.addf %132, %133 : vector<32x32xf32>
    %135 = arith.addf %89, %134 : vector<32x32xf32>
    %cst_77 = arith.constant dense<0.000000e+00> : vector<32xf32>
    %136 = vector.multi_reduction <add>, %135, %cst_77 [1] : vector<32x32xf32> to vector<32xf32>
    %137 = vector.shape_cast %136 : vector<32xf32> to vector<32x1xf32>
    %cst_78 = arith.constant 3.200000e+01 : f32
    %138 = vector.broadcast %cst_78 : f32 to vector<32x1xf32>
    %139 = arith.divf %137, %138 : vector<32x1xf32>
    %140 = vector.broadcast %139 : vector<32x1xf32> to vector<32x32xf32>
    %141 = arith.subf %135, %140 : vector<32x32xf32>
    %142 = vector.broadcast %139 : vector<32x1xf32> to vector<32x32xf32>
    %143 = arith.subf %135, %142 : vector<32x32xf32>
    %144 = arith.mulf %141, %143 : vector<32x32xf32>
    %cst_79 = arith.constant dense<0.000000e+00> : vector<32xf32>
    %145 = vector.multi_reduction <add>, %144, %cst_79 [1] : vector<32x32xf32> to vector<32xf32>
    %146 = vector.shape_cast %145 : vector<32xf32> to vector<32x1xf32>
    %cst_80 = arith.constant 3.200000e+01 : f32
    %147 = vector.broadcast %cst_80 : f32 to vector<32x1xf32>
    %148 = arith.divf %146, %147 : vector<32x1xf32>
    %149 = vector.broadcast %139 : vector<32x1xf32> to vector<32x32xf32>
    %150 = arith.subf %135, %149 : vector<32x32xf32>
    %cst_81 = arith.constant 9.99999974E-6 : f32
    %151 = vector.broadcast %cst_81 : f32 to vector<32x1xf32>
    %152 = arith.addf %148, %151 : vector<32x1xf32>
    %153 = math.rsqrt %152 : vector<32x1xf32>
    %154 = vector.broadcast %153 : vector<32x1xf32> to vector<32x32xf32>
    %155 = arith.mulf %150, %154 : vector<32x32xf32>
    %156 = vector.broadcast %99 : vector<1x32xf32> to vector<32x32xf32>
    %157 = arith.mulf %155, %156 : vector<32x32xf32>
    %158 = vector.broadcast %101 : vector<1x32xf32> to vector<32x32xf32>
    %159 = arith.addf %157, %158 : vector<32x32xf32>
    %c2 = arith.constant 2 : index
    %c0_82 = arith.constant 0 : index
    %c0_83 = arith.constant 0 : index
    %160 = vector.load %arg9[%c2, %c0_82, %c0_83] : memref<3x32x32xf32, #tpu.memory_space<vmem>>, vector<1x32x32xf32>
    %161 = vector.shape_cast %160 : vector<1x32x32xf32> to vector<32x32xf32>
    %c2_84 = arith.constant 2 : index
    %c0_85 = arith.constant 0 : index
    %c0_86 = arith.constant 0 : index
    %162 = vector.load %arg10[%c2_84, %c0_85, %c0_86] : memref<3x1x32xf32, #tpu.memory_space<vmem>>, vector<1x1x32xf32>
    %163 = vector.shape_cast %162 : vector<1x1x32xf32> to vector<1x32xf32>
    %c2_87 = arith.constant 2 : index
    %c0_88 = arith.constant 0 : index
    %c0_89 = arith.constant 0 : index
    %164 = vector.load %arg13[%c2_87, %c0_88, %c0_89] : memref<3x32x32xf32, #tpu.memory_space<vmem>>, vector<1x32x32xf32>
    %165 = vector.shape_cast %164 : vector<1x32x32xf32> to vector<32x32xf32>
    %c2_90 = arith.constant 2 : index
    %c0_91 = arith.constant 0 : index
    %c0_92 = arith.constant 0 : index
    %166 = vector.load %arg14[%c2_90, %c0_91, %c0_92] : memref<3x1x32xf32, #tpu.memory_space<vmem>>, vector<1x1x32xf32>
    %167 = vector.shape_cast %166 : vector<1x1x32xf32> to vector<1x32xf32>
    %c2_93 = arith.constant 2 : index
    %c0_94 = arith.constant 0 : index
    %c0_95 = arith.constant 0 : index
    %168 = vector.load %arg15[%c2_93, %c0_94, %c0_95] : memref<3x1x32xf32, #tpu.memory_space<vmem>>, vector<1x1x32xf32>
    %169 = vector.shape_cast %168 : vector<1x1x32xf32> to vector<1x32xf32>
    %c2_96 = arith.constant 2 : index
    %c0_97 = arith.constant 0 : index
    %c0_98 = arith.constant 0 : index
    %170 = vector.load %arg16[%c2_96, %c0_97, %c0_98] : memref<3x1x32xf32, #tpu.memory_space<vmem>>, vector<1x1x32xf32>
    %171 = vector.shape_cast %170 : vector<1x1x32xf32> to vector<1x32xf32>
    %172 = vector.extract_strided_slice %19 {offsets = [0, 64], sizes = [16, 32], strides = [1, 1]} : vector<16x192xf32> to vector<16x32xf32>
    %173 = vector.extract_strided_slice %19 {offsets = [0, 160], sizes = [16, 32], strides = [1, 1]} : vector<16x192xf32> to vector<16x32xf32>
    %cst_99 = arith.constant dense<0.000000e+00> : vector<32x32xf32>
    %174 = tpu.matmul %159, %161, %cst_99 {dimension_numbers = #tpu.dot_dimension_numbers<[1], [0], [0], [1], [0, 0, 1, 1], [], []>} : vector<32x32xf32>, vector<32x32xf32>, vector<32x32xf32> -> vector<32x32xf32>
    %175 = vector.broadcast %163 : vector<1x32xf32> to vector<32x32xf32>
    %176 = arith.addf %174, %175 : vector<32x32xf32>
    %177 = tpu.concatenate %176, %176, %176, %176 in 0 : vector<32x32xf32>, vector<32x32xf32>, vector<32x32xf32>, vector<32x32xf32> -> vector<128x32xf32>
    %178 = arith.mulf %177, %3 : vector<128x32xf32>
    %cst_100 = arith.constant dense<0.000000e+00> : vector<128x16xf32>
    %179 = tpu.matmul %178, %172, %cst_100 {dimension_numbers = #tpu.dot_dimension_numbers<[1], [1], [0], [0], [0, 0, 1, 0], [], []>} : vector<128x32xf32>, vector<16x32xf32>, vector<128x16xf32> -> vector<128x16xf32>
    %cst_101 = arith.constant 0.353553385 : f32
    %180 = vector.broadcast %cst_101 : f32 to vector<128x16xf32>
    %181 = arith.mulf %179, %180 : vector<128x16xf32>
    %182 = arith.addf %181, %2 : vector<128x16xf32>
    %cst_102 = arith.constant dense<0xFF800000> : vector<128xf32>
    %183 = vector.multi_reduction <maximumf>, %182, %cst_102 [1] : vector<128x16xf32> to vector<128xf32>
    %184 = vector.shape_cast %183 : vector<128xf32> to vector<128x1xf32>
    %185 = vector.broadcast %184 : vector<128x1xf32> to vector<128x16xf32>
    %186 = arith.subf %182, %185 : vector<128x16xf32>
    %187 = math.exp %186 : vector<128x16xf32>
    %cst_103 = arith.constant dense<0.000000e+00> : vector<128xf32>
    %188 = vector.multi_reduction <add>, %187, %cst_103 [1] : vector<128x16xf32> to vector<128xf32>
    %189 = vector.shape_cast %188 : vector<128xf32> to vector<128x1xf32>
    %190 = tpu.reciprocal %189 : vector<128x1xf32> -> vector<128x1xf32>
    %191 = vector.broadcast %190 : vector<128x1xf32> to vector<128x16xf32>
    %192 = arith.mulf %187, %191 : vector<128x16xf32>
    %cst_104 = arith.constant dense<0.000000e+00> : vector<128x32xf32>
    %193 = tpu.matmul %192, %173, %cst_104 {dimension_numbers = #tpu.dot_dimension_numbers<[1], [0], [0], [1], [0, 0, 1, 1], [], []>} : vector<128x16xf32>, vector<16x32xf32>, vector<128x32xf32> -> vector<128x32xf32>
    %194 = arith.mulf %193, %3 : vector<128x32xf32>
    %195 = vector.extract_strided_slice %194 {offsets = [0, 0], sizes = [32, 32], strides = [1, 1]} : vector<128x32xf32> to vector<32x32xf32>
    %196 = vector.extract_strided_slice %194 {offsets = [32, 0], sizes = [32, 32], strides = [1, 1]} : vector<128x32xf32> to vector<32x32xf32>
    %197 = arith.addf %195, %196 : vector<32x32xf32>
    %198 = vector.extract_strided_slice %194 {offsets = [64, 0], sizes = [32, 32], strides = [1, 1]} : vector<128x32xf32> to vector<32x32xf32>
    %199 = arith.addf %197, %198 : vector<32x32xf32>
    %200 = vector.extract_strided_slice %194 {offsets = [96, 0], sizes = [32, 32], strides = [1, 1]} : vector<128x32xf32> to vector<32x32xf32>
    %201 = arith.addf %199, %200 : vector<32x32xf32>
    %cst_105 = arith.constant dense<0.000000e+00> : vector<32x32xf32>
    %202 = tpu.matmul %201, %165, %cst_105 {dimension_numbers = #tpu.dot_dimension_numbers<[1], [0], [0], [1], [0, 0, 1, 1], [], []>} : vector<32x32xf32>, vector<32x32xf32>, vector<32x32xf32> -> vector<32x32xf32>
    %203 = vector.broadcast %167 : vector<1x32xf32> to vector<32x32xf32>
    %204 = arith.addf %202, %203 : vector<32x32xf32>
    %205 = arith.addf %159, %204 : vector<32x32xf32>
    %cst_106 = arith.constant dense<0.000000e+00> : vector<32xf32>
    %206 = vector.multi_reduction <add>, %205, %cst_106 [1] : vector<32x32xf32> to vector<32xf32>
    %207 = vector.shape_cast %206 : vector<32xf32> to vector<32x1xf32>
    %cst_107 = arith.constant 3.200000e+01 : f32
    %208 = vector.broadcast %cst_107 : f32 to vector<32x1xf32>
    %209 = arith.divf %207, %208 : vector<32x1xf32>
    %210 = vector.broadcast %209 : vector<32x1xf32> to vector<32x32xf32>
    %211 = arith.subf %205, %210 : vector<32x32xf32>
    %212 = vector.broadcast %209 : vector<32x1xf32> to vector<32x32xf32>
    %213 = arith.subf %205, %212 : vector<32x32xf32>
    %214 = arith.mulf %211, %213 : vector<32x32xf32>
    %cst_108 = arith.constant dense<0.000000e+00> : vector<32xf32>
    %215 = vector.multi_reduction <add>, %214, %cst_108 [1] : vector<32x32xf32> to vector<32xf32>
    %216 = vector.shape_cast %215 : vector<32xf32> to vector<32x1xf32>
    %cst_109 = arith.constant 3.200000e+01 : f32
    %217 = vector.broadcast %cst_109 : f32 to vector<32x1xf32>
    %218 = arith.divf %216, %217 : vector<32x1xf32>
    %219 = vector.broadcast %209 : vector<32x1xf32> to vector<32x32xf32>
    %220 = arith.subf %205, %219 : vector<32x32xf32>
    %cst_110 = arith.constant 9.99999974E-6 : f32
    %221 = vector.broadcast %cst_110 : f32 to vector<32x1xf32>
    %222 = arith.addf %218, %221 : vector<32x1xf32>
    %223 = math.rsqrt %222 : vector<32x1xf32>
    %224 = vector.broadcast %223 : vector<32x1xf32> to vector<32x32xf32>
    %225 = arith.mulf %220, %224 : vector<32x32xf32>
    %226 = vector.broadcast %169 : vector<1x32xf32> to vector<32x32xf32>
    %227 = arith.mulf %225, %226 : vector<32x32xf32>
    %228 = vector.broadcast %171 : vector<1x32xf32> to vector<32x32xf32>
    %229 = arith.addf %227, %228 : vector<32x32xf32>
    %c0_111 = arith.constant 0 : index
    %c0_112 = arith.constant 0 : index
    %230 = vector.load %arg17[%c0_111, %c0_112] : memref<32x32xf32, #tpu.memory_space<vmem>>, vector<32x32xf32>
    tpu.vector_store %arg17[%c0_111, %c0_112], %229 {strides = array<i32>} : memref<32x32xf32, #tpu.memory_space<vmem>>, vector<32x32xf32>,
    return
  }
  func.func @transform_0(%arg0: i32) -> (i32, i32) {
    %c0_i32 = arith.constant 0 : i32
    %c0_i32_0 = arith.constant 0 : i32
    %c0_i32_1 = arith.constant 0 : i32
    return %c0_i32, %c0_i32_0 : i32, i32
  }
  func.func @transform_1(%arg0: i32) -> (i32, i32) {
    %c0_i32 = arith.constant 0 : i32
    %c0_i32_0 = arith.constant 0 : i32
    %c0_i32_1 = arith.constant 0 : i32
    return %c0_i32, %c0_i32_0 : i32, i32
  }
  func.func @transform_2(%arg0: i32) -> (i32, i32) {
    %c0_i32 = arith.constant 0 : i32
    %c0_i32_0 = arith.constant 0 : i32
    %c0_i32_1 = arith.constant 0 : i32
    return %c0_i32, %c0_i32_0 : i32, i32
  }
  func.func @transform_3(%arg0: i32) -> (i32, i32) {
    %c0_i32 = arith.constant 0 : i32
    %c0_i32_0 = arith.constant 0 : i32
    %c0_i32_1 = arith.constant 0 : i32
    return %c0_i32, %c0_i32_0 : i32, i32
  }
  func.func @transform_4(%arg0: i32) -> (i32, i32) {
    %c0_i32 = arith.constant 0 : i32
    %c0_i32_0 = arith.constant 0 : i32
    %c0_i32_1 = arith.constant 0 : i32
    return %c0_i32, %c0_i32_0 : i32, i32
  }
  func.func @transform_5(%arg0: i32) -> (i32, i32) {
    %c0_i32 = arith.constant 0 : i32
    %c0_i32_0 = arith.constant 0 : i32
    %c0_i32_1 = arith.constant 0 : i32
    return %c0_i32, %c0_i32_0 : i32, i32
  }
  func.func @transform_6(%arg0: i32) -> (i32, i32) {
    %c0_i32 = arith.constant 0 : i32
    %c0_i32_0 = arith.constant 0 : i32
    %c0_i32_1 = arith.constant 0 : i32
    return %c0_i32, %c0_i32_0 : i32, i32
  }
  func.func @transform_7(%arg0: i32) -> (i32, i32) {
    %c0_i32 = arith.constant 0 : i32
    %c0_i32_0 = arith.constant 0 : i32
    %c0_i32_1 = arith.constant 0 : i32
    return %c0_i32, %c0_i32_0 : i32, i32
  }
  func.func @transform_8(%arg0: i32) -> (i32, i32, i32) {
    %c0_i32 = arith.constant 0 : i32
    %c0_i32_0 = arith.constant 0 : i32
    %c0_i32_1 = arith.constant 0 : i32
    %c0_i32_2 = arith.constant 0 : i32
    return %c0_i32, %c0_i32_0, %c0_i32_1 : i32, i32, i32
  }
  func.func @transform_9(%arg0: i32) -> (i32, i32, i32) {
    %c0_i32 = arith.constant 0 : i32
    %c0_i32_0 = arith.constant 0 : i32
    %c0_i32_1 = arith.constant 0 : i32
    %c0_i32_2 = arith.constant 0 : i32
    return %c0_i32, %c0_i32_0, %c0_i32_1 : i32, i32, i32
  }
  func.func @transform_10(%arg0: i32) -> (i32, i32) {
    %c0_i32 = arith.constant 0 : i32
    %c0_i32_0 = arith.constant 0 : i32
    %c0_i32_1 = arith.constant 0 : i32
    return %c0_i32, %c0_i32_0 : i32, i32
  }
  func.func @transform_11(%arg0: i32) -> (i32, i32) {
    %c0_i32 = arith.constant 0 : i32
    %c0_i32_0 = arith.constant 0 : i32
    %c0_i32_1 = arith.constant 0 : i32
    return %c0_i32, %c0_i32_0 : i32, i32
  }
  func.func @transform_12(%arg0: i32) -> (i32, i32, i32) {
    %c0_i32 = arith.constant 0 : i32
    %c0_i32_0 = arith.constant 0 : i32
    %c0_i32_1 = arith.constant 0 : i32
    %c0_i32_2 = arith.constant 0 : i32
    return %c0_i32, %c0_i32_0, %c0_i32_1 : i32, i32, i32
  }
  func.func @transform_13(%arg0: i32) -> (i32, i32, i32) {
    %c0_i32 = arith.constant 0 : i32
    %c0_i32_0 = arith.constant 0 : i32
    %c0_i32_1 = arith.constant 0 : i32
    %c0_i32_2 = arith.constant 0 : i32
    return %c0_i32, %c0_i32_0, %c0_i32_1 : i32, i32, i32
  }
  func.func @transform_14(%arg0: i32) -> (i32, i32, i32) {
    %c0_i32 = arith.constant 0 : i32
    %c0_i32_0 = arith.constant 0 : i32
    %c0_i32_1 = arith.constant 0 : i32
    %c0_i32_2 = arith.constant 0 : i32
    return %c0_i32, %c0_i32_0, %c0_i32_1 : i32, i32, i32
  }
  func.func @transform_15(%arg0: i32) -> (i32, i32, i32) {
    %c0_i32 = arith.constant 0 : i32
    %c0_i32_0 = arith.constant 0 : i32
    %c0_i32_1 = arith.constant 0 : i32
    %c0_i32_2 = arith.constant 0 : i32
    return %c0_i32, %c0_i32_0, %c0_i32_1 : i32, i32, i32
  }
  func.func @transform_16(%arg0: i32) -> (i32, i32) {
    %c0_i32 = arith.constant 0 : i32
    %c0_i32_0 = arith.constant 0 : i32
    %c0_i32_1 = arith.constant 0 : i32
    return %c0_i32, %c0_i32_0 : i32, i32
  }
  func.func @transform_17(%arg0: i32) -> (i32, i32) {
    %c0_i32 = arith.constant 0 : i32
    %c0_i32_0 = arith.constant 0 : i32
    %c0_i32_1 = arith.constant 0 : i32
    return %c0_i32, %c0_i32_0 : i32, i32
  }
}

</mosaic_0001>

<bundles_post_ra>
// kernel: tpu_custom_call.1
= control target key start
LH: loop header
LB: loop body
LE: loop exit
PB: predicated region body
PF: predicated region fallthrough
CT: control target
= control target key end

     0   :  { %s5415_s0 = inlined_call_operand.vmem [shape: f32[32,24], index: 0, kind: input, shape index: {}]   ;;  %s5416_s1 = inlined_call_operand.vmem [shape: f32[16,12], index: 1, kind: input, shape index: {}]   ;;  %s5417_s2 = inlined_call_operand.vmem [shape: f32[128,16], index: 2, kind: input, shape index: {}]   ;;  %s5418_s3 = inlined_call_operand.vmem [shape: f32[128,32], index: 3, kind: input, shape index: {}]   ;;  %s5419_s4 = inlined_call_operand.vmem [shape: f32[24,32], index: 4, kind: input, shape index: {}]   ;;  %s5420_s5 = inlined_call_operand.hbm [shape: f32[1,32], index: 5, kind: input, shape index: {}]   ;;  %s5421_s6 = inlined_call_operand.vmem [shape: f32[12,32], index: 6, kind: input, shape index: {}]   ;;  %s5422_s7 = inlined_call_operand.hbm [shape: f32[1,32], index: 7, kind: input, shape index: {}]   ;;  %s5423_s8 = inlined_call_operand.vmem [shape: f32[3,32,32], index: 8, kind: input, shape index: {}]   ;;  %s5424_s9 = inlined_call_operand.vmem [shape: f32[3,1,32], index: 9, kind: input, shape index: {}]   ;;  %s5425_s10 = inlined_call_operand.vmem [shape: f32[32,192], index: 10, kind: input, shape index: {}]   ;;  %s5426_s11 = inlined_call_operand.hbm [shape: f32[1,192], index: 11, kind: input, shape index: {}]   ;;  %s5427_s12 = inlined_call_operand.vmem [shape: f32[3,32,32], index: 12, kind: input, shape index: {}]   ;;  %s5428_s13 = inlined_call_operand.vmem [shape: f32[3,1,32], index: 13, kind: input, shape index: {}]   ;;  %s5429_s14 = inlined_call_operand.vmem [shape: f32[3,1,32], index: 14, kind: input, shape index: {}]   ;;  %s5430_s15 = inlined_call_operand.hbm [shape: f32[3,1,32], index: 15, kind: input, shape index: {}]   ;;  %s5431_s16 = inlined_call_operand.hbm [shape: f32[32,32], index: 16, kind: output, shape index: {0}]   ;;  %s5432_s17 = inlined_call_operand.hbm [shape: f32[16,32], index: 17, kind: output, shape index: {1}]  }
   0x1   :  { %5435 = sst [smem:[#allocation18_spill]] %s5415_s0 }
   0x2   :  { %5436 = sst [smem:[#allocation19_spill]] %s5416_s1 }
   0x3   :  { %23 = vsyncpa [#allocation3], 0 }
   0x4   :  { %24 = vsyncpa [#allocation6], 0 }
   0x5   :  { %25 = vsyncpa [#allocation9], 0 }
   0x6   :  { %26 = vsyncpa [#allocation4], 0  ;;  %s56_s26 = sshll.u32 %s5422_s7, 4  ;;  %s57_s26 = int_to_ptr.hbm [resolvable:$true] %s56_s26 }
   0x7   :  { %27 = vsyncpa [#allocation12], 0  ;;  %s3746_s27 = smov [#allocation5]   ;;  %s43_s30 = sshll.u32 %s5420_s5, 4  ;;  %s44_s30 = int_to_ptr.hbm [resolvable:$true] %s43_s30 }
   0x8   :  { %s58_s28 = sshll.u32 %s3746_s27, 4  ;;  %s3747_s18 = smov [#allocation2]   ;;  %s59_s28 = int_to_ptr.vmem [resolvable:$true] %s58_s28 }
   0x9   :  { %61 = dma.hbm_to_vmem [thread:$0]  %s57_s26, 16, %s59_s28, [#allocation6]  }
   0xa   :  { %s45_s19 = sshll.u32 %s3747_s18, 4  ;;  %s73_s21 = sshll.u32 %s5426_s11, 4  ;;  %s46_s19 = int_to_ptr.vmem [resolvable:$true] %s45_s19  ;;  %s74_s21 = int_to_ptr.hbm [resolvable:$true] %s73_s21 }
   0xb   :  { %48 = dma.hbm_to_vmem [thread:$0]  %s44_s30, 16, %s46_s19, [#allocation3]  }
   0xc   :  { %s89_s23 = sshll.u32 %s5430_s15, 4  ;;  %s3748_s24 = smov [#allocation7]   ;;  %s90_s23 = int_to_ptr.hbm [resolvable:$true] %s89_s23 }
   0xd   :  { %s75_s25 = sshll.u32 %s3748_s24, 4  ;;  %s3749_s5 = smov [#allocation8]   ;;  %s76_s25 = int_to_ptr.vmem [resolvable:$true] %s75_s25 }
   0xe   :  { %78 = dma.hbm_to_vmem [thread:$0]  %s74_s21, 32, %s76_s25, [#allocation6]  }
   0xf   :  { %s91_s26 = sshll.u32 %s3749_s5, 4  ;;  %s3750_s27 = smov 16   ;;  %s92_s26 = int_to_ptr.vmem [resolvable:$true] %s91_s26 }
  0x10   :  { %s3751_s28 = smov 1  }
  0x11   :  { %97 = dma.hbm_to_vmem [thread:$0]  %s90_s23, 48, %s92_s26, [#allocation9], %s3750_s27, %s3750_s27, %s3751_s28  }
  0x12   :  { %3736 = dma.done.wait [#allocation3], 16  }
  0x13   :  { %3737 = vsyncadd [#allocation3], 4294967280 }
  0x14   :  { %3738 = dma.done.wait [#allocation6], 48  }
  0x15   :  { %3739 = vsyncadd [#allocation6], 4294967248 }
  0x16   :  { %3740 = dma.done.wait [#allocation9], 48  }
  0x17   :  { %3741 = vsyncadd [#allocation9], 4294967248  ;;  %vm214_vm0 = vcmask 1043456   ;;  %v202_v0 = vld [vmem:[%s5421_s6 + $0x8] sm:$0xf]  ;;  %v201_v1 = vld [vmem:[%s5421_s6] sm:$0xff] }
  0x18   :  { %3089 = vmatpush.msk.msra.mxu1 %vm214_vm0, %v202_v0  ;;  %s5437_s19 = sld [smem:[#allocation19_spill]]  ;;  %vm207_vm1 = vcmask 97280   ;;  %v154_v3 = vld [vmem:[%s5419_s4 + $0x10] sm:$0xff]  ;;  %v153_v4 = vld [vmem:[%s5419_s4 + $0x8] sm:$0xff]  ;;  %v152_v5 = vld [vmem:[%s5419_s4] sm:$0xff]  ;;  %vm159_vm2 = vcmask 195584  }
  0x19   :  { %185 = vmatpush.msra.mxu0 %v154_v3  ;;  %v250_v6 = vld [vmem:[%s5425_s10 + $0x30] sm:$0xff]  ;;  %s5438_s26 = sld [smem:[#allocation18_spill]]  ;;  %v248_v8 = vld [vmem:[%s5425_s10 + $0x20] sm:$0xff]  ;;  %v251_v15 = vld [vmem:[%s5425_s10 + $0x38] sm:$0xff]  ;;  %vm241_vm3 = vcmask 261120   ;;  %vm533_vm4 = vcmask 130048  }
  0x1a   :  { %233 = vmatpush.msra.mxu1 %v201_v1  ;;  %v246_v9 = vld [vmem:[%s5425_s10 + $0x10] sm:$0xff]  ;;  %3244 = vmatpush.msra.mxu2 %v250_v6  ;;  %v244_v10 = vld [vmem:[%s5425_s10] sm:$0xff]  ;;  %v249_v16 = vld [vmem:[%s5425_s10 + $0x28] sm:$0xff]  ;;  %s3752_s6 = smov 32   ;;  %s3754_s23 = smov 96  }
  0x1b   :  { %186 = vmatpush.msra.mxu0 %v153_v4  ;;  %3248 = vmatpush.msra.mxu3 %v251_v15  ;;  %v247_v17 = vld [vmem:[%s5425_s10 + $0x18] sm:$0xff]  ;;  %v245_v18 = vld [vmem:[%s5425_s10 + $0x8] sm:$0xff]  ;;  %v3280_v19 = vld [vmem:[#allocation5] ss:$0 sm:$0xff]  ;;  %s3065_s28 = sshll.u32 %s5432_s17, 4  ;;  %s3757_s11 = smov 128   ;;  %s3066_s28 = int_to_ptr.hbm [resolvable:$true] %s3065_s28 }
  0x1c   :  { %276 = vmatpush.msrb.mxu1 %v250_v6  ;;  %3245 = vmatpush.msra.mxu2 %v248_v8  ;;  %v313_v22 = vld [vmem:[%s5423_s8 + $0x18] sm:$0xff]  ;;  %v312_v23 = vld [vmem:[%s5423_s8 + $0x10] sm:$0xff]  ;;  %v311_v24 = vld [vmem:[%s5423_s8 + $0x8] sm:$0xff]  ;;  %s3052_s0 = sshll.u32 %s5431_s16, 4  ;;  %s3053_s0 = int_to_ptr.hbm [resolvable:$true] %s3052_s0 }
  0x1d   :  { %187 = vmatpush.msra.mxu0 %v152_v5  ;;  %3249 = vmatpush.msra.mxu3 %v249_v16  ;;  %v310_v26 = vld [vmem:[%s5423_s8] sm:$0xff]  ;;  %v3141_v53 = vld [vmem:[%s5423_s8 + $0x38] sm:$0xff]  ;;  %v3140_v55 = vld [vmem:[%s5423_s8 + $0x30] sm:$0xff] }
  0x1e   :  { %v118_v2 = vld [vmem:[%s5437_s19] sm:$0xff]  ;;  %v119_v11 = vld [vmem:[%s5437_s19 + $0x8] sm:$0xff]  ;;  %277 = vmatpush.msrb.mxu1 %v248_v8  ;;  %3246 = vmatpush.msra.mxu2 %v246_v9  ;;  %v142_v1 = vld [vmem:[%s5418_s3 + $0x30] sm:$0xff] }
  0x1f   :  { %3090 = vmatmul.msk.f32.vlgmr.msra.gmra.mxu1 %vm207_vm1, %v118_v2  ;;  %v114_v7 = vld [vmem:[%s5438_s26] sm:$0xff]  ;;  %v115_v12 = vld [vmem:[%s5438_s26 + $0x8] sm:$0xff]  ;;  %v116_v13 = vld [vmem:[%s5438_s26 + $0x10] sm:$0xff]  ;;  %3250 = vmatpush.msra.mxu3 %v247_v17 }
  0x20   :  { %3085 = vmatmul.msk.f32.vlgmr.msra.gmra.mxu0 %vm159_vm2, %v114_v7  ;;  %278 = vmatpush.msrb.mxu1 %v246_v9  ;;  %v117_v14 = vld [vmem:[%s5438_s26 + $0x18] sm:$0xff]  ;;  %v3281_v29 = vld [vmem:[#allocation2] ss:$0 sm:$0xff]  ;;  %v252_v39 = vld [vmem:[#allocation7] sm:$0x3] }
  0x21   :  { %3247 = vmatpush.msra.mxu2 %v244_v10  ;;  %3251 = vmatpush.msra.mxu3 %v245_v18  ;;  %v255_v40 = vperm.slane %v252_v39, 1  ;;  %v254_v41 = vperm.slane %v252_v39, 0  ;;  %v3282_v43 = vld [vmem:[%s5424_s9] ss:$0 sm:$0xff]  ;;  %v3139_v57 = vld [vmem:[%s5423_s8 + $0x28] sm:$0xff]  ;;  %v138_v4 = vld [vmem:[%s5418_s3 + $0x10] sm:$0xff] }
  0x22   :  { %279 = vmatpush.msrb.mxu1 %v244_v10  ;;  %v136_v52 = vld [vmem:[%s5418_s3] sm:$0xff]  ;;  %v141_v58 = vld [vmem:[%s5418_s3 + $0x28] sm:$0xff]  ;;  %v143_v7 = vld [vmem:[%s5418_s3 + $0x38] sm:$0xff] }
  0x23   :  { %v3138_v60 = vld [vmem:[%s5423_s8 + $0x20] sm:$0xff]  ;;  %v137_v62 = vld [vmem:[%s5418_s3 + $0x8] sm:$0xff]  ;;  %v139_v10 = vld [vmem:[%s5418_s3 + $0x18] sm:$0xff] }
  0x24   :  { %299 = vmatpush.msra.mxu1 %v251_v15 }
  0x26   :  { %300 = vmatpush.msra.mxu1 %v249_v16  ;;  %v145_v16 = vld [vmem:[%s5418_s3 + $0x48] sm:$0xff] }
  0x27   :  { %3091 = vmatmul.msk.f32.gmra.mxu1 %vm207_vm1, %v119_v11 }
  0x28   :  { %3086 = vmatmul.msk.f32.gmra.mxu0 %vm159_vm2, %v115_v12  ;;  %301 = vmatpush.msra.mxu1 %v247_v17  ;;  %v144_v12 = vld [vmem:[%s5418_s3 + $0x40] sm:$0xff] }
  0x2a   :  { %302 = vmatpush.msra.mxu1 %v245_v18  ;;  %v146_v18 = vld [vmem:[%s5418_s3 + $0x50] sm:$0xff] }
  0x30   :  { %3087 = vmatmul.msk.f32.gmra.mxu0 %vm159_vm2, %v116_v13 }
  0x38   :  { %3088 = vmatmul.msk.f32.gmra.mxu0 %vm159_vm2, %v117_v14  ;;  %v140_v14 = vld [vmem:[%s5418_s3 + $0x20] sm:$0xff] }
  0x9c   :  { %v235_v20 = vpop.f32.mrf.mxu1 }
  0x9d   :  { %v236_v21 = vadd.f32 %v3280_v19, %v235_v20  ;;  %v189_v25 = vpop.f32.mrf.mxu0  ;;  %v147_v20 = vld [vmem:[%s5418_s3 + $0x58] sm:$0xff] }
  0x9e   :  { %v3943_v30 = vadd.f32 %v3281_v29, %v189_v25 }
  0x9f   :  { %242 = vst.msk [vmem:[#allocation11] sm:$0xff] %vm241_vm3, %v236_v21  ;;  %3092 = vmatmul.msk.f32.vlgmr.msrb.gmra.mxu1 %vm241_vm3, %v236_v21 }
  0xa0   :  { %349 = vmatpush.msrb.mxu1 %v313_v22  ;;  %v148_v22 = vld [vmem:[%s5418_s3 + $0x60] sm:$0xff] }
  0xa2   :  { %350 = vmatpush.msrb.mxu1 %v312_v23 }
  0xa4   :  { %v238_v27 = vpop.f32.mrf.mxu1  ;;  %351 = vmatpush.msrb.mxu1 %v311_v24  ;;  %v149_v24 = vld [vmem:[%s5418_s3 + $0x68] sm:$0xff] }
  0xa5   :  { %v239_v28 = vadd.f32 %v3280_v19, %v238_v27  ;;  %v192_v31 = vpop.f32.mrf.mxu0 }
  0xa6   :  { %352 = vmatpush.msrb.mxu1 %v310_v26  ;;  %v3947_v32 = vadd.f32 %v3281_v29, %v192_v31  ;;  %v150_v26 = vld [vmem:[%s5418_s3 + $0x70] sm:$0xff] }
  0xa7   :  { %243 = vst.msk [vmem:[#allocation11 + $0x8] sm:$0xff] %vm241_vm3, %v239_v28  ;;  %3093 = vmatmul.msk.f32.vlgmr.msra.gmra.mxu2 %vm241_vm3, %v239_v28  ;;  %3094 = vmatmul.msk.f32.vlgmr.msra.gmra.mxu1 %vm241_vm3, %v236_v21 }
  0xa8   :  { %3095 = vmatmul.msk.f32.vlgmr.msra.gmra.mxu3 %vm241_vm3, %v239_v28  ;;  %v151_v28 = vld [vmem:[%s5418_s3 + $0x78] sm:$0xff] }
  0xad   :  { %v195_v33 = vpop.f32.mrf.mxu0 }
  0xae   :  { %v3951_v34 = vadd.f32 %v3281_v29, %v195_v33  ;;  %v120_v33 = vld [vmem:[%s5417_s2] sm:$0xff] }
  0xaf   :  { %3096 = vmatmul.msk.f32.vlgmr.msrb.gmra.mxu1 %vm241_vm3, %v3943_v30 }
  0xb5   :  { %v198_v35 = vpop.f32.mrf.mxu0 }
  0xb6   :  { %v3955_v36 = vadd.f32 %v3281_v29, %v198_v35 }
  0xb7   :  { %3097 = vmatmul.msk.f32.gmra.mxu1 %vm241_vm3, %v3947_v32 }
  0xbf   :  { %3098 = vmatmul.msk.f32.gmra.mxu1 %vm241_vm3, %v3951_v34 }
  0xc7   :  { %3099 = vmatmul.msk.f32.gmra.mxu1 %vm241_vm3, %v3955_v36 }
 0x11c   :  { %v281_v37 = vpop.f32.mrf.mxu1 }
 0x11d   :  { %v3974_v51 = vadd.f32 %v281_v37, %v254_v41 }
 0x124   :  { %v304_v38 = vpop.f32.mrf.mxu1 }
 0x125   :  { %v3964_v46 = vadd.f32 %v304_v38, %v255_v40 }
 0x12a   :  { %v284_v42 = vpop.f32.mrf.mxu2 }
 0x12b   :  { %v3962_v44 = vadd.f32 %v284_v42, %v254_v41  ;;  %v307_v45 = vpop.f32.mrf.mxu3  ;;  %v125_v41 = vld [vmem:[%s5417_s2 + $0x28] sm:$0xff] }
 0x12c   :  { %v3966_v47 = vadd.f32 %v307_v45, %v255_v40  ;;  %v354_v48 = vpop.f32.mrf.mxu1 }
 0x12d   :  { %3100 = vmatpush.xpose.msk.msra.mxu1 %vm241_vm3, %v3962_v44  ;;  %3252 = vmatpush.xpose.msk.msrb.mxu2 %vm241_vm3, %v3962_v44  ;;  %v355_v50 = vadd.f32 %v3282_v43, %v354_v48 }
 0x12e   :  { %v3275_v49 = vpack.i.bf16 %v3964_v46, %v3966_v47 }
 0x12f   :  { %v366_v54 = vmul.f32 %v355_v50, %v136_v52  ;;  %v374_v13 = vmul.f32 %v355_v50, %v144_v12  ;;  %v370_v15 = vmul.f32 %v355_v50, %v140_v14  ;;  %v378_v23 = vmul.f32 %v355_v50, %v148_v22  ;;  %v122_v50 = vld [vmem:[%s5417_s2 + $0x10] sm:$0xff]  ;;  %v123_v22 = vld [vmem:[%s5417_s2 + $0x18] sm:$0xff] }
 0x131   :  { %3101 = vmatpush.xpose.msk.msra.mxu1 %vm241_vm3, %v3974_v51  ;;  %3253 = vmatpush.xpose.msk.msrb.mxu2 %vm241_vm3, %v3974_v51 }
 0x134   :  { %v357_v56 = vpop.f32.mrf.mxu1  ;;  %3102 = vmatmul.msk.f32.vlgmr.msra.gmra.mxu1 %vm241_vm3, %v366_v54  ;;  %v126_v54 = vld [vmem:[%s5417_s2 + $0x30] sm:$0xff] }
 0x135   :  { %1267 = vmatpush.msrb.mxu1 %v3141_v53  ;;  %v358_v59 = vadd.f32 %v3282_v43, %v357_v56 }
 0x137   :  { %1268 = vmatpush.msrb.mxu1 %v3140_v55  ;;  %v371_v61 = vmul.f32 %v358_v59, %v141_v58  ;;  %v367_v63 = vmul.f32 %v358_v59, %v137_v62  ;;  %v375_v17 = vmul.f32 %v358_v59, %v145_v16  ;;  %v379_v25 = vmul.f32 %v358_v59, %v149_v24  ;;  %v131_v24 = vld [vmem:[%s5417_s2 + $0x58] sm:$0xff] }
 0x139   :  { %1269 = vmatpush.msrb.mxu1 %v3139_v57  ;;  %3107 = vmatmul.msk.f32.vlgmr.msrb.gmra.mxu2 %vm241_vm3, %v371_v61  ;;  %v121_v61 = vld [vmem:[%s5417_s2 + $0x8] sm:$0xff] }
 0x13b   :  { %1270 = vmatpush.msrb.mxu1 %v3138_v60 }
 0x13c   :  { %v360_v0 = vpop.f32.mrf.mxu1  ;;  %3103 = vmatmul.msk.f32.gmra.mxu1 %vm241_vm3, %v367_v63  ;;  %v127_v63 = vld [vmem:[%s5417_s2 + $0x38] sm:$0xff] }
 0x13d   :  { %1899 = vmatpush.msra.mxu1 %v3966_v47  ;;  %v361_v2 = vadd.f32 %v3282_v43, %v360_v0 }
 0x13f   :  { %1900 = vmatpush.msra.mxu1 %v3964_v46  ;;  %v372_v3 = vmul.f32 %v361_v2, %v142_v1  ;;  %v368_v5 = vmul.f32 %v361_v2, %v138_v4  ;;  %v376_v19 = vmul.f32 %v361_v2, %v146_v18  ;;  %v380_v27 = vmul.f32 %v361_v2, %v150_v26 }
 0x141   :  { %3108 = vmatmul.msk.f32.gmra.mxu2 %vm241_vm3, %v372_v3 }
 0x144   :  { %v363_v6 = vpop.f32.mrf.mxu1  ;;  %3104 = vmatmul.msk.f32.gmra.mxu1 %vm241_vm3, %v368_v5 }
 0x145   :  { %v364_v8 = vadd.f32 %v3282_v43, %v363_v6  ;;  %v128_v6 = vld [vmem:[%s5417_s2 + $0x40] sm:$0xff] }
 0x147   :  { %v373_v9 = vmul.f32 %v364_v8, %v143_v7  ;;  %v369_v11 = vmul.f32 %v364_v8, %v139_v10  ;;  %v377_v21 = vmul.f32 %v364_v8, %v147_v20  ;;  %v381_v29 = vmul.f32 %v364_v8, %v151_v28 }
 0x149   :  { %3109 = vmatmul.msk.f32.gmra.mxu2 %vm241_vm3, %v373_v9 }
 0x14c   :  { %3105 = vmatmul.msk.f32.gmra.mxu1 %vm241_vm3, %v369_v11  ;;  %v129_v11 = vld [vmem:[%s5417_s2 + $0x48] sm:$0xff] }
 0x151   :  { %3110 = vmatmul.msk.f32.gmra.mxu2 %vm241_vm3, %v374_v13 }
 0x154   :  { %3106 = vmatmul.msk.f32.gmra.mxu1 %vm241_vm3, %v370_v15 }
 0x159   :  { %3111 = vmatmul.msk.f32.gmra.mxu2 %vm241_vm3, %v375_v17  ;;  %v130_v17 = vld [vmem:[%s5417_s2 + $0x50] sm:$0xff] }
 0x161   :  { %3112 = vmatmul.msk.f32.gmra.mxu2 %vm241_vm3, %v376_v19 }
 0x169   :  { %3113 = vmatmul.msk.f32.gmra.mxu2 %vm241_vm3, %v377_v21 }
 0x171   :  { %3114 = vmatmul.msk.f32.gmra.mxu2 %vm241_vm3, %v378_v23 }
 0x179   :  { %3115 = vmatmul.msk.f32.gmra.mxu2 %vm241_vm3, %v379_v25 }
 0x181   :  { %3116 = vmatmul.msk.f32.gmra.mxu2 %vm241_vm3, %v380_v27 }
 0x189   :  { %3117 = vmatmul.msk.f32.gmra.mxu2 %vm241_vm3, %v381_v29 }
 0x1b1   :  { %v453_v31 = vpop.f32.mrf.mxu1 }
 0x1b2   :  { %v501_v35 = vmul.f32 0.35355338, %v453_v31 }
 0x1b4   :  { %v4061_v37 = vadd.f32 %v501_v35, %v120_v33  ;;  %v124_v35 = vld [vmem:[%s5417_s2 + $0x20] sm:$0xff] }
 0x1b6   :  { %v534_v38 = vsel %vm533_vm4, %v4061_v37, -inf }
 0x1b7   :  { %535 = vmax.xlane.f32.xlu2 %v534_v38 }
 0x1b9   :  { %v456_v39 = vpop.f32.mrf.mxu1 }
 0x1ba   :  { %v502_v59 = vmul.f32 0.35355338, %v456_v39  ;;  %v132_v39 = vld [vmem:[%s5417_s2 + $0x60] sm:$0xff] }
 0x1bc   :  { %v468_v40 = vpop.f32.mrf.mxu2  ;;  %v4092_v1 = vadd.f32 %v502_v59, %v121_v61  ;;  %v134_v59 = vld [vmem:[%s5417_s2 + $0x70] sm:$0xff] }
 0x1bd   :  { %v506_v42 = vmul.f32 0.35355338, %v468_v40 }
 0x1be   :  { %v537_v4 = vsel %vm533_vm4, %v4092_v1, -inf }
 0x1bf   :  { %v4068_v43 = vadd.f32 %v506_v42, %v125_v41 }
 0x1c1   :  { %v549_v45 = vsel %vm533_vm4, %v4068_v43, -inf  ;;  %v459_v48 = vpop.f32.mrf.mxu1 }
 0x1c2   :  { %550 = vmax.xlane.f32.xlu0 %v549_v45  ;;  %v503_v52 = vmul.f32 0.35355338, %v459_v48 }
 0x1c4   :  { %v471_v53 = vpop.f32.mrf.mxu2  ;;  %v4078_v56 = vadd.f32 %v503_v52, %v122_v50  ;;  %v133_v52 = vld [vmem:[%s5417_s2 + $0x68] sm:$0xff] }
 0x1c5   :  { %v507_v55 = vmul.f32 0.35355338, %v471_v53 }
 0x1c6   :  { %v540_v57 = vsel %vm533_vm4, %v4078_v56, -inf }
 0x1c7   :  { %v4082_v58 = vadd.f32 %v507_v55, %v126_v54  ;;  %541 = vmax.xlane.f32.xlu2 %v540_v57 }
 0x1c9   :  { %v552_v60 = vsel %vm533_vm4, %v4082_v58, -inf  ;;  %v462_v15 = vpop.f32.mrf.mxu1 }
 0x1ca   :  { %553 = vmax.xlane.f32.xlu0 %v552_v60  ;;  %v504_v20 = vmul.f32 0.35355338, %v462_v15 }
 0x1cc   :  { %v474_v62 = vpop.f32.mrf.mxu2  ;;  %v4127_v26 = vadd.f32 %v504_v20, %v123_v22 }
 0x1cd   :  { %v508_v0 = vmul.f32 0.35355338, %v474_v62 }
 0x1ce   :  { %v543_v33 = vsel %vm533_vm4, %v4127_v26, -inf }
 0x1cf   :  { %v4094_v2 = vadd.f32 %v508_v0, %v127_v63 }
 0x1d1   :  { %v555_v3 = vsel %vm533_vm4, %v4094_v2, -inf  ;;  %v465_v27 = vpop.f32.mrf.mxu1 }
 0x1d2   :  { %556 = vmax.xlane.f32.xlu1 %v555_v3  ;;  %538 = vmax.xlane.f32.xlu0 %v537_v4  ;;  %v505_v29 = vmul.f32 0.35355338, %v465_v27 }
 0x1d4   :  { %v477_v5 = vpop.f32.mrf.mxu2  ;;  %v4141_v41 = vadd.f32 %v505_v29, %v124_v35 }
 0x1d5   :  { %v509_v7 = vmul.f32 0.35355338, %v477_v5 }
 0x1d6   :  { %v546_v48 = vsel %vm533_vm4, %v4141_v41, -inf }
 0x1d7   :  { %v4103_v8 = vadd.f32 %v509_v7, %v128_v6 }
 0x1d9   :  { %v558_v9 = vsel %vm533_vm4, %v4103_v8, -inf }
 0x1da   :  { %559 = vmax.xlane.f32.xlu1 %v558_v9 }
 0x1dc   :  { %v480_v10 = vpop.f32.mrf.mxu2 }
 0x1dd   :  { %v510_v12 = vmul.f32 0.35355338, %v480_v10 }
 0x1df   :  { %v4110_v13 = vadd.f32 %v510_v12, %v129_v11 }
 0x1e1   :  { %v561_v14 = vsel %vm533_vm4, %v4110_v13, -inf }
 0x1e2   :  { %562 = vmax.xlane.f32.xlu2 %v561_v14 }
 0x1e4   :  { %v483_v16 = vpop.f32.mrf.mxu2 }
 0x1e5   :  { %v511_v18 = vmul.f32 0.35355338, %v483_v16 }
 0x1e7   :  { %v4117_v19 = vadd.f32 %v511_v18, %v130_v17 }
 0x1e9   :  { %v564_v21 = vsel %vm533_vm4, %v4117_v19, -inf }
 0x1ea   :  { %565 = vmax.xlane.f32.xlu1 %v564_v21 }
 0x1ec   :  { %v486_v23 = vpop.f32.mrf.mxu2 }
 0x1ed   :  { %v512_v25 = vmul.f32 0.35355338, %v486_v23 }
 0x1ef   :  { %v4129_v28 = vadd.f32 %v512_v25, %v131_v24 }
 0x1f1   :  { %v567_v31 = vsel %vm533_vm4, %v4129_v28, -inf }
 0x1f2   :  { %568 = vmax.xlane.f32.xlu0 %v567_v31  ;;  %544 = vmax.xlane.f32.xlu1 %v543_v33 }
 0x1f4   :  { %v489_v38 = vpop.f32.mrf.mxu2 }
 0x1f5   :  { %v513_v40 = vmul.f32 0.35355338, %v489_v38 }
 0x1f7   :  { %v4143_v42 = vadd.f32 %v513_v40, %v132_v39  ;;  %v135_v40 = vld [vmem:[%s5417_s2 + $0x78] sm:$0xff] }
 0x1f9   :  { %v570_v45 = vsel %vm533_vm4, %v4143_v42, -inf }
 0x1fa   :  { %571 = vmax.xlane.f32.xlu0 %v570_v45  ;;  %547 = vmax.xlane.f32.xlu1 %v546_v48 }
 0x1fc   :  { %v492_v50 = vpop.f32.mrf.mxu2 }
 0x1fd   :  { %v514_v53 = vmul.f32 0.35355338, %v492_v50 }
 0x1ff   :  { %v4152_v54 = vadd.f32 %v514_v53, %v133_v52 }
 0x201   :  { %v573_v55 = vsel %vm533_vm4, %v4152_v54, -inf }
 0x202   :  { %574 = vmax.xlane.f32.xlu0 %v573_v55 }
 0x204   :  { %v495_v57 = vpop.f32.mrf.mxu2 }
 0x205   :  { %v515_v60 = vmul.f32 0.35355338, %v495_v57 }
 0x207   :  { %v4159_v61 = vadd.f32 %v515_v60, %v134_v59 }
 0x209   :  { %v576_v62 = vsel %vm533_vm4, %v4159_v61, -inf }
 0x20a   :  { %577 = vmax.xlane.f32.xlu0 %v576_v62 }
 0x20c   :  { %v498_v29 = vpop.f32.mrf.mxu2 }
 0x20d   :  { %v516_v39 = vmul.f32 0.35355338, %v498_v29 }
 0x20f   :  { %v4194_v50 = vadd.f32 %v516_v39, %v135_v40 }
 0x211   :  { %v579_v53 = vsel %vm533_vm4, %v4194_v50, -inf }
 0x22a   :  { %v536_v63 = vpop.xlane.xlu2 %535 }
 0x22b   :  { %v582_v0 = vsub.f32 %v4061_v37, %v536_v63 }
 0x22d   :  { %v598_v3 = vmul.f32 1.442695, %v582_v0 }
 0x22f   :  { %3294 = vpow2.f32 %v598_v3 }
 0x235   :  { %v4164_v4 = vpop.eup %3294  ;;  %v551_v5 = vpop.xlane.xlu0 %550 }
 0x236   :  { %v587_v6 = vsub.f32 %v4068_v43, %v551_v5  ;;  %v630_v7 = vsel %vm533_vm4, %v4164_v4, 0.0 }
 0x237   :  { %631 = vadd.xlane.f32.xlu0 %v630_v7 }
 0x238   :  { %v608_v9 = vmul.f32 1.442695, %v587_v6 }
 0x23a   :  { %3296 = vpow2.f32 %v608_v9 }
 0x23d   :  { %v554_v10 = vpop.xlane.xlu0 %553 }
 0x23e   :  { %v588_v11 = vsub.f32 %v4082_v58, %v554_v10  ;;  %v542_v58 = vpop.xlane.xlu2 %541 }
 0x23f   :  { %v584_v33 = vsub.f32 %v4078_v56, %v542_v58  ;;  %v3270_v56 = vpack.i.bf16 %v3974_v51, %v3962_v44 }
 0x240   :  { %v4170_v12 = vpop.eup %3296  ;;  %v610_v14 = vmul.f32 1.442695, %v588_v11 }
 0x241   :  { %v645_v37 = vsel %vm533_vm4, %v4170_v12, 0.0  ;;  %v602_v45 = vmul.f32 1.442695, %v584_v33 }
 0x242   :  { %3298 = vpow2.f32 %v610_v14  ;;  %646 = vadd.xlane.f32.xlu2 %v645_v37 }
 0x245   :  { %v557_v15 = vpop.xlane.xlu1 %556  ;;  %v539_v25 = vpop.xlane.xlu0 %538 }
 0x246   :  { %v589_v43 = vsub.f32 %v4094_v2, %v557_v15 }
 0x248   :  { %v4175_v16 = vpop.eup %3298  ;;  %v612_v17 = vmul.f32 1.442695, %v589_v43 }
 0x249   :  { %v648_v18 = vsel %vm533_vm4, %v4175_v16, 0.0 }
 0x24a   :  { %3300 = vpow2.f32 %v612_v17  ;;  %649 = vadd.xlane.f32.xlu2 %v648_v18 }
 0x24d   :  { %v560_v20 = vpop.xlane.xlu1 %559 }
 0x24e   :  { %v590_v21 = vsub.f32 %v4103_v8, %v560_v20  ;;  %v583_v8 = vsub.f32 %v4092_v1, %v539_v25 }
 0x250   :  { %v4180_v22 = vpop.eup %3300  ;;  %v614_v23 = vmul.f32 1.442695, %v590_v21 }
 0x251   :  { %v651_v24 = vsel %vm533_vm4, %v4180_v22, 0.0 }
 0x252   :  { %3302 = vpow2.f32 %v614_v23  ;;  %652 = vadd.xlane.f32.xlu1 %v651_v24 }
 0x255   :  { %v563_v2 = vpop.xlane.xlu2 %562 }
 0x256   :  { %v591_v27 = vsub.f32 %v4110_v13, %v563_v2  ;;  %v600_v13 = vmul.f32 1.442695, %v583_v8 }
 0x258   :  { %v4185_v31 = vpop.eup %3302  ;;  %v616_v35 = vmul.f32 1.442695, %v591_v27 }
 0x259   :  { %v654_v38 = vsel %vm533_vm4, %v4185_v31, 0.0 }
 0x25a   :  { %3304 = vpow2.f32 %v616_v35  ;;  %655 = vadd.xlane.f32.xlu1 %v654_v38 }
 0x25b   :  { %3306 = vpow2.f32 %v602_v45 }
 0x25c   :  { %3308 = vpow2.f32 %v600_v13 }
 0x25d   :  { %v566_v48 = vpop.xlane.xlu1 %565 }
 0x25e   :  { %v592_v20 = vsub.f32 %v4117_v19, %v566_v48 }
 0x260   :  { %v4196_v52 = vpop.eup %3304  ;;  %v618_v24 = vmul.f32 1.442695, %v592_v20 }
 0x261   :  { %v657_v1 = vsel %vm533_vm4, %v4196_v52, 0.0  ;;  %v4204_v59 = vpop.eup %3306 }
 0x262   :  { %3271 = vrot.lane.b32.xlu2 %v3270_v56, %s3752_s6  ;;  %658 = vadd.xlane.f32.xlu0 %v657_v1  ;;  %v4208_v63 = vpop.eup %3308  ;;  %v636_v5 = vsel %vm533_vm4, %v4204_v59, 0.0  ;;  %s3755_s6 = smov 64  }
 0x263   :  { %580 = vmax.xlane.f32.xlu1 %v579_v53  ;;  %v633_v6 = vsel %vm533_vm4, %v4208_v63, 0.0 }
 0x265   :  { %v569_v55 = vpop.xlane.xlu0 %568  ;;  %v545_v57 = vpop.xlane.xlu1 %544 }
 0x266   :  { %v593_v60 = vsub.f32 %v4129_v28, %v569_v55  ;;  %v585_v62 = vsub.f32 %v4127_v26, %v545_v57 }
 0x268   :  { %v620_v0 = vmul.f32 1.442695, %v593_v60  ;;  %v604_v3 = vmul.f32 1.442695, %v585_v62 }
 0x26a   :  { %3310 = vpow2.f32 %v620_v0  ;;  %637 = vadd.xlane.f32.xlu0 %v636_v5 }
 0x26b   :  { %3312 = vpow2.f32 %v604_v3  ;;  %634 = vadd.xlane.f32.xlu1 %v633_v6 }
 0x26d   :  { %v572_v7 = vpop.xlane.xlu0 %571  ;;  %v548_v9 = vpop.xlane.xlu1 %547 }
 0x26e   :  { %v594_v28 = vsub.f32 %v4143_v42, %v572_v7  ;;  %v586_v26 = vsub.f32 %v4141_v41, %v548_v9 }
 0x270   :  { %v4216_v10 = vpop.eup %3310  ;;  %v622_v11 = vmul.f32 1.442695, %v594_v28  ;;  %v606_v14 = vmul.f32 1.442695, %v586_v26 }
 0x271   :  { %v4218_v37 = vpop.eup %3312  ;;  %v663_v15 = vsel %vm533_vm4, %v4216_v10, 0.0 }
 0x272   :  { %3314 = vpow2.f32 %v622_v11  ;;  %v639_v43 = vsel %vm533_vm4, %v4218_v37, 0.0 }
 0x273   :  { %3316 = vpow2.f32 %v606_v14  ;;  %640 = vadd.xlane.f32.xlu0 %v639_v43  ;;  %664 = vadd.xlane.f32.xlu1 %v663_v15 }
 0x275   :  { %v575_v17 = vpop.xlane.xlu0 %574 }
 0x276   :  { %v595_v42 = vsub.f32 %v4152_v54, %v575_v17 }
 0x278   :  { %v4225_v41 = vpop.eup %3314  ;;  %v624_v18 = vmul.f32 1.442695, %v595_v42 }
 0x279   :  { %v4227_v58 = vpop.eup %3316  ;;  %v666_v21 = vsel %vm533_vm4, %v4225_v41, 0.0 }
 0x27a   :  { %3318 = vpow2.f32 %v624_v18  ;;  %v642_v23 = vsel %vm533_vm4, %v4227_v58, 0.0 }
 0x27b   :  { %667 = vadd.xlane.f32.xlu1 %v666_v21  ;;  %643 = vadd.xlane.f32.xlu0 %v642_v23  ;;  %3320 = vpow2.f32 %v618_v24 }
 0x27d   :  { %v578_v2 = vpop.xlane.xlu0 %577 }
 0x27e   :  { %v596_v54 = vsub.f32 %v4159_v61, %v578_v2 }
 0x280   :  { %v4235_v25 = vpop.eup %3318  ;;  %v626_v27 = vmul.f32 1.442695, %v596_v54 }
 0x281   :  { %v669_v19 = vsel %vm533_vm4, %v4235_v25, 0.0  ;;  %v4239_v29 = vpop.eup %3320 }
 0x282   :  { %3322 = vpow2.f32 %v626_v27  ;;  %v660_v61 = vsel %vm533_vm4, %v4239_v29, 0.0 }
 0x283   :  { %670 = vadd.xlane.f32.xlu1 %v669_v19 }
 0x288   :  { %v4241_v33 = vpop.eup %3322 }
 0x289   :  { %v672_v35 = vsel %vm533_vm4, %v4241_v33, 0.0 }
 0x28a   :  { %673 = vadd.xlane.f32.xlu0 %v672_v35 }
 0x28b   :  { %661 = vadd.xlane.f32.xlu2 %v660_v61 }
 0x2aa   :  { %v632_v8 = vpop.xlane.xlu0 %631 }
 0x2ab   :  { %3324 = vrcp.f32 %v632_v8  ;;  %v689_v55 = vand.u32 2147483648, %v632_v8  ;;  %vm683_vm6 = vweird.f32 %v632_v8  ;;  %v687_v60 = vand.u32 2147483647, %v632_v8 }
 0x2ad   :  { %v690_v7 = vor.u32 1.1754944e-38, %v689_v55  ;;  %vm688_vm10 = vcmp.eq.f32.partialorder %v687_v60, 8.507059e+37 }
 0x2b1   :  { %v3325_v38 = vpop.eup %3324 }
 0x2b2   :  { %v679_v39 = vmul.f32 %v3325_v38, %v632_v8  ;;  %vm684_vm5 = vweird.f32 %v3325_v38 }
 0x2b3   :  { %vm4247_vm7 = vmor %vm683_vm6, %vm684_vm5 }
 0x2b4   :  { %v680_v45 = vsub.f32 1.0, %v679_v39 }
 0x2b5   :  { %v647_v40 = vpop.xlane.xlu2 %646 }
 0x2b6   :  { %3326 = vrcp.f32 %v647_v40  ;;  %v681_v13 = vmul.f32 %v3325_v38, %v680_v45  ;;  %v759_v3 = vand.u32 2147483648, %v647_v40  ;;  %v757_v5 = vand.u32 2147483647, %v647_v40 }
 0x2b7   :  { %vm753_vm9 = vweird.f32 %v647_v40 }
 0x2b8   :  { %v682_v53 = vadd.f32 %v3325_v38, %v681_v13  ;;  %v760_v26 = vor.u32 1.1754944e-38, %v759_v3  ;;  %vm758_vm12 = vcmp.eq.f32.partialorder %v757_v5, 8.507059e+37 }
 0x2ba   :  { %v686_v6 = vsel %vm4247_vm7, %v3325_v38, %v682_v53 }
 0x2bb   :  { %v691_v43 = vsel %vm688_vm10, %v690_v7, %v686_v6 }
 0x2bc   :  { %v3327_v48 = vpop.eup %3326  ;;  %v902_v24 = vmul.f32 %v4164_v4, %v691_v43 }
 0x2bd   :  { %v749_v56 = vmul.f32 %v3327_v48, %v647_v40  ;;  %v650_v1 = vpop.xlane.xlu2 %649  ;;  %vm754_vm8 = vweird.f32 %v3327_v48 }
 0x2be   :  { %3328 = vrcp.f32 %v650_v1  ;;  %vm755_vm11 = vmor %vm753_vm9, %vm754_vm8  ;;  %v773_v21 = vand.u32 2147483648, %v650_v1  ;;  %v771_v27 = vand.u32 2147483647, %v650_v1  ;;  %vm767_vm14 = vweird.f32 %v650_v1 }
 0x2bf   :  { %v750_v57 = vsub.f32 1.0, %v749_v56 }
 0x2c0   :  { %v774_v61 = vor.u32 1.1754944e-38, %v773_v21  ;;  %vm772_vm0 = vcmp.eq.f32.partialorder %v771_v27, 8.507059e+37 }
 0x2c1   :  { %v751_v0 = vmul.f32 %v3327_v48, %v750_v57 }
 0x2c3   :  { %v752_v9 = vadd.f32 %v3327_v48, %v751_v0 }
 0x2c4   :  { %v3329_v28 = vpop.eup %3328 }
 0x2c5   :  { %v763_v11 = vmul.f32 %v3329_v28, %v650_v1  ;;  %v3272_v14 = vpop.permute.xlu2 %3271  ;;  %v653_v15 = vpop.xlane.xlu1 %652  ;;  %v756_v17 = vsel %vm755_vm11, %v3327_v48, %v752_v9  ;;  %vm768_vm13 = vweird.f32 %v3329_v28 }
 0x2c6   :  { %3330 = vrcp.f32 %v653_v15  ;;  %v3273_v42 = vunpack.i.l.bf16 %v3272_v14  ;;  %v761_v20 = vsel %vm758_vm12, %v760_v26, %v756_v17  ;;  %v3274_v23 = vunpack.i.h.bf16 %v3272_v14  ;;  %vm769_vm15 = vmor %vm767_vm14, %vm768_vm13 }
 0x2c7   :  { %v764_v18 = vsub.f32 1.0, %v763_v11  ;;  %v907_v54 = vmul.f32 %v4170_v12, %v761_v20  ;;  %v787_v40 = vand.u32 2147483648, %v653_v15  ;;  %v785_v48 = vand.u32 2147483647, %v653_v15 }
 0x2c8   :  { %986 = vmatpush.msrb.mxu0 %v3273_v42  ;;  %3254 = vmatpush.msrb.mxu3 %v3273_v42  ;;  %vm781_vm2 = vweird.f32 %v653_v15 }
 0x2c9   :  { %v765_v2 = vmul.f32 %v3329_v28, %v764_v18  ;;  %v788_v53 = vor.u32 1.1754944e-38, %v787_v40  ;;  %vm786_vm6 = vcmp.eq.f32.partialorder %v785_v48, 8.507059e+37 }
 0x2ca   :  { %987 = vmatpush.msrb.mxu0 %v3274_v23  ;;  %3255 = vmatpush.msrb.mxu3 %v3274_v23 }
 0x2cb   :  { %3118 = vmatmul.msk.f32.vlgmr.msrb.gmra.mxu0 %vm533_vm4, %v902_v24  ;;  %3123 = vmatmul.msk.f32.vlgmr.msrb.gmra.mxu3 %vm533_vm4, %v907_v54  ;;  %v766_v19 = vadd.f32 %v3329_v28, %v765_v2 }
 0x2cc   :  { %v3331_v35 = vpop.eup %3330 }
 0x2cd   :  { %v777_v8 = vmul.f32 %v3331_v35, %v653_v15  ;;  %v656_v38 = vpop.xlane.xlu1 %655  ;;  %v770_v39 = vsel %vm769_vm15, %v3329_v28, %v766_v19  ;;  %vm782_vm1 = vweird.f32 %v3331_v35 }
 0x2ce   :  { %3332 = vrcp.f32 %v656_v38  ;;  %v775_v4 = vsel %vm772_vm0, %v774_v61, %v770_v39  ;;  %vm783_vm5 = vmor %vm781_vm2, %vm782_vm1  ;;  %v799_v6 = vand.u32 2147483647, %v656_v38  ;;  %vm795_vm8 = vweird.f32 %v656_v38 }
 0x2cf   :  { %v778_v12 = vsub.f32 1.0, %v777_v8  ;;  %v908_v13 = vmul.f32 %v4175_v16, %v775_v4  ;;  %v801_v16 = vand.u32 2147483648, %v656_v38 }
 0x2d0   :  { %vm800_vm10 = vcmp.eq.f32.partialorder %v799_v6, 8.507059e+37 }
 0x2d1   :  { %v779_v45 = vmul.f32 %v3331_v35, %v778_v12  ;;  %v802_v14 = vor.u32 1.1754944e-38, %v801_v16 }
 0x2d3   :  { %3124 = vmatmul.msk.f32.gmra.mxu3 %vm533_vm4, %v908_v13  ;;  %v780_v56 = vadd.f32 %v3331_v35, %v779_v45 }
 0x2d4   :  { %v3333_v1 = vpop.eup %3332 }
 0x2d5   :  { %v791_v55 = vmul.f32 %v3333_v1, %v656_v38  ;;  %v659_v57 = vpop.xlane.xlu0 %658  ;;  %v784_v60 = vsel %vm783_vm5, %v3331_v35, %v780_v56  ;;  %vm796_vm7 = vweird.f32 %v3333_v1 }
 0x2d6   :  { %3334 = vrcp.f32 %v659_v57  ;;  %v581_v62 = vpop.xlane.xlu1 %580  ;;  %v789_v0 = vsel %vm786_vm6, %v788_v53, %v784_v60  ;;  %vm797_vm9 = vmor %vm795_vm8, %vm796_vm7  ;;  %v813_v24 = vand.u32 2147483647, %v659_v57  ;;  %vm809_vm12 = vweird.f32 %v659_v57 }
 0x2d7   :  { %v792_v3 = vsub.f32 1.0, %v791_v55  ;;  %v597_v5 = vsub.f32 %v4194_v50, %v581_v62  ;;  %v909_v28 = vmul.f32 %v4180_v22, %v789_v0  ;;  %v815_v22 = vand.u32 2147483648, %v659_v57 }
 0x2d8   :  { %vm814_vm14 = vcmp.eq.f32.partialorder %v813_v24, 8.507059e+37 }
 0x2d9   :  { %v793_v7 = vmul.f32 %v3333_v1, %v792_v3  ;;  %v628_v9 = vmul.f32 1.442695, %v597_v5  ;;  %v816_v19 = vor.u32 1.1754944e-38, %v815_v22 }
 0x2db   :  { %3336 = vpow2.f32 %v628_v9  ;;  %3125 = vmatmul.msk.f32.gmra.mxu3 %vm533_vm4, %v909_v28  ;;  %v794_v26 = vadd.f32 %v3333_v1, %v793_v7 }
 0x2dc   :  { %v3335_v11 = vpop.eup %3334 }
 0x2dd   :  { %v805_v15 = vmul.f32 %v3335_v11, %v659_v57  ;;  %v4262_v43 = vpop.xlane.xlu0 %637  ;;  %v798_v17 = vsel %vm797_vm9, %v3333_v1, %v794_v26  ;;  %vm810_vm11 = vweird.f32 %v3335_v11 }
 0x2de   :  { %3338 = vrcp.f32 %v4262_v43  ;;  %v635_v50 = vpop.xlane.xlu1 %634  ;;  %v803_v42 = vsel %vm800_vm10, %v802_v14, %v798_v17  ;;  %vm811_vm13 = vmor %vm809_vm12, %vm810_vm11  ;;  %vm711_vm6 = vweird.f32 %v4262_v43  ;;  %v715_v7 = vand.u32 2147483647, %v4262_v43 }
 0x2df   :  { %v806_v18 = vsub.f32 1.0, %v805_v15  ;;  %3340 = vrcp.f32 %v635_v50  ;;  %v910_v23 = vmul.f32 %v4185_v31, %v803_v42  ;;  %v703_v13 = vand.u32 2147483648, %v635_v50 }
 0x2e0   :  { %vm697_vm0 = vweird.f32 %v635_v50  ;;  %v701_v1 = vand.u32 2147483647, %v635_v50  ;;  %vm716_vm8 = vcmp.eq.f32.partialorder %v715_v7, 8.507059e+37 }
 0x2e1   :  { %v4265_v20 = vpop.eup %3336  ;;  %v807_v21 = vmul.f32 %v3335_v11, %v806_v18  ;;  %v704_v62 = vor.u32 1.1754944e-38, %v703_v13 }
 0x2e2   :  { %v675_v2 = vsel %vm533_vm4, %v4265_v20, 0.0  ;;  %vm702_vm2 = vcmp.eq.f32.partialorder %v701_v1, 8.507059e+37 }
 0x2e3   :  { %676 = vadd.xlane.f32.xlu1 %v675_v2  ;;  %3126 = vmatmul.msk.f32.gmra.mxu3 %vm533_vm4, %v910_v23  ;;  %v808_v54 = vadd.f32 %v3335_v11, %v807_v21 }
 0x2e4   :  { %v3339_v27 = vpop.eup %3338 }
 0x2e5   :  { %v3341_v35 = vpop.eup %3340  ;;  %v707_v61 = vmul.f32 %v3339_v27, %v4262_v43  ;;  %v812_v8 = vsel %vm811_vm13, %v3335_v11, %v808_v54  ;;  %vm712_vm5 = vweird.f32 %v3339_v27 }
 0x2e6   :  { %v693_v38 = vmul.f32 %v3341_v35, %v635_v50  ;;  %v641_v31 = vpop.xlane.xlu0 %640  ;;  %v817_v39 = vsel %vm814_vm14, %v816_v19, %v812_v8  ;;  %vm698_vm15 = vweird.f32 %v3341_v35  ;;  %v4276_v16 = vpop.xlane.xlu1 %664  ;;  %vm713_vm7 = vmor %vm711_vm6, %vm712_vm5 }
 0x2e7   :  { %3342 = vrcp.f32 %v641_v31  ;;  %v708_v4 = vsub.f32 1.0, %v707_v61  ;;  %v911_v40 = vmul.f32 %v4196_v52, %v817_v39  ;;  %vm699_vm1 = vmor %vm697_vm0, %vm698_vm15  ;;  %v717_v52 = vand.u32 2147483648, %v4262_v43 }
 0x2e8   :  { %v694_v12 = vsub.f32 1.0, %v693_v38  ;;  %v731_v42 = vand.u32 2147483648, %v641_v31  ;;  %vm725_vm10 = vweird.f32 %v641_v31  ;;  %v729_v43 = vand.u32 2147483647, %v641_v31 }
 0x2e9   :  { %v709_v48 = vmul.f32 %v3339_v27, %v708_v4  ;;  %v718_v11 = vor.u32 1.1754944e-38, %v717_v52 }
 0x2ea   :  { %v695_v45 = vmul.f32 %v3341_v35, %v694_v12  ;;  %v732_v23 = vor.u32 1.1754944e-38, %v731_v42  ;;  %vm730_vm12 = vcmp.eq.f32.partialorder %v729_v43, 8.507059e+37 }
 0x2eb   :  { %3127 = vmatmul.msk.f32.gmra.mxu3 %vm533_vm4, %v911_v40  ;;  %v710_v3 = vadd.f32 %v3339_v27, %v709_v48 }
 0x2ec   :  { %v696_v56 = vadd.f32 %v3341_v35, %v695_v45 }
 0x2ed   :  { %v3343_v53 = vpop.eup %3342  ;;  %v714_v28 = vsel %vm713_vm7, %v3339_v27, %v710_v3 }
 0x2ee   :  { %v721_v55 = vmul.f32 %v3343_v53, %v641_v31  ;;  %v644_v57 = vpop.xlane.xlu0 %643  ;;  %v700_v60 = vsel %vm699_vm1, %v3341_v35, %v696_v56  ;;  %v719_v15 = vsel %vm716_vm8, %v718_v11, %v714_v28  ;;  %vm726_vm9 = vweird.f32 %v3343_v53  ;;  %v4283_v22 = vpop.xlane.xlu1 %667 }
 0x2ef   :  { %3344 = vrcp.f32 %v644_v57  ;;  %v705_v5 = vsel %vm702_vm2, %v704_v62, %v700_v60  ;;  %vm727_vm11 = vmor %vm725_vm10, %vm726_vm9  ;;  %v745_v19 = vand.u32 2147483648, %v644_v57  ;;  %vm739_vm14 = vweird.f32 %v644_v57 }
 0x2f0   :  { %v722_v0 = vsub.f32 1.0, %v721_v55  ;;  %v903_v6 = vmul.f32 %v4208_v63, %v705_v5  ;;  %3346 = vrcp.f32 %v4276_v16  ;;  %v904_v63 = vmul.f32 %v4204_v59, %v719_v15 }
 0x2f1   :  { %v743_v61 = vand.u32 2147483647, %v644_v57  ;;  %v746_v39 = vor.u32 1.1754944e-38, %v745_v19  ;;  %vm837_vm8 = vweird.f32 %v4276_v16 }
 0x2f2   :  { %v723_v9 = vmul.f32 %v3343_v53, %v722_v0  ;;  %3119 = vmatmul.msk.f32.gmra.mxu0 %vm533_vm4, %v903_v6  ;;  %v843_v6 = vand.u32 2147483648, %v4276_v16 }
 0x2f3   :  { %vm744_vm0 = vcmp.eq.f32.partialorder %v743_v61, 8.507059e+37 }
 0x2f4   :  { %v724_v50 = vadd.f32 %v3343_v53, %v723_v9  ;;  %v841_v9 = vand.u32 2147483647, %v4276_v16 }
 0x2f5   :  { %v3345_v26 = vpop.eup %3344 }
 0x2f6   :  { %v735_v14 = vmul.f32 %v3345_v26, %v644_v57  ;;  %v728_v21 = vsel %vm727_vm11, %v3343_v53, %v724_v50  ;;  %v3347_v24 = vpop.eup %3346  ;;  %vm740_vm13 = vweird.f32 %v3345_v26  ;;  %v4290_v12 = vpop.xlane.xlu1 %670  ;;  %vm842_vm10 = vcmp.eq.f32.partialorder %v841_v9, 8.507059e+37  ;;  %v317_v9 = vld [vmem:[%s5427_s12 + $0x10] sm:$0xff] }
 0x2f7   :  { %v733_v54 = vsel %vm730_vm12, %v732_v23, %v728_v21  ;;  %v833_v59 = vmul.f32 %v3347_v24, %v4276_v16  ;;  %vm741_vm15 = vmor %vm739_vm14, %vm740_vm13  ;;  %vm838_vm6 = vweird.f32 %v3347_v24  ;;  %vm851_vm12 = vweird.f32 %v4283_v22 }
 0x2f8   :  { %v736_v17 = vsub.f32 1.0, %v735_v14  ;;  %v905_v35 = vmul.f32 %v4218_v37, %v733_v54  ;;  %vm839_vm9 = vmor %vm837_vm8, %vm838_vm6  ;;  %v844_v14 = vor.u32 1.1754944e-38, %v843_v6  ;;  %v855_v16 = vand.u32 2147483647, %v4283_v22  ;;  %v318_v6 = vld [vmem:[%s5427_s12 + $0x18] sm:$0xff] }
 0x2f9   :  { %v834_v31 = vsub.f32 1.0, %v833_v59  ;;  %1092 = vmatpush.msra.mxu0 %v318_v6 }
 0x2fa   :  { %v737_v18 = vmul.f32 %v3345_v26, %v736_v17  ;;  %3120 = vmatmul.msk.f32.gmra.mxu0 %vm533_vm4, %v904_v63  ;;  %v857_v63 = vand.u32 2147483648, %v4283_v22  ;;  %vm856_vm14 = vcmp.eq.f32.partialorder %v855_v16, 8.507059e+37 }
 0x2fb   :  { %v835_v48 = vmul.f32 %v3347_v24, %v834_v31  ;;  %1093 = vmatpush.msra.mxu0 %v317_v9 }
 0x2fc   :  { %v738_v27 = vadd.f32 %v3345_v26, %v737_v18  ;;  %v858_v23 = vor.u32 1.1754944e-38, %v857_v63  ;;  %v4339_v63 = vld [vmem:[%s5418_s3] sm:$0xff] }
 0x2fd   :  { %v674_v0 = vpop.xlane.xlu0 %673  ;;  %v836_v52 = vadd.f32 %v3347_v24, %v835_v48 }
 0x2fe   :  { %v662_v2 = vpop.xlane.xlu2 %661  ;;  %v742_v8 = vsel %vm741_vm15, %v3345_v26, %v738_v27  ;;  %v871_v27 = vand.u32 2147483648, %v4290_v12  ;;  %vm879_vm6 = vweird.f32 %v674_v0 }
 0x2ff   :  { %3348 = vrcp.f32 %v662_v2  ;;  %v747_v45 = vsel %vm744_vm0, %v746_v39, %v742_v8  ;;  %v829_v37 = vand.u32 2147483648, %v662_v2  ;;  %v827_v55 = vand.u32 2147483647, %v662_v2 }
 0x300   :  { %3350 = vrcp.f32 %v4283_v22  ;;  %v906_v53 = vmul.f32 %v4227_v58, %v747_v45  ;;  %vm823_vm2 = vweird.f32 %v662_v2  ;;  %v840_v11 = vsel %vm839_vm9, %v3347_v24, %v836_v52 }
 0x301   :  { %3352 = vrcp.f32 %v4290_v12  ;;  %v830_v60 = vor.u32 1.1754944e-38, %v829_v37  ;;  %vm828_vm7 = vcmp.eq.f32.partialorder %v827_v55, 8.507059e+37  ;;  %v845_v15 = vsel %vm842_vm10, %v844_v14, %v840_v11 }
 0x302   :  { %3121 = vmatmul.msk.f32.gmra.mxu0 %vm533_vm4, %v905_v35  ;;  %3354 = vrcp.f32 %v674_v0  ;;  %vm865_vm0 = vweird.f32 %v4290_v12  ;;  %v872_v35 = vor.u32 1.1754944e-38, %v871_v27  ;;  %v883_v39 = vand.u32 2147483647, %v674_v0 }
 0x304   :  { %vm884_vm8 = vcmp.eq.f32.partialorder %v883_v39, 8.507059e+37 }
 0x305   :  { %v3349_v38 = vpop.eup %3348 }
 0x306   :  { %v3351_v4 = vpop.eup %3350  ;;  %v819_v40 = vmul.f32 %v3349_v38, %v662_v2  ;;  %vm824_vm1 = vweird.f32 %v3349_v38 }
 0x307   :  { %v847_v56 = vmul.f32 %v3351_v4, %v4283_v22  ;;  %vm825_vm5 = vmor %vm823_vm2, %vm824_vm1  ;;  %v3353_v5 = vpop.eup %3352  ;;  %vm852_vm11 = vweird.f32 %v3351_v4  ;;  %v869_v22 = vand.u32 2147483647, %v4290_v12 }
 0x308   :  { %v820_v13 = vsub.f32 1.0, %v819_v40  ;;  %v861_v26 = vmul.f32 %v3353_v5, %v4290_v12  ;;  %v3355_v42 = vpop.eup %3354  ;;  %vm853_vm13 = vmor %vm851_vm12, %vm852_vm11  ;;  %vm866_vm15 = vweird.f32 %v3353_v5 }
 0x309   :  { %v848_v62 = vsub.f32 1.0, %v847_v56  ;;  %v875_v18 = vmul.f32 %v3355_v42, %v674_v0  ;;  %vm867_vm1 = vmor %vm865_vm0, %vm866_vm15  ;;  %vm870_vm2 = vcmp.eq.f32.partialorder %v869_v22, 8.507059e+37 }
 0x30a   :  { %v821_v1 = vmul.f32 %v3349_v38, %v820_v13  ;;  %3122 = vmatmul.msk.f32.gmra.mxu0 %vm533_vm4, %v906_v53  ;;  %v862_v17 = vsub.f32 1.0, %v861_v26 }
 0x30b   :  { %v849_v28 = vmul.f32 %v3351_v4, %v848_v62  ;;  %v876_v2 = vsub.f32 1.0, %v875_v18 }
 0x30c   :  { %v822_v57 = vadd.f32 %v3349_v38, %v821_v1  ;;  %v863_v43 = vmul.f32 %v3353_v5, %v862_v17 }
 0x30d   :  { %v850_v50 = vadd.f32 %v3351_v4, %v849_v28  ;;  %v877_v59 = vmul.f32 %v3355_v42, %v876_v2  ;;  %v315_v28 = vld [vmem:[%s5427_s12] sm:$0xff] }
 0x30e   :  { %v826_v3 = vsel %vm825_vm5, %v3349_v38, %v822_v57  ;;  %v864_v54 = vadd.f32 %v3353_v5, %v863_v43  ;;  %vm880_vm5 = vweird.f32 %v3355_v42  ;;  %v885_v38 = vand.u32 2147483648, %v674_v0  ;;  %v4345_v43 = vld [vmem:[%s5418_s3 + $0x40] sm:$0xff] }
 0x30f   :  { %v831_v7 = vsel %vm828_vm7, %v830_v60, %v826_v3  ;;  %v854_v21 = vsel %vm853_vm13, %v3351_v4, %v850_v50  ;;  %v878_v8 = vadd.f32 %v3355_v42, %v877_v59  ;;  %vm881_vm7 = vmor %vm879_vm6, %vm880_vm5  ;;  %v4333_v50 = vld [vmem:[%s5418_s3 + $0x20] sm:$0xff] }
 0x310   :  { %v912_v58 = vmul.f32 %v4239_v29, %v831_v7  ;;  %v913_v29 = vmul.f32 %v4216_v10, %v845_v15  ;;  %v859_v24 = vsel %vm856_vm14, %v858_v23, %v854_v21  ;;  %v868_v19 = vsel %vm867_vm1, %v3353_v5, %v864_v54  ;;  %v4351_v23 = vld [vmem:[%s5418_s3 + $0x8] sm:$0xff]  ;;  %v4357_v2 = vld [vmem:[%s5418_s3 + $0x60] sm:$0xff] }
 0x311   :  { %v914_v10 = vmul.f32 %v4225_v41, %v859_v24  ;;  %v873_v61 = vsel %vm870_vm2, %v872_v35, %v868_v19  ;;  %v882_v41 = vsel %vm881_vm7, %v3355_v42, %v878_v8  ;;  %v886_v4 = vor.u32 1.1754944e-38, %v885_v38  ;;  %v4370_v35 = vld [vmem:[%s5418_s3 + $0x48] sm:$0xff] }
 0x312   :  { %3128 = vmatmul.msk.f32.gmra.mxu3 %vm533_vm4, %v912_v58  ;;  %v915_v31 = vmul.f32 %v4235_v25, %v873_v61 }
 0x313   :  { %v887_v12 = vsel %vm884_vm8, %v886_v4, %v882_v41  ;;  %v4382_v41 = vld [vmem:[%s5418_s3 + $0x10] sm:$0xff] }
 0x314   :  { %v916_v40 = vmul.f32 %v4241_v33, %v887_v12 }
 0x31a   :  { %3129 = vmatmul.msk.f32.gmra.mxu3 %vm533_vm4, %v913_v29 }
 0x322   :  { %3130 = vmatmul.msk.f32.gmra.mxu3 %vm533_vm4, %v914_v10  ;;  %v4363_v10 = vld [vmem:[%s5418_s3 + $0x28] sm:$0xff] }
 0x32a   :  { %3131 = vmatmul.msk.f32.gmra.mxu3 %vm533_vm4, %v915_v31  ;;  %v4376_v31 = vld [vmem:[%s5418_s3 + $0x68] sm:$0xff] }
 0x332   :  { %3132 = vmatmul.msk.f32.gmra.mxu3 %vm533_vm4, %v916_v40  ;;  %v4388_v40 = vld [vmem:[%s5418_s3 + $0x30] sm:$0xff] }
 0x348   :  { %v989_v3 = vpop.f32.mrf.mxu0 }
 0x349   :  { %v1037_v29 = vmul.f32 %v4339_v63, %v989_v3 }
 0x34e   :  { %v1004_v55 = vpop.f32.mrf.mxu3 }
 0x34f   :  { %v1042_v22 = vmul.f32 %v4363_v10, %v1004_v55 }
 0x356   :  { %v677_v45 = vpop.xlane.xlu1 %676  ;;  %v1007_v0 = vpop.f32.mrf.mxu3 }
 0x357   :  { %3356 = vrcp.f32 %v677_v45  ;;  %v899_v37 = vand.u32 2147483648, %v677_v45  ;;  %v897_v25 = vand.u32 2147483647, %v677_v45  ;;  %vm893_vm10 = vweird.f32 %v677_v45 }
 0x359   :  { %v900_v57 = vor.u32 1.1754944e-38, %v899_v37  ;;  %vm898_vm12 = vcmp.eq.f32.partialorder %v897_v25, 8.507059e+37  ;;  %v4401_v25 = vld [vmem:[%s5418_s3 + $0x70] sm:$0xff] }
 0x35d   :  { %v3357_v13 = vpop.eup %3356 }
 0x35e   :  { %v889_v48 = vmul.f32 %v3357_v13, %v677_v45  ;;  %vm894_vm9 = vweird.f32 %v3357_v13  ;;  %v1010_v52 = vpop.f32.mrf.mxu3  ;;  %v1043_v45 = vmul.f32 %v4388_v40, %v1007_v0  ;;  %v4420_v0 = vld [vmem:[%s5418_s3 + $0x58] sm:$0xff] }
 0x35f   :  { %vm895_vm11 = vmor %vm893_vm10, %vm894_vm9 }
 0x360   :  { %v890_v56 = vsub.f32 1.0, %v889_v48 }
 0x362   :  { %v891_v1 = vmul.f32 %v3357_v13, %v890_v56 }
 0x364   :  { %v892_v53 = vadd.f32 %v3357_v13, %v891_v1 }
 0x366   :  { %v896_v60 = vsel %vm895_vm11, %v3357_v13, %v892_v53  ;;  %v1013_v7 = vpop.f32.mrf.mxu3  ;;  %v4394_v13 = vld [vmem:[%s5418_s3 + $0x50] sm:$0xff] }
 0x367   :  { %v901_v62 = vsel %vm898_vm12, %v900_v57, %v896_v60  ;;  %v1045_v18 = vmul.f32 %v4345_v43, %v1013_v7  ;;  %v4408_v57 = vld [vmem:[%s5418_s3 + $0x18] sm:$0xff] }
 0x368   :  { %v917_v33 = vmul.f32 %v4265_v20, %v901_v62  ;;  %v316_v20 = vld [vmem:[%s5427_s12 + $0x8] sm:$0xff]  ;;  %v4414_v62 = vld [vmem:[%s5418_s3 + $0x38] sm:$0xff] }
 0x369   :  { %1094 = vmatpush.msra.mxu0 %v316_v20 }
 0x36a   :  { %3133 = vmatmul.msk.f32.gmra.mxu3 %vm533_vm4, %v917_v33  ;;  %v1044_v33 = vmul.f32 %v4414_v62, %v1010_v52  ;;  %v3283_v52 = vld [vmem:[%s5428_s13] ss:$0 sm:$0xff] }
 0x36b   :  { %1095 = vmatpush.msra.mxu0 %v315_v28 }
 0x36e   :  { %v1016_v26 = vpop.f32.mrf.mxu3 }
 0x36f   :  { %v992_v5 = vpop.f32.mrf.mxu0  ;;  %v1046_v61 = vmul.f32 %v4370_v35, %v1016_v26 }
 0x370   :  { %v1038_v24 = vmul.f32 %v4351_v23, %v992_v5 }
 0x372   :  { %v1054_v19 = vadd.f32 %v1042_v22, %v1038_v24 }
 0x374   :  { %v1058_v38 = vadd.f32 %v1054_v19, %v1046_v61 }
 0x377   :  { %v995_v58 = vpop.f32.mrf.mxu0 }
 0x378   :  { %v1039_v4 = vmul.f32 %v4382_v41, %v995_v58  ;;  %v4426_v58 = vld [vmem:[%s5418_s3 + $0x78] sm:$0xff] }
 0x37a   :  { %v1055_v56 = vadd.f32 %v1043_v45, %v1039_v4 }
 0x37f   :  { %v998_v11 = vpop.f32.mrf.mxu0 }
 0x380   :  { %v1040_v60 = vmul.f32 %v4408_v57, %v998_v11 }
 0x382   :  { %v1056_v5 = vadd.f32 %v1044_v33, %v1040_v60 }
 0x387   :  { %v1001_v15 = vpop.f32.mrf.mxu0 }
 0x388   :  { %v1041_v42 = vmul.f32 %v4333_v50, %v1001_v15 }
 0x38a   :  { %v1053_v16 = vadd.f32 %v1041_v42, %v1037_v29 }
 0x38c   :  { %v1057_v27 = vadd.f32 %v1053_v16, %v1045_v18 }
 0x395   :  { %v1019_v14 = vpop.f32.mrf.mxu3 }
 0x396   :  { %v1047_v48 = vmul.f32 %v4394_v13, %v1019_v14 }
 0x398   :  { %v1059_v1 = vadd.f32 %v1055_v56, %v1047_v48 }
 0x39d   :  { %v1022_v17 = vpop.f32.mrf.mxu3 }
 0x39e   :  { %v1048_v3 = vmul.f32 %v4420_v0, %v1022_v17 }
 0x3a0   :  { %v1060_v7 = vadd.f32 %v1056_v5, %v1048_v3 }
 0x3a5   :  { %v1025_v21 = vpop.f32.mrf.mxu3 }
 0x3a6   :  { %v1049_v54 = vmul.f32 %v4357_v2, %v1025_v21 }
 0x3a8   :  { %v1061_v59 = vadd.f32 %v1057_v27, %v1049_v54 }
 0x3aa   :  { %3134 = vmatmul.msk.f32.vlgmr.msra.gmra.mxu0 %vm241_vm3, %v1061_v59  ;;  %v3753_v59 = vmov 32.0  }
 0x3ab   :  { %3358 = vrcp.f32 %v3753_v59 }
 0x3ad   :  { %v1028_v8 = vpop.f32.mrf.mxu3 }
 0x3ae   :  { %v1050_v39 = vmul.f32 %v4376_v31, %v1028_v8 }
 0x3b0   :  { %v1062_v12 = vadd.f32 %v1058_v38, %v1050_v39 }
 0x3b2   :  { %3135 = vmatmul.msk.f32.gmra.mxu0 %vm241_vm3, %v1062_v12 }
 0x3b5   :  { %v1031_v37 = vpop.f32.mrf.mxu3 }
 0x3b6   :  { %v1051_v53 = vmul.f32 %v4401_v25, %v1031_v37 }
 0x3b8   :  { %v1063_v55 = vadd.f32 %v1059_v1, %v1051_v53 }
 0x3ba   :  { %3136 = vmatmul.msk.f32.gmra.mxu0 %vm241_vm3, %v1063_v55 }
 0x3ed   :  { %v1034_v6 = vpop.f32.mrf.mxu3 }
 0x3ee   :  { %v1052_v9 = vmul.f32 %v4426_v58, %v1034_v6 }
 0x3f0   :  { %v1064_v20 = vadd.f32 %v1060_v7, %v1052_v9 }
 0x3f2   :  { %3137 = vmatmul.msk.f32.gmra.mxu0 %vm241_vm3, %v1064_v20 }
 0x427   :  { %v1097_v28 = vpop.f32.mrf.mxu0 }
 0x428   :  { %v1098_v26 = vadd.f32 %v3283_v52, %v1097_v28 }
 0x42a   :  { %v1109_v11 = vadd.f32 %v1098_v26, %v3943_v30 }
 0x42c   :  { %v1113_v14 = vsel %vm241_vm3, %v1109_v11, 0.0 }
 0x42d   :  { %1114 = vadd.xlane.f32.xlu0 %v1113_v14 }
 0x42f   :  { %v1100_v15 = vpop.f32.mrf.mxu0 }
 0x430   :  { %v1101_v17 = vadd.f32 %v3283_v52, %v1100_v15 }
 0x432   :  { %v1110_v42 = vadd.f32 %v1101_v17, %v3947_v32  ;;  %v3359_v32 = vpop.eup %3358 }
 0x433   :  { %v1126_v19 = vmul.f32 32.0, %v3359_v32  ;;  %vm1130_vm13 = vweird.f32 %v3359_v32 }
 0x434   :  { %v1116_v29 = vsel %vm241_vm3, %v1110_v42, 0.0 }
 0x435   :  { %1117 = vadd.xlane.f32.xlu1 %v1116_v29  ;;  %v1127_v61 = vsub.f32 1.0, %v1126_v19  ;;  %v3284_v19 = vld [vmem:[%s5429_s14] ss:$0 sm:$0xff] }
 0x437   :  { %v1103_v16 = vpop.f32.mrf.mxu0  ;;  %v1128_v8 = vmul.f32 %v3359_v32, %v1127_v61 }
 0x438   :  { %v1104_v18 = vadd.f32 %v3283_v52, %v1103_v16 }
 0x439   :  { %v1129_v38 = vadd.f32 %v3359_v32, %v1128_v8 }
 0x43a   :  { %v1111_v21 = vadd.f32 %v1104_v18, %v3951_v34 }
 0x43b   :  { %v4441_v39 = vsel %vm1130_vm13, %v3359_v32, %v1129_v38 }
 0x43c   :  { %v1119_v24 = vsel %vm241_vm3, %v1111_v21, 0.0 }
 0x43d   :  { %1120 = vadd.xlane.f32.xlu2 %v1119_v24 }
 0x46f   :  { %v1106_v54 = vpop.f32.mrf.mxu0 }
 0x470   :  { %v1107_v27 = vadd.f32 %v3283_v52, %v1106_v54 }
 0x472   :  { %v1112_v30 = vadd.f32 %v1107_v27, %v3955_v36 }
 0x474   :  { %v1122_v22 = vsel %vm241_vm3, %v1112_v30, 0.0 }
 0x475   :  { %1123 = vadd.xlane.f32.xlu0 %v1122_v22 }
 0x4a0   :  { %v1115_v34 = vpop.xlane.xlu0 %1114 }
 0x4a1   :  { %v1132_v4 = vmul.f32 %v4441_v39, %v1115_v34  ;;  %v3285_v34 = vld [vmem:[#allocation8] ss:$0 sm:$0xff] }
 0x4a3   :  { %v1136_v12 = vsub.f32 %v1109_v11, %v1132_v4 }
 0x4a5   :  { %v1140_v45 = vmul.f32 %v1136_v12, %v1136_v12 }
 0x4a7   :  { %v1144_v36 = vsel %vm241_vm3, %v1140_v45, 0.0 }
 0x4a8   :  { %1145 = vadd.xlane.f32.xlu1 %v1144_v36  ;;  %v1118_v48 = vpop.xlane.xlu1 %1117 }
 0x4a9   :  { %v1133_v56 = vmul.f32 %v4441_v39, %v1118_v48 }
 0x4ab   :  { %v1137_v37 = vsub.f32 %v1110_v42, %v1133_v56 }
 0x4ad   :  { %v1141_v1 = vmul.f32 %v1137_v37, %v1137_v37 }
 0x4af   :  { %v1147_v53 = vsel %vm241_vm3, %v1141_v1, 0.0 }
 0x4b0   :  { %v1121_v55 = vpop.xlane.xlu2 %1120  ;;  %1148 = vadd.xlane.f32.xlu2 %v1147_v53 }
 0x4b1   :  { %v1134_v60 = vmul.f32 %v4441_v39, %v1121_v55 }
 0x4b3   :  { %v4448_v33 = vsub.f32 %v1111_v21, %v1134_v60 }
 0x4b5   :  { %v1142_v3 = vmul.f32 %v4448_v33, %v4448_v33 }
 0x4b7   :  { %v1150_v5 = vsel %vm241_vm3, %v1142_v3, 0.0 }
 0x4b8   :  { %1151 = vadd.xlane.f32.xlu0 %v1150_v5 }
 0x4c8   :  { %1302 = vrot.lane.b32.xlu2 %v3962_v44, %s3754_s23 }
 0x4cc   :  { %1300 = vrot.lane.b32.xlu0 %v3974_v51, %s3754_s23 }
 0x4e8   :  { %v1124_v6 = vpop.xlane.xlu0 %1123 }
 0x4e9   :  { %v1135_v7 = vmul.f32 %v4441_v39, %v1124_v6 }
 0x4eb   :  { %v4458_v9 = vsub.f32 %v1112_v30, %v1135_v7 }
 0x4ed   :  { %v1143_v20 = vmul.f32 %v4458_v9, %v4458_v9 }
 0x4ef   :  { %v1153_v52 = vsel %vm241_vm3, %v1143_v20, 0.0 }
 0x4f0   :  { %1154 = vadd.xlane.f32.xlu1 %v1153_v52 }
 0x51b   :  { %v1146_v28 = vpop.xlane.xlu1 %1145 }
 0x51c   :  { %v1156_v26 = vmul.f32 %v1146_v28, %v4441_v39 }
 0x51e   :  { %v1160_v11 = vadd.f32 1e-05, %v1156_v26 }
 0x520   :  { %3360 = vrsqrt.f32 %v1160_v11  ;;  %vm1170_vm15 = vweird.f32 %v1160_v11 }
 0x523   :  { %v1149_v14 = vpop.xlane.xlu2 %1148 }
 0x524   :  { %v1157_v15 = vmul.f32 %v1149_v14, %v4441_v39 }
 0x526   :  { %v3361_v17 = vpop.eup %3360  ;;  %v1161_v42 = vadd.f32 1e-05, %v1157_v15 }
 0x527   :  { %v1165_v29 = vmul.f32 %v3361_v17, %v1160_v11  ;;  %vm1171_vm14 = vweird.f32 %v3361_v17 }
 0x528   :  { %3362 = vrsqrt.f32 %v1161_v42  ;;  %vm1172_vm0 = vmor %vm1170_vm15, %vm1171_vm14  ;;  %vm1180_vm2 = vweird.f32 %v1161_v42 }
 0x529   :  { %v1166_v16 = vmul.f32 %v3361_v17, %v1165_v29 }
 0x52b   :  { %v1167_v18 = vmul.f32 0.5, %v1166_v16  ;;  %v1152_v21 = vpop.xlane.xlu0 %1151  ;;  %v1303_v24 = vpop.permute.xlu2 %1302 }
 0x52c   :  { %v1158_v54 = vmul.f32 %v1152_v21, %v4441_v39  ;;  %3153 = vmatpush.xpose.msk.msrb.mxu0 %vm241_vm3, %v1303_v24 }
 0x52d   :  { %v1168_v27 = vsub.f32 1.5, %v1167_v18 }
 0x52e   :  { %v3363_v30 = vpop.eup %3362  ;;  %v1162_v22 = vadd.f32 1e-05, %v1158_v54 }
 0x52f   :  { %v1169_v59 = vmul.f32 %v3361_v17, %v1168_v27  ;;  %v1175_v32 = vmul.f32 %v3363_v30, %v1161_v42  ;;  %vm1181_vm1 = vweird.f32 %v3363_v30 }
 0x530   :  { %3364 = vrsqrt.f32 %v1162_v22  ;;  %vm1182_vm5 = vmor %vm1180_vm2, %vm1181_vm1  ;;  %vm1190_vm7 = vweird.f32 %v1162_v22 }
 0x531   :  { %v1173_v61 = vsel %vm1172_vm0, %v3361_v17, %v1169_v59  ;;  %v1176_v8 = vmul.f32 %v3363_v30, %v1175_v32 }
 0x532   :  { %v1204_v38 = vmul.f32 %v1173_v61, %v1136_v12 }
 0x533   :  { %v1177_v4 = vmul.f32 0.5, %v1176_v8 }
 0x534   :  { %v1211_v45 = vmul.f32 %v3284_v19, %v1204_v38 }
 0x535   :  { %v1178_v36 = vsub.f32 1.5, %v1177_v4 }
 0x536   :  { %v3365_v48 = vpop.eup %3364  ;;  %v4470_v56 = vadd.f32 %v3285_v34, %v1211_v45 }
 0x537   :  { %v1179_v1 = vmul.f32 %v3363_v30, %v1178_v36  ;;  %v1185_v53 = vmul.f32 %v3365_v48, %v1162_v22  ;;  %vm1191_vm6 = vweird.f32 %v3365_v48  ;;  %v3286_v22 = vld [vmem:[%s5424_s9 + $0x1] ss:$0 sm:$0xff] }
 0x538   :  { %3149 = vmatmul.msk.f32.vlgmr.msrb.gmra.mxu1 %vm241_vm3, %v4470_v56  ;;  %vm1192_vm8 = vmor %vm1190_vm7, %vm1191_vm6 }
 0x539   :  { %v1183_v55 = vsel %vm1182_vm5, %v3363_v30, %v1179_v1  ;;  %v1186_v60 = vmul.f32 %v3365_v48, %v1185_v53 }
 0x53a   :  { %v1205_v3 = vmul.f32 %v1183_v55, %v1137_v37 }
 0x53b   :  { %v1187_v5 = vmul.f32 0.5, %v1186_v60 }
 0x53c   :  { %v1212_v12 = vmul.f32 %v3284_v19, %v1205_v3 }
 0x53d   :  { %v1188_v6 = vsub.f32 1.5, %v1187_v5 }
 0x53e   :  { %v1301_v7 = vpop.permute.xlu0 %1300  ;;  %v4474_v20 = vadd.f32 %v3285_v34, %v1212_v12 }
 0x53f   :  { %v1189_v52 = vmul.f32 %v3365_v48, %v1188_v6  ;;  %3154 = vmatpush.xpose.msk.msrb.mxu0 %vm241_vm3, %v1301_v7 }
 0x540   :  { %3150 = vmatmul.msk.f32.gmra.mxu1 %vm241_vm3, %v4474_v20 }
 0x541   :  { %v1193_v28 = vsel %vm1192_vm8, %v3365_v48, %v1189_v52 }
 0x542   :  { %v1206_v26 = vmul.f32 %v1193_v28, %v4448_v33 }
 0x544   :  { %v1213_v11 = vmul.f32 %v3284_v19, %v1206_v26 }
 0x546   :  { %v4480_v37 = vadd.f32 %v3285_v34, %v1213_v11 }
 0x548   :  { %3151 = vmatmul.msk.f32.gmra.mxu1 %vm241_vm3, %v4480_v37 }
 0x563   :  { %v1155_v14 = vpop.xlane.xlu1 %1154 }
 0x564   :  { %v1159_v15 = vmul.f32 %v1155_v14, %v4441_v39 }
 0x566   :  { %v1163_v17 = vadd.f32 1e-05, %v1159_v15 }
 0x568   :  { %3366 = vrsqrt.f32 %v1163_v17  ;;  %vm1200_vm10 = vweird.f32 %v1163_v17 }
 0x56e   :  { %v3367_v42 = vpop.eup %3366 }
 0x56f   :  { %v1195_v29 = vmul.f32 %v3367_v42, %v1163_v17  ;;  %vm1201_vm9 = vweird.f32 %v3367_v42 }
 0x570   :  { %vm1202_vm11 = vmor %vm1200_vm10, %vm1201_vm9 }
 0x571   :  { %v1196_v16 = vmul.f32 %v3367_v42, %v1195_v29 }
 0x573   :  { %v1197_v18 = vmul.f32 0.5, %v1196_v16 }
 0x575   :  { %v1198_v21 = vsub.f32 1.5, %v1197_v18 }
 0x577   :  { %v1199_v24 = vmul.f32 %v3367_v42, %v1198_v21 }
 0x579   :  { %v1203_v33 = vsel %vm1202_vm11, %v3367_v42, %v1199_v24  ;;  %v3531_v42 = vld [vmem:[%s5417_s2 + $0x18] sm:$0xff] }
 0x57a   :  { %v1207_v54 = vmul.f32 %v1203_v33, %v4458_v9 }
 0x57c   :  { %v1214_v27 = vmul.f32 %v3284_v19, %v1207_v54  ;;  %v3533_v54 = vld [vmem:[%s5417_s2 + $0x28] sm:$0xff] }
 0x57e   :  { %v4486_v30 = vadd.f32 %v3285_v34, %v1214_v27 }
 0x580   :  { %3152 = vmatmul.msk.f32.gmra.mxu1 %vm241_vm3, %v4486_v30 }
 0x5b5   :  { %v1272_v59 = vpop.f32.mrf.mxu1 }
 0x5b6   :  { %v1273_v32 = vadd.f32 %v3286_v22, %v1272_v59 }
 0x5b8   :  { %v1284_v61 = vmul.f32 %v4339_v63, %v1273_v32  ;;  %v1288_v63 = vmul.f32 %v4333_v50, %v1273_v32  ;;  %v1296_v52 = vmul.f32 %v4357_v2, %v1273_v32 }
 0x5ba   :  { %3155 = vmatmul.msk.f32.vlgmr.msrb.gmra.mxu0 %vm241_vm3, %v1284_v61  ;;  %v3534_v61 = vld [vmem:[%s5417_s2 + $0x30] sm:$0xff] }
 0x5bd   :  { %v1275_v8 = vpop.f32.mrf.mxu1 }
 0x5be   :  { %v1276_v38 = vadd.f32 %v3286_v22, %v1275_v8 }
 0x5c0   :  { %v1285_v9 = vmul.f32 %v4351_v23, %v1276_v38  ;;  %v1289_v23 = vmul.f32 %v4363_v10, %v1276_v38  ;;  %v1293_v50 = vmul.f32 %v4370_v35, %v1276_v38  ;;  %v1297_v11 = vmul.f32 %v4376_v31, %v1276_v38 }
 0x5c2   :  { %3156 = vmatmul.msk.f32.gmra.mxu0 %vm241_vm3, %v1285_v9 }
 0x5c5   :  { %v1278_v19 = vpop.f32.mrf.mxu1 }
 0x5c6   :  { %v1279_v34 = vadd.f32 %v3286_v22, %v1278_v19 }
 0x5c8   :  { %v1286_v4 = vmul.f32 %v4382_v41, %v1279_v34  ;;  %v1290_v1 = vmul.f32 %v4388_v40, %v1279_v34  ;;  %v1294_v55 = vmul.f32 %v4394_v13, %v1279_v34  ;;  %v3528_v40 = vld [vmem:[%s5417_s2] sm:$0xff]  ;;  %v3529_v13 = vld [vmem:[%s5417_s2 + $0x8] sm:$0xff]  ;;  %v1298_v14 = vmul.f32 %v4401_v25, %v1279_v34  ;;  %v3535_v34 = vld [vmem:[%s5417_s2 + $0x38] sm:$0xff] }
 0x5ca   :  { %3157 = vmatmul.msk.f32.gmra.mxu0 %vm241_vm3, %v1286_v4 }
 0x5fd   :  { %v1281_v45 = vpop.f32.mrf.mxu1 }
 0x5fe   :  { %v1282_v36 = vadd.f32 %v3286_v22, %v1281_v45 }
 0x600   :  { %v1287_v48 = vmul.f32 %v4408_v57, %v1282_v36  ;;  %v1291_v41 = vmul.f32 %v4414_v62, %v1282_v36  ;;  %v1292_v57 = vmul.f32 %v4345_v43, %v1273_v32  ;;  %v1295_v3 = vmul.f32 %v4420_v0, %v1282_v36  ;;  %v3530_v0 = vld [vmem:[%s5417_s2 + $0x10] sm:$0xff] }
 0x601   :  { %v1299_v2 = vmul.f32 %v4426_v58, %v1282_v36  ;;  %v3532_v58 = vld [vmem:[%s5417_s2 + $0x20] sm:$0xff] }
 0x602   :  { %3158 = vmatmul.msk.f32.gmra.mxu0 %vm241_vm3, %v1287_v48 }
 0x60a   :  { %3159 = vmatmul.msk.f32.gmra.mxu0 %vm241_vm3, %v1288_v63  ;;  %v3536_v63 = vld [vmem:[%s5417_s2 + $0x40] sm:$0xff] }
 0x612   :  { %3160 = vmatmul.msk.f32.gmra.mxu0 %vm241_vm3, %v1289_v23 }
 0x61a   :  { %3161 = vmatmul.msk.f32.gmra.mxu0 %vm241_vm3, %v1290_v1 }
 0x622   :  { %3162 = vmatmul.msk.f32.gmra.mxu0 %vm241_vm3, %v1291_v41 }
 0x62a   :  { %3163 = vmatmul.msk.f32.gmra.mxu0 %vm241_vm3, %v1292_v57 }
 0x632   :  { %3164 = vmatmul.msk.f32.gmra.mxu0 %vm241_vm3, %v1293_v50 }
 0x637   :  { %v1373_v53 = vpop.f32.mrf.mxu0 }
 0x638   :  { %v1421_v10 = vmul.f32 0.35355338, %v1373_v53 }
 0x63a   :  { %3165 = vmatmul.msk.f32.gmra.mxu0 %vm241_vm3, %v1294_v55  ;;  %v4518_v62 = vadd.f32 %v3528_v40, %v1421_v10 }
 0x63c   :  { %v1453_v43 = vsel %vm533_vm4, %v4518_v62, -inf }
 0x63d   :  { %1454 = vmax.xlane.f32.xlu1 %v1453_v43 }
 0x63f   :  { %v1376_v60 = vpop.f32.mrf.mxu0 }
 0x640   :  { %v1422_v35 = vmul.f32 0.35355338, %v1376_v60 }
 0x642   :  { %3166 = vmatmul.msk.f32.gmra.mxu0 %vm241_vm3, %v1295_v3  ;;  %v1438_v5 = vadd.f32 %v3529_v13, %v1422_v35 }
 0x644   :  { %v1456_v12 = vsel %vm533_vm4, %v1438_v5, -inf }
 0x645   :  { %1457 = vmax.xlane.f32.xlu1 %v1456_v12 }
 0x647   :  { %v1379_v6 = vpop.f32.mrf.mxu0 }
 0x648   :  { %v1423_v7 = vmul.f32 0.35355338, %v1379_v6 }
 0x64a   :  { %3167 = vmatmul.msk.f32.gmra.mxu0 %vm241_vm3, %v1296_v52  ;;  %v1439_v28 = vadd.f32 %v3530_v0, %v1423_v7 }
 0x64c   :  { %v1459_v26 = vsel %vm533_vm4, %v1439_v28, -inf }
 0x64d   :  { %1460 = vmax.xlane.f32.xlu1 %v1459_v26 }
 0x652   :  { %3168 = vmatmul.msk.f32.gmra.mxu0 %vm241_vm3, %v1297_v11 }
 0x65a   :  { %3169 = vmatmul.msk.f32.gmra.mxu0 %vm241_vm3, %v1298_v14  ;;  %v3538_v14 = vld [vmem:[%s5417_s2 + $0x50] sm:$0xff] }
 0x662   :  { %3170 = vmatmul.msk.f32.gmra.mxu0 %vm241_vm3, %v1299_v2 }
 0x67f   :  { %v1382_v15 = vpop.f32.mrf.mxu0 }
 0x680   :  { %v1424_v17 = vmul.f32 0.35355338, %v1382_v15 }
 0x682   :  { %v4543_v29 = vadd.f32 %v3531_v42, %v1424_v17 }
 0x684   :  { %v1462_v31 = vsel %vm533_vm4, %v4543_v29, -inf }
 0x685   :  { %1463 = vmax.xlane.f32.xlu2 %v1462_v31 }
 0x687   :  { %v1385_v16 = vpop.f32.mrf.mxu0 }
 0x688   :  { %v1425_v25 = vmul.f32 0.35355338, %v1385_v16 }
 0x68a   :  { %v4550_v18 = vadd.f32 %v3532_v58, %v1425_v25 }
 0x68c   :  { %v1465_v21 = vsel %vm533_vm4, %v4550_v18, -inf }
 0x68d   :  { %1466 = vmax.xlane.f32.xlu0 %v1465_v21 }
 0x68f   :  { %v1388_v24 = vpop.f32.mrf.mxu0 }
 0x690   :  { %v1426_v33 = vmul.f32 0.35355338, %v1388_v24 }
 0x692   :  { %v4557_v27 = vadd.f32 %v3533_v54, %v1426_v33 }
 0x694   :  { %v1468_v22 = vsel %vm533_vm4, %v4557_v27, -inf }
 0x695   :  { %1469 = vmax.xlane.f32.xlu1 %v1468_v22 }
 0x697   :  { %v1391_v59 = vpop.f32.mrf.mxu0 }
 0x698   :  { %v1427_v32 = vmul.f32 0.35355338, %v1391_v59 }
 0x69a   :  { %v4564_v8 = vadd.f32 %v3534_v61, %v1427_v32 }
 0x69c   :  { %v1471_v38 = vsel %vm533_vm4, %v4564_v8, -inf }
 0x69d   :  { %1472 = vmax.xlane.f32.xlu1 %v1471_v38 }
 0x69f   :  { %v1394_v9 = vpop.f32.mrf.mxu0 }
 0x6a0   :  { %v1428_v19 = vmul.f32 0.35355338, %v1394_v9 }
 0x6a2   :  { %v4571_v4 = vadd.f32 %v3535_v34, %v1428_v19 }
 0x6a4   :  { %v1474_v45 = vsel %vm533_vm4, %v4571_v4, -inf }
 0x6a5   :  { %1475 = vmax.xlane.f32.xlu1 %v1474_v45 }
 0x6a7   :  { %v1397_v36 = vpop.f32.mrf.mxu0 }
 0x6a8   :  { %v1429_v48 = vmul.f32 0.35355338, %v1397_v36 }
 0x6aa   :  { %v4578_v23 = vadd.f32 %v3536_v63, %v1429_v48  ;;  %v3540_v48 = vld [vmem:[%s5417_s2 + $0x60] sm:$0xff] }
 0x6ac   :  { %v1477_v1 = vsel %vm533_vm4, %v4578_v23, -inf }
 0x6ad   :  { %1478 = vmax.xlane.f32.xlu2 %v1477_v1 }
 0x6af   :  { %v1400_v60 = vpop.f32.mrf.mxu0 }
 0x6b0   :  { %v1455_v41 = vpop.xlane.xlu1 %1454  ;;  %v1430_v6 = vmul.f32 0.35355338, %v1400_v60 }
 0x6b1   :  { %v1501_v57 = vsub.f32 %v4518_v62, %v1455_v41 }
 0x6b3   :  { %v1517_v50 = vmul.f32 1.442695, %v1501_v57 }
 0x6b5   :  { %3368 = vpow2.f32 %v1517_v50 }
 0x6b7   :  { %v1403_v52 = vpop.f32.mrf.mxu0 }
 0x6b8   :  { %v1458_v53 = vpop.xlane.xlu1 %1457  ;;  %v1431_v26 = vmul.f32 0.35355338, %v1403_v52  ;;  %v3542_v52 = vld [vmem:[%s5417_s2 + $0x70] sm:$0xff] }
 0x6b9   :  { %v1502_v10 = vsub.f32 %v1438_v5, %v1458_v53  ;;  %v3537_v5 = vld [vmem:[%s5417_s2 + $0x48] sm:$0xff] }
 0x6ba   :  { %v4594_v7 = vadd.f32 %v3537_v5, %v1430_v6  ;;  %v4605_v2 = vadd.f32 %v3538_v14, %v1431_v26 }
 0x6bb   :  { %v4583_v55 = vpop.eup %3368  ;;  %v1519_v40 = vmul.f32 1.442695, %v1502_v10 }
 0x6bc   :  { %v1549_v43 = vsel %vm533_vm4, %v4583_v55, 0.0  ;;  %v1483_v15 = vsel %vm533_vm4, %v4605_v2, -inf }
 0x6bd   :  { %3370 = vpow2.f32 %v1519_v40  ;;  %1550 = vadd.xlane.f32.xlu1 %v1549_v43  ;;  %v3541_v43 = vld [vmem:[%s5417_s2 + $0x68] sm:$0xff] }
 0x6bf   :  { %v1406_v42 = vpop.f32.mrf.mxu0 }
 0x6c0   :  { %v1461_v35 = vpop.xlane.xlu1 %1460  ;;  %v1432_v54 = vmul.f32 0.35355338, %v1406_v42 }
 0x6c1   :  { %v1503_v3 = vsub.f32 %v1439_v28, %v1461_v35  ;;  %v1480_v28 = vsel %vm533_vm4, %v4594_v7, -inf }
 0x6c3   :  { %v4587_v13 = vpop.eup %3370  ;;  %v1521_v12 = vmul.f32 1.442695, %v1503_v3 }
 0x6c4   :  { %v1552_v62 = vsel %vm533_vm4, %v4587_v13, 0.0 }
 0x6c5   :  { %3372 = vpow2.f32 %v1521_v12  ;;  %1553 = vadd.xlane.f32.xlu1 %v1552_v62 }
 0x6c7   :  { %v1409_v24 = vpop.f32.mrf.mxu0 }
 0x6c8   :  { %v1433_v9 = vmul.f32 0.35355338, %v1409_v24 }
 0x6cb   :  { %v4596_v0 = vpop.eup %3372 }
 0x6cc   :  { %v1555_v11 = vsel %vm533_vm4, %v4596_v0, 0.0 }
 0x6cd   :  { %1481 = vmax.xlane.f32.xlu1 %v1480_v28  ;;  %1556 = vadd.xlane.f32.xlu0 %v1555_v11 }
 0x6cf   :  { %v1412_v45 = vpop.f32.mrf.mxu0 }
 0x6d0   :  { %v1434_v57 = vmul.f32 0.35355338, %v1412_v45 }
 0x6d5   :  { %1484 = vmax.xlane.f32.xlu0 %v1483_v15 }
 0x6d7   :  { %v1415_v10 = vpop.f32.mrf.mxu0 }
 0x6d8   :  { %v1435_v12 = vmul.f32 0.35355338, %v1415_v10 }
 0x6da   :  { %v4654_v26 = vadd.f32 %v3542_v52, %v1435_v12 }
 0x6f8   :  { %v1464_v17 = vpop.xlane.xlu2 %1463 }
 0x6f9   :  { %v1504_v31 = vsub.f32 %v4543_v29, %v1464_v17  ;;  %v3539_v29 = vld [vmem:[%s5417_s2 + $0x58] sm:$0xff]  ;;  %v1495_v17 = vsel %vm533_vm4, %v4654_v26, -inf }
 0x6fa   :  { %v4618_v32 = vadd.f32 %v3539_v29, %v1432_v54 }
 0x6fb   :  { %v1523_v16 = vmul.f32 1.442695, %v1504_v31  ;;  %v3543_v31 = vld [vmem:[%s5417_s2 + $0x78] sm:$0xff] }
 0x6fc   :  { %v1486_v19 = vsel %vm533_vm4, %v4618_v32, -inf }
 0x6fd   :  { %3374 = vpow2.f32 %v1523_v16 }
 0x700   :  { %v1467_v25 = vpop.xlane.xlu0 %1466 }
 0x701   :  { %v1505_v58 = vsub.f32 %v4550_v18, %v1467_v25 }
 0x703   :  { %v4611_v21 = vpop.eup %3374  ;;  %v1525_v33 = vmul.f32 1.442695, %v1505_v58 }
 0x704   :  { %v1558_v22 = vsel %vm533_vm4, %v4611_v21, 0.0 }
 0x705   :  { %3376 = vpow2.f32 %v1525_v33  ;;  %1559 = vadd.xlane.f32.xlu2 %v1558_v22 }
 0x708   :  { %v1470_v59 = vpop.xlane.xlu1 %1469 }
 0x709   :  { %v1506_v61 = vsub.f32 %v4557_v27, %v1470_v59  ;;  %v4630_v27 = vadd.f32 %v3540_v48, %v1433_v9 }
 0x70b   :  { %v4621_v18 = vpop.eup %3376  ;;  %v1527_v38 = vmul.f32 1.442695, %v1506_v61  ;;  %v1489_v50 = vsel %vm533_vm4, %v4630_v27, -inf }
 0x70c   :  { %v1561_v34 = vsel %vm533_vm4, %v4621_v18, 0.0 }
 0x70d   :  { %3378 = vpow2.f32 %v1527_v38  ;;  %1487 = vmax.xlane.f32.xlu2 %v1486_v19  ;;  %1562 = vadd.xlane.f32.xlu1 %v1561_v34 }
 0x710   :  { %v1473_v36 = vpop.xlane.xlu1 %1472 }
 0x711   :  { %v1507_v63 = vsub.f32 %v4564_v8, %v1473_v36  ;;  %v4642_v8 = vadd.f32 %v3541_v43, %v1434_v57 }
 0x713   :  { %v4633_v1 = vpop.eup %3378  ;;  %v1529_v41 = vmul.f32 1.442695, %v1507_v63  ;;  %v1492_v6 = vsel %vm533_vm4, %v4642_v8, -inf }
 0x714   :  { %v1564_v53 = vsel %vm533_vm4, %v4633_v1, 0.0 }
 0x715   :  { %3380 = vpow2.f32 %v1529_v41  ;;  %1490 = vmax.xlane.f32.xlu1 %v1489_v50  ;;  %1565 = vadd.xlane.f32.xlu0 %v1564_v53 }
 0x718   :  { %v1476_v40 = vpop.xlane.xlu1 %1475 }
 0x719   :  { %v1508_v60 = vsub.f32 %v4571_v4, %v1476_v40  ;;  %v1418_v4 = vpop.f32.mrf.mxu0 }
 0x71a   :  { %v1436_v15 = vmul.f32 0.35355338, %v1418_v4 }
 0x71b   :  { %v4645_v35 = vpop.eup %3380  ;;  %v1531_v3 = vmul.f32 1.442695, %v1508_v60 }
 0x71c   :  { %v1567_v62 = vsel %vm533_vm4, %v4645_v35, 0.0  ;;  %v4666_v16 = vadd.f32 %v3543_v31, %v1436_v15 }
 0x71d   :  { %3382 = vpow2.f32 %v1531_v3  ;;  %1493 = vmax.xlane.f32.xlu0 %v1492_v6  ;;  %1568 = vadd.xlane.f32.xlu2 %v1567_v62 }
 0x71e   :  { %v1498_v58 = vsel %vm533_vm4, %v4666_v16, -inf }
 0x720   :  { %v1479_v5 = vpop.xlane.xlu2 %1478 }
 0x721   :  { %v1509_v28 = vsub.f32 %v4578_v23, %v1479_v5 }
 0x723   :  { %v4657_v11 = vpop.eup %3382  ;;  %v1533_v14 = vmul.f32 1.442695, %v1509_v28 }
 0x724   :  { %v1570_v42 = vsel %vm533_vm4, %v4657_v11, 0.0 }
 0x725   :  { %3384 = vpow2.f32 %v1533_v14  ;;  %1496 = vmax.xlane.f32.xlu2 %v1495_v17  ;;  %1571 = vadd.xlane.f32.xlu1 %v1570_v42 }
 0x72b   :  { %v4668_v23 = vpop.eup %3384 }
 0x72c   :  { %v1573_v25 = vsel %vm533_vm4, %v4668_v23, 0.0 }
 0x72d   :  { %1574 = vadd.xlane.f32.xlu0 %v1573_v25  ;;  %1499 = vmax.xlane.f32.xlu1 %v1498_v58 }
 0x730   :  { %v1551_v24 = vpop.xlane.xlu1 %1550 }
 0x731   :  { %3386 = vrcp.f32 %v1551_v24  ;;  %v1608_v29 = vand.u32 2147483648, %v1551_v24  ;;  %v1606_v38 = vand.u32 2147483647, %v1551_v24  ;;  %vm1602_vm13 = vweird.f32 %v1551_v24 }
 0x733   :  { %v1609_v34 = vor.u32 1.1754944e-38, %v1608_v29  ;;  %vm1607_vm15 = vcmp.eq.f32.partialorder %v1606_v38, 8.507059e+37 }
 0x737   :  { %v3387_v33 = vpop.eup %3386 }
 0x738   :  { %v1598_v54 = vmul.f32 %v3387_v33, %v1551_v24  ;;  %v1554_v22 = vpop.xlane.xlu1 %1553  ;;  %vm1603_vm12 = vweird.f32 %v3387_v33 }
 0x739   :  { %3388 = vrcp.f32 %v1554_v22  ;;  %vm1604_vm14 = vmor %vm1602_vm13, %vm1603_vm12  ;;  %v1622_v10 = vand.u32 2147483648, %v1554_v22  ;;  %v1620_v60 = vand.u32 2147483647, %v1554_v22  ;;  %vm1616_vm1 = vweird.f32 %v1554_v22 }
 0x73a   :  { %v1599_v59 = vsub.f32 1.0, %v1598_v54 }
 0x73b   :  { %v1623_v6 = vor.u32 1.1754944e-38, %v1622_v10  ;;  %vm1621_vm5 = vcmp.eq.f32.partialorder %v1620_v60, 8.507059e+37 }
 0x73c   :  { %v1600_v61 = vmul.f32 %v3387_v33, %v1599_v59 }
 0x73e   :  { %v1601_v9 = vadd.f32 %v3387_v33, %v1600_v61 }
 0x73f   :  { %v3389_v19 = vpop.eup %3388 }
 0x740   :  { %v1605_v45 = vsel %vm1604_vm14, %v3387_v33, %v1601_v9  ;;  %v1612_v36 = vmul.f32 %v3389_v19, %v1554_v22  ;;  %v1557_v48 = vpop.xlane.xlu0 %1556  ;;  %v1482_v63 = vpop.xlane.xlu1 %1481  ;;  %vm1617_vm0 = vweird.f32 %v3389_v19 }
 0x741   :  { %v1610_v41 = vsel %vm1607_vm15, %v1609_v34, %v1605_v45  ;;  %3390 = vrcp.f32 %v1557_v48  ;;  %v1510_v50 = vsub.f32 %v4594_v7, %v1482_v63  ;;  %vm1618_vm2 = vmor %vm1616_vm1, %vm1617_vm0  ;;  %v1636_v14 = vand.u32 2147483648, %v1557_v48 }
 0x742   :  { %v1613_v57 = vsub.f32 1.0, %v1612_v36  ;;  %v1821_v53 = vmul.f32 %v4583_v55, %v1610_v41  ;;  %v1634_v31 = vand.u32 2147483647, %v1557_v48  ;;  %vm1630_vm7 = vweird.f32 %v1557_v48 }
 0x743   :  { %v1535_v43 = vmul.f32 1.442695, %v1510_v50  ;;  %v1637_v58 = vor.u32 1.1754944e-38, %v1636_v14 }
 0x744   :  { %v1614_v40 = vmul.f32 %v3389_v19, %v1613_v57  ;;  %3171 = vmatmul.msk.f32.vlgmr.msra.gmra.mxu1 %vm533_vm4, %v1821_v53  ;;  %vm1635_vm9 = vcmp.eq.f32.partialorder %v1634_v31, 8.507059e+37 }
 0x745   :  { %3392 = vpow2.f32 %v1535_v43 }
 0x746   :  { %v1615_v3 = vadd.f32 %v3389_v19, %v1614_v40 }
 0x747   :  { %v3391_v12 = vpop.eup %3390 }
 0x748   :  { %v1626_v62 = vmul.f32 %v3391_v12, %v1557_v48  ;;  %v1485_v5 = vpop.xlane.xlu0 %1484  ;;  %v1619_v52 = vsel %vm1618_vm2, %v3389_v19, %v1615_v3  ;;  %vm1631_vm6 = vweird.f32 %v3391_v12 }
 0x749   :  { %v1511_v7 = vsub.f32 %v4605_v2, %v1485_v5  ;;  %v1624_v55 = vsel %vm1621_vm5, %v1623_v6, %v1619_v52  ;;  %vm1632_vm8 = vmor %vm1630_vm7, %vm1631_vm6 }
 0x74a   :  { %v1627_v4 = vsub.f32 1.0, %v1626_v62  ;;  %v1822_v28 = vmul.f32 %v4587_v13, %v1624_v55 }
 0x74b   :  { %v1537_v15 = vmul.f32 1.442695, %v1511_v7  ;;  %v4679_v17 = vpop.eup %3392 }
 0x74c   :  { %v1628_v42 = vmul.f32 %v3391_v12, %v1627_v4  ;;  %3172 = vmatmul.msk.f32.gmra.mxu1 %vm533_vm4, %v1822_v28  ;;  %v1576_v25 = vsel %vm533_vm4, %v4679_v17, 0.0 }
 0x74d   :  { %3394 = vpow2.f32 %v1537_v15  ;;  %1577 = vadd.xlane.f32.xlu2 %v1576_v25 }
 0x74e   :  { %v1629_v2 = vadd.f32 %v3391_v12, %v1628_v42 }
 0x750   :  { %v1633_v24 = vsel %vm1632_vm8, %v3391_v12, %v1629_v2 }
 0x751   :  { %v1638_v13 = vsel %vm1635_vm9, %v1637_v58, %v1633_v24 }
 0x752   :  { %v1823_v33 = vmul.f32 %v4596_v0, %v1638_v13 }
 0x753   :  { %v4685_v54 = vpop.eup %3394 }
 0x754   :  { %3173 = vmatmul.msk.f32.gmra.mxu1 %vm533_vm4, %v1823_v33  ;;  %v1579_v22 = vsel %vm533_vm4, %v4685_v54, 0.0 }
 0x755   :  { %1580 = vadd.xlane.f32.xlu0 %v1579_v22 }
 0x778   :  { %v1560_v59 = vpop.xlane.xlu2 %1559 }
 0x779   :  { %3396 = vrcp.f32 %v1560_v59  ;;  %v1650_v36 = vand.u32 2147483648, %v1560_v59  ;;  %v1648_v48 = vand.u32 2147483647, %v1560_v59  ;;  %vm1644_vm11 = vweird.f32 %v1560_v59 }
 0x77b   :  { %v1651_v57 = vor.u32 1.1754944e-38, %v1650_v36  ;;  %vm1649_vm13 = vcmp.eq.f32.partialorder %v1648_v48, 8.507059e+37 }
 0x77f   :  { %v3397_v29 = vpop.eup %3396 }
 0x780   :  { %v1640_v61 = vmul.f32 %v3397_v29, %v1560_v59  ;;  %v1488_v38 = vpop.xlane.xlu2 %1487  ;;  %v1563_v9 = vpop.xlane.xlu1 %1562  ;;  %vm1645_vm10 = vweird.f32 %v3397_v29 }
 0x781   :  { %v1512_v19 = vsub.f32 %v4618_v32, %v1488_v38  ;;  %3398 = vrcp.f32 %v1563_v9  ;;  %vm1646_vm12 = vmor %vm1644_vm11, %vm1645_vm10  ;;  %v1664_v5 = vand.u32 2147483648, %v1563_v9  ;;  %v1662_v7 = vand.u32 2147483647, %v1563_v9 }
 0x782   :  { %v1641_v34 = vsub.f32 1.0, %v1640_v61  ;;  %vm1658_vm15 = vweird.f32 %v1563_v9 }
 0x783   :  { %v1539_v45 = vmul.f32 1.442695, %v1512_v19  ;;  %v1665_v4 = vor.u32 1.1754944e-38, %v1664_v5  ;;  %vm1663_vm1 = vcmp.eq.f32.partialorder %v1662_v7, 8.507059e+37 }
 0x784   :  { %v1642_v0 = vmul.f32 %v3397_v29, %v1641_v34 }
 0x785   :  { %3400 = vpow2.f32 %v1539_v45 }
 0x786   :  { %v1643_v63 = vadd.f32 %v3397_v29, %v1642_v0 }
 0x787   :  { %v3399_v41 = vpop.eup %3398 }
 0x788   :  { %v1654_v50 = vmul.f32 %v3399_v41, %v1563_v9  ;;  %v1566_v53 = vpop.xlane.xlu0 %1565  ;;  %v1491_v10 = vpop.xlane.xlu1 %1490  ;;  %v1647_v40 = vsel %vm1646_vm12, %v3397_v29, %v1643_v63  ;;  %vm1659_vm14 = vweird.f32 %v3399_v41 }
 0x789   :  { %3402 = vrcp.f32 %v1566_v53  ;;  %v1513_v32 = vsub.f32 %v4630_v27, %v1491_v10  ;;  %v1652_v60 = vsel %vm1649_vm13, %v1651_v57, %v1647_v40  ;;  %vm1660_vm0 = vmor %vm1658_vm15, %vm1659_vm14  ;;  %v1678_v33 = vand.u32 2147483648, %v1566_v53 }
 0x78a   :  { %v1655_v43 = vsub.f32 1.0, %v1654_v50  ;;  %v1824_v6 = vmul.f32 %v4611_v21, %v1652_v60  ;;  %vm1672_vm5 = vweird.f32 %v1566_v53 }
 0x78b   :  { %v4692_v3 = vpop.eup %3400  ;;  %v1541_v12 = vmul.f32 1.442695, %v1513_v32  ;;  %v1679_v61 = vor.u32 1.1754944e-38, %v1678_v33 }
 0x78c   :  { %v1656_v62 = vmul.f32 %v3399_v41, %v1655_v43  ;;  %v1582_v52 = vsel %vm533_vm4, %v4692_v3, 0.0  ;;  %3174 = vmatmul.msk.f32.gmra.mxu1 %vm533_vm4, %v1824_v6 }
 0x78d   :  { %3404 = vpow2.f32 %v1541_v12  ;;  %1583 = vadd.xlane.f32.xlu1 %v1582_v52 }
 0x78e   :  { %v1657_v27 = vadd.f32 %v3399_v41, %v1656_v62 }
 0x78f   :  { %v3403_v55 = vpop.eup %3402 }
 0x790   :  { %v1668_v28 = vmul.f32 %v3403_v55, %v1566_v53  ;;  %v1494_v14 = vpop.xlane.xlu0 %1493  ;;  %v1569_v15 = vpop.xlane.xlu2 %1568  ;;  %v1661_v21 = vsel %vm1660_vm0, %v3399_v41, %v1657_v27  ;;  %vm1673_vm2 = vweird.f32 %v3403_v55 }
 0x791   :  { %v1514_v42 = vsub.f32 %v4642_v8, %v1494_v14  ;;  %3406 = vrcp.f32 %v1569_v15  ;;  %v1666_v25 = vsel %vm1663_vm1, %v1665_v4, %v1661_v21  ;;  %v1676_v8 = vand.u32 2147483647, %v1566_v53  ;;  %vm1674_vm6 = vmor %vm1672_vm5, %vm1673_vm2 }
 0x792   :  { %v1669_v31 = vsub.f32 1.0, %v1668_v28  ;;  %v1825_v24 = vmul.f32 %v4621_v18, %v1666_v25  ;;  %v1692_v57 = vand.u32 2147483648, %v1569_v15  ;;  %vm1686_vm9 = vweird.f32 %v1569_v15 }
 0x793   :  { %v4699_v2 = vpop.eup %3404  ;;  %v1543_v58 = vmul.f32 1.442695, %v1514_v42  ;;  %vm1677_vm7 = vcmp.eq.f32.partialorder %v1676_v8, 8.507059e+37 }
 0x794   :  { %v1670_v13 = vmul.f32 %v3403_v55, %v1669_v31  ;;  %v1585_v22 = vsel %vm533_vm4, %v4699_v2, 0.0  ;;  %3175 = vmatmul.msk.f32.gmra.mxu1 %vm533_vm4, %v1825_v24  ;;  %v1693_v40 = vor.u32 1.1754944e-38, %v1692_v57 }
 0x795   :  { %3408 = vpow2.f32 %v1543_v58  ;;  %1586 = vadd.xlane.f32.xlu2 %v1585_v22 }
 0x796   :  { %v1671_v59 = vadd.f32 %v3403_v55, %v1670_v13 }
 0x797   :  { %v3407_v29 = vpop.eup %3406 }
 0x798   :  { %v1682_v38 = vmul.f32 %v3407_v29, %v1569_v15  ;;  %v1497_v9 = vpop.xlane.xlu2 %1496  ;;  %v1572_v19 = vpop.xlane.xlu1 %1571  ;;  %v1675_v18 = vsel %vm1674_vm6, %v3403_v55, %v1671_v59  ;;  %vm1687_vm8 = vweird.f32 %v3407_v29 }
 0x799   :  { %v1515_v34 = vsub.f32 %v4654_v26, %v1497_v9  ;;  %3410 = vrcp.f32 %v1572_v19  ;;  %v1680_v0 = vsel %vm1677_vm7, %v1679_v61, %v1675_v18  ;;  %v1690_v26 = vand.u32 2147483647, %v1569_v15  ;;  %vm1688_vm10 = vmor %vm1686_vm9, %vm1687_vm8 }
 0x79a   :  { %v1683_v45 = vsub.f32 1.0, %v1682_v38  ;;  %v1826_v63 = vmul.f32 %v4633_v1, %v1680_v0  ;;  %v1704_v52 = vand.u32 2147483647, %v1572_v19  ;;  %v1706_v7 = vand.u32 2147483648, %v1572_v19 }
 0x79b   :  { %v4706_v36 = vpop.eup %3408  ;;  %v1545_v48 = vmul.f32 1.442695, %v1515_v34  ;;  %vm1691_vm11 = vcmp.eq.f32.partialorder %v1690_v26, 8.507059e+37  ;;  %vm1700_vm13 = vweird.f32 %v1572_v19 }
 0x79c   :  { %v1684_v41 = vmul.f32 %v3407_v29, %v1683_v45  ;;  %v1588_v50 = vsel %vm533_vm4, %v4706_v36, 0.0  ;;  %3176 = vmatmul.msk.f32.gmra.mxu1 %vm533_vm4, %v1826_v63  ;;  %v1707_v15 = vor.u32 1.1754944e-38, %v1706_v7  ;;  %vm1705_vm15 = vcmp.eq.f32.partialorder %v1704_v52, 8.507059e+37 }
 0x79d   :  { %3412 = vpow2.f32 %v1545_v48  ;;  %1589 = vadd.xlane.f32.xlu0 %v1588_v50 }
 0x79e   :  { %v1685_v53 = vadd.f32 %v3407_v29, %v1684_v41 }
 0x79f   :  { %v3411_v10 = vpop.eup %3410 }
 0x7a0   :  { %v1696_v32 = vmul.f32 %v3411_v10, %v1572_v19  ;;  %v1575_v43 = vpop.xlane.xlu0 %1574  ;;  %v1500_v60 = vpop.xlane.xlu1 %1499  ;;  %v1689_v1 = vsel %vm1688_vm10, %v3407_v29, %v1685_v53  ;;  %vm1701_vm12 = vweird.f32 %v3411_v10 }
 0x7a1   :  { %3414 = vrcp.f32 %v1575_v43  ;;  %v1516_v6 = vsub.f32 %v4666_v16, %v1500_v60  ;;  %v1694_v62 = vsel %vm1691_vm11, %v1693_v40, %v1689_v1  ;;  %vm1702_vm14 = vmor %vm1700_vm13, %vm1701_vm12  ;;  %v1720_v58 = vand.u32 2147483648, %v1575_v43 }
 0x7a2   :  { %v1697_v12 = vsub.f32 1.0, %v1696_v32  ;;  %v1827_v27 = vmul.f32 %v4645_v35, %v1694_v62  ;;  %v1718_v33 = vand.u32 2147483647, %v1575_v43  ;;  %vm1714_vm1 = vweird.f32 %v1575_v43 }
 0x7a3   :  { %v4713_v5 = vpop.eup %3412  ;;  %v1547_v4 = vmul.f32 1.442695, %v1516_v6  ;;  %v1721_v59 = vor.u32 1.1754944e-38, %v1720_v58 }
 0x7a4   :  { %v1698_v55 = vmul.f32 %v3411_v10, %v1697_v12  ;;  %v1591_v28 = vsel %vm533_vm4, %v4713_v5, 0.0  ;;  %3177 = vmatmul.msk.f32.gmra.mxu1 %vm533_vm4, %v1827_v27  ;;  %vm1719_vm5 = vcmp.eq.f32.partialorder %v1718_v33, 8.507059e+37 }
 0x7a5   :  { %1592 = vadd.xlane.f32.xlu1 %v1591_v28  ;;  %3416 = vpow2.f32 %v1547_v4 }
 0x7a6   :  { %v1699_v14 = vadd.f32 %v3411_v10, %v1698_v55 }
 0x7a7   :  { %v3415_v16 = vpop.eup %3414 }
 0x7a8   :  { %v1710_v21 = vmul.f32 %v3415_v16, %v1575_v43  ;;  %v1703_v42 = vsel %vm1702_vm14, %v3411_v10, %v1699_v14  ;;  %vm1715_vm0 = vweird.f32 %v3415_v16 }
 0x7a9   :  { %v1708_v31 = vsel %vm1705_vm15, %v1707_v15, %v1703_v42  ;;  %vm1716_vm2 = vmor %vm1714_vm1, %vm1715_vm0 }
 0x7aa   :  { %v1711_v35 = vsub.f32 1.0, %v1710_v21  ;;  %v1828_v25 = vmul.f32 %v4657_v11, %v1708_v31 }
 0x7ab   :  { %v4720_v24 = vpop.eup %3416 }
 0x7ac   :  { %v1712_v13 = vmul.f32 %v3415_v16, %v1711_v35  ;;  %3178 = vmatmul.msk.f32.gmra.mxu1 %vm533_vm4, %v1828_v25  ;;  %v1594_v22 = vsel %vm533_vm4, %v4720_v24, 0.0 }
 0x7ad   :  { %1595 = vadd.xlane.f32.xlu2 %v1594_v22 }
 0x7ae   :  { %v1713_v8 = vadd.f32 %v3415_v16, %v1712_v13 }
 0x7b0   :  { %v1717_v29 = vsel %vm1716_vm2, %v3415_v16, %v1713_v8  ;;  %v3146_v8 = vld [vmem:[%s5427_s12 + $0x38] sm:$0xff] }
 0x7b1   :  { %v1722_v61 = vsel %vm1719_vm5, %v1721_v59, %v1717_v29  ;;  %2005 = vmatpush.msra.mxu2 %v3146_v8 }
 0x7b2   :  { %v1829_v11 = vmul.f32 %v4668_v23, %v1722_v61 }
 0x7b4   :  { %3179 = vmatmul.msk.f32.gmra.mxu1 %vm533_vm4, %v1829_v11 }
 0x7c0   :  { %v1578_v38 = vpop.xlane.xlu2 %1577 }
 0x7c1   :  { %3418 = vrcp.f32 %v1578_v38  ;;  %v1734_v45 = vand.u32 2147483648, %v1578_v38  ;;  %v1732_v48 = vand.u32 2147483647, %v1578_v38  ;;  %vm1728_vm7 = vweird.f32 %v1578_v38 }
 0x7c3   :  { %v1735_v57 = vor.u32 1.1754944e-38, %v1734_v45  ;;  %vm1733_vm9 = vcmp.eq.f32.partialorder %v1732_v48, 8.507059e+37 }
 0x7c7   :  { %v3419_v9 = vpop.eup %3418 }
 0x7c8   :  { %v1581_v19 = vpop.xlane.xlu0 %1580  ;;  %v1724_v18 = vmul.f32 %v3419_v9, %v1578_v38  ;;  %vm1729_vm6 = vweird.f32 %v3419_v9 }
 0x7c9   :  { %3420 = vrcp.f32 %v1581_v19  ;;  %vm1730_vm8 = vmor %vm1728_vm7, %vm1729_vm6  ;;  %v1748_v10 = vand.u32 2147483648, %v1581_v19  ;;  %v1746_v43 = vand.u32 2147483647, %v1581_v19  ;;  %vm1742_vm11 = vweird.f32 %v1581_v19 }
 0x7ca   :  { %v1725_v34 = vsub.f32 1.0, %v1724_v18 }
 0x7cb   :  { %v1749_v1 = vor.u32 1.1754944e-38, %v1748_v10  ;;  %vm1747_vm13 = vcmp.eq.f32.partialorder %v1746_v43, 8.507059e+37 }
 0x7cc   :  { %v1726_v0 = vmul.f32 %v3419_v9, %v1725_v34 }
 0x7ce   :  { %v1727_v41 = vadd.f32 %v3419_v9, %v1726_v0 }
 0x7cf   :  { %v3421_v63 = vpop.eup %3420 }
 0x7d0   :  { %v1738_v50 = vmul.f32 %v3421_v63, %v1581_v19  ;;  %v1731_v23 = vsel %vm1730_vm8, %v3419_v9, %v1727_v41  ;;  %vm1743_vm10 = vweird.f32 %v3421_v63 }
 0x7d1   :  { %v1736_v53 = vsel %vm1733_vm9, %v1735_v57, %v1731_v23  ;;  %vm1744_vm12 = vmor %vm1742_vm11, %vm1743_vm10 }
 0x7d2   :  { %v1739_v26 = vsub.f32 1.0, %v1738_v50  ;;  %v1830_v40 = vmul.f32 %v4679_v17, %v1736_v53 }
 0x7d4   :  { %v1740_v32 = vmul.f32 %v3421_v63, %v1739_v26  ;;  %3180 = vmatmul.msk.f32.gmra.mxu1 %vm533_vm4, %v1830_v40 }
 0x7d6   :  { %v1741_v60 = vadd.f32 %v3421_v63, %v1740_v32 }
 0x7d8   :  { %v1745_v12 = vsel %vm1744_vm12, %v3421_v63, %v1741_v60 }
 0x7d9   :  { %v1750_v6 = vsel %vm1747_vm13, %v1749_v1, %v1745_v12 }
 0x7da   :  { %v1831_v62 = vmul.f32 %v4685_v54, %v1750_v6 }
 0x7dc   :  { %3181 = vmatmul.msk.f32.gmra.mxu1 %vm533_vm4, %v1831_v62 }
 0x800   :  { %v1584_v52 = vpop.xlane.xlu1 %1583 }
 0x801   :  { %3422 = vrcp.f32 %v1584_v52  ;;  %v1762_v28 = vand.u32 2147483648, %v1584_v52  ;;  %v1760_v14 = vand.u32 2147483647, %v1584_v52  ;;  %vm1756_vm15 = vweird.f32 %v1584_v52 }
 0x803   :  { %v1763_v21 = vor.u32 1.1754944e-38, %v1762_v28  ;;  %vm1761_vm1 = vcmp.eq.f32.partialorder %v1760_v14, 8.507059e+37 }
 0x807   :  { %v3423_v7 = vpop.eup %3422 }
 0x808   :  { %v1752_v17 = vmul.f32 %v3423_v7, %v1584_v52  ;;  %v1587_v27 = vpop.xlane.xlu2 %1586  ;;  %vm1757_vm14 = vweird.f32 %v3423_v7  ;;  %v1902_v52 = vpop.f32.mrf.mxu1 }
 0x809   :  { %3424 = vrcp.f32 %v1587_v27  ;;  %vm1758_vm0 = vmor %vm1756_vm15, %vm1757_vm14  ;;  %v1776_v33 = vand.u32 2147483648, %v1587_v27  ;;  %v1774_v22 = vand.u32 2147483647, %v1587_v27  ;;  %vm1770_vm5 = vweird.f32 %v1587_v27 }
 0x80a   :  { %v1753_v55 = vsub.f32 1.0, %v1752_v17 }
 0x80b   :  { %v1777_v61 = vor.u32 1.1754944e-38, %v1776_v33  ;;  %vm1775_vm7 = vcmp.eq.f32.partialorder %v1774_v22, 8.507059e+37 }
 0x80c   :  { %v1754_v4 = vmul.f32 %v3423_v7, %v1753_v55 }
 0x80e   :  { %v1755_v16 = vadd.f32 %v3423_v7, %v1754_v4 }
 0x80f   :  { %v3425_v15 = vpop.eup %3424 }
 0x810   :  { %v1766_v42 = vmul.f32 %v3425_v15, %v1587_v27  ;;  %v1590_v54 = vpop.xlane.xlu0 %1589  ;;  %v1759_v31 = vsel %vm1758_vm0, %v3423_v7, %v1755_v16  ;;  %vm1771_vm2 = vweird.f32 %v3425_v15 }
 0x811   :  { %3426 = vrcp.f32 %v1590_v54  ;;  %v1764_v25 = vsel %vm1761_vm1, %v1763_v21, %v1759_v31  ;;  %vm1772_vm6 = vmor %vm1770_vm5, %vm1771_vm2  ;;  %v1790_v18 = vand.u32 2147483648, %v1590_v54  ;;  %v1788_v0 = vand.u32 2147483647, %v1590_v54  ;;  %v1905_v21 = vpop.f32.mrf.mxu1  ;;  %v3143_v31 = vld [vmem:[%s5427_s12 + $0x20] sm:$0xff] }
 0x812   :  { %v1767_v35 = vsub.f32 1.0, %v1766_v42  ;;  %v1832_v58 = vmul.f32 %v4692_v3, %v1764_v25  ;;  %vm1784_vm9 = vweird.f32 %v1590_v54  ;;  %v3144_v42 = vld [vmem:[%s5427_s12 + $0x28] sm:$0xff] }
 0x813   :  { %v1791_v41 = vor.u32 1.1754944e-38, %v1790_v18  ;;  %vm1789_vm11 = vcmp.eq.f32.partialorder %v1788_v0, 8.507059e+37 }
 0x814   :  { %v1768_v13 = vmul.f32 %v3425_v15, %v1767_v35  ;;  %3182 = vmatmul.msk.f32.gmra.mxu1 %vm533_vm4, %v1832_v58 }
 0x816   :  { %v1769_v59 = vadd.f32 %v3425_v15, %v1768_v13 }
 0x817   :  { %v3427_v29 = vpop.eup %3426 }
 0x818   :  { %v1780_v11 = vmul.f32 %v3427_v29, %v1590_v54  ;;  %v1593_v38 = vpop.xlane.xlu1 %1592  ;;  %v1773_v9 = vsel %vm1772_vm6, %v3425_v15, %v1769_v59  ;;  %vm1785_vm8 = vweird.f32 %v3427_v29 }
 0x819   :  { %3428 = vrcp.f32 %v1593_v38  ;;  %v1778_v19 = vsel %vm1775_vm7, %v1777_v61, %v1773_v9  ;;  %vm1786_vm10 = vmor %vm1784_vm9, %vm1785_vm8  ;;  %v1804_v10 = vand.u32 2147483648, %v1593_v38  ;;  %v1802_v32 = vand.u32 2147483647, %v1593_v38  ;;  %v1908_v54 = vpop.f32.mrf.mxu1  ;;  %v4768_v9 = vld [vmem:[%s5418_s3 + $0x40] sm:$0xff] }
 0x81a   :  { %v1781_v3 = vsub.f32 1.0, %v1780_v11  ;;  %v1833_v34 = vmul.f32 %v4699_v2, %v1778_v19  ;;  %vm1798_vm13 = vweird.f32 %v1593_v38  ;;  %v4762_v11 = vld [vmem:[%s5418_s3] sm:$0xff] }
 0x81b   :  { %v1805_v60 = vor.u32 1.1754944e-38, %v1804_v10  ;;  %vm1803_vm15 = vcmp.eq.f32.partialorder %v1802_v32, 8.507059e+37 }
 0x81c   :  { %v1782_v45 = vmul.f32 %v3427_v29, %v1781_v3  ;;  %3183 = vmatmul.msk.f32.gmra.mxu1 %vm533_vm4, %v1833_v34 }
 0x81e   :  { %v1783_v48 = vadd.f32 %v3427_v29, %v1782_v45  ;;  %v4774_v45 = vld [vmem:[%s5418_s3 + $0x60] sm:$0xff] }
 0x81f   :  { %v3429_v63 = vpop.eup %3428 }
 0x820   :  { %v1794_v57 = vmul.f32 %v3429_v63, %v1593_v38  ;;  %v1787_v50 = vsel %vm1786_vm10, %v3427_v29, %v1783_v48  ;;  %v1596_v23 = vpop.xlane.xlu2 %1595  ;;  %vm1799_vm12 = vweird.f32 %v3429_v63  ;;  %v4756_v29 = vld [vmem:[%s5418_s3 + $0x20] sm:$0xff]  ;;  %v1950_v38 = vmul.f32 %v4762_v11, %v1902_v52  ;;  %v4780_v48 = vld [vmem:[%s5418_s3 + $0x28] sm:$0xff] }
 0x821   :  { %v1792_v26 = vsel %vm1789_vm11, %v1791_v41, %v1787_v50  ;;  %3430 = vrcp.f32 %v1596_v23  ;;  %vm1800_vm14 = vmor %vm1798_vm13, %vm1799_vm12  ;;  %v1818_v27 = vand.u32 2147483648, %v1596_v23  ;;  %v1816_v55 = vand.u32 2147483647, %v1596_v23 }
 0x822   :  { %v1795_v53 = vsub.f32 1.0, %v1794_v57  ;;  %v1834_v2 = vmul.f32 %v4706_v36, %v1792_v26  ;;  %vm1812_vm1 = vweird.f32 %v1596_v23  ;;  %v4786_v57 = vld [vmem:[%s5418_s3 + $0x8] sm:$0xff] }
 0x823   :  { %v1819_v28 = vor.u32 1.1754944e-38, %v1818_v27  ;;  %vm1817_vm5 = vcmp.eq.f32.partialorder %v1816_v55, 8.507059e+37  ;;  %v1951_v50 = vmul.f32 %v4786_v57, %v1905_v21  ;;  %v4842_v21 = vld [vmem:[%s5418_s3 + $0x58] sm:$0xff] }
 0x824   :  { %v1796_v40 = vmul.f32 %v3429_v63, %v1795_v53  ;;  %3184 = vmatmul.msk.f32.gmra.mxu1 %vm533_vm4, %v1834_v2 }
 0x826   :  { %v1797_v43 = vadd.f32 %v3429_v63, %v1796_v40  ;;  %v4799_v40 = vld [vmem:[%s5418_s3 + $0x68] sm:$0xff] }
 0x827   :  { %v3431_v1 = vpop.eup %3430 }
 0x828   :  { %v1801_v12 = vsel %vm1800_vm14, %v3429_v63, %v1797_v43  ;;  %v1808_v6 = vmul.f32 %v3431_v1, %v1596_v23  ;;  %vm1813_vm0 = vweird.f32 %v3431_v1  ;;  %v4792_v23 = vld [vmem:[%s5418_s3 + $0x48] sm:$0xff]  ;;  %v4805_v43 = vld [vmem:[%s5418_s3 + $0x30] sm:$0xff] }
 0x829   :  { %v1806_v62 = vsel %vm1803_vm15, %v1805_v60, %v1801_v12  ;;  %vm1814_vm2 = vmor %vm1812_vm1, %vm1813_vm0  ;;  %v4811_v12 = vld [vmem:[%s5418_s3 + $0x10] sm:$0xff] }
 0x82a   :  { %v1835_v7 = vmul.f32 %v4713_v5, %v1806_v62  ;;  %v1809_v17 = vsub.f32 1.0, %v1808_v6  ;;  %v3145_v5 = vld [vmem:[%s5427_s12 + $0x30] sm:$0xff]  ;;  %v1952_v6 = vmul.f32 %v4811_v12, %v1908_v54 }
 0x82b   :  { %2006 = vmatpush.msra.mxu2 %v3145_v5  ;;  %v4817_v62 = vld [vmem:[%s5418_s3 + $0x50] sm:$0xff] }
 0x82c   :  { %v1810_v36 = vmul.f32 %v3431_v1, %v1809_v17  ;;  %3185 = vmatmul.msk.f32.gmra.mxu1 %vm533_vm4, %v1835_v7 }
 0x82d   :  { %2007 = vmatpush.msra.mxu2 %v3144_v42 }
 0x82e   :  { %v1811_v4 = vadd.f32 %v3431_v1, %v1810_v36  ;;  %v4824_v36 = vld [vmem:[%s5418_s3 + $0x70] sm:$0xff] }
 0x82f   :  { %2008 = vmatpush.msra.mxu2 %v3143_v31 }
 0x830   :  { %v1815_v14 = vsel %vm1814_vm2, %v3431_v1, %v1811_v4  ;;  %v4830_v4 = vld [vmem:[%s5418_s3 + $0x38] sm:$0xff] }
 0x831   :  { %v1820_v16 = vsel %vm1817_vm5, %v1819_v28, %v1815_v14 }
 0x832   :  { %v1836_v15 = vmul.f32 %v4720_v24, %v1820_v16  ;;  %v1911_v24 = vpop.f32.mrf.mxu1  ;;  %v4836_v16 = vld [vmem:[%s5418_s3 + $0x18] sm:$0xff] }
 0x834   :  { %3186 = vmatmul.msk.f32.gmra.mxu1 %vm533_vm4, %v1836_v15  ;;  %v1953_v15 = vmul.f32 %v4836_v16, %v1911_v24 }
 0x83a   :  { %v1914_v35 = vpop.f32.mrf.mxu1 }
 0x83b   :  { %v1954_v61 = vmul.f32 %v4756_v29, %v1914_v35  ;;  %v4849_v35 = vld [vmem:[%s5418_s3 + $0x78] sm:$0xff] }
 0x83d   :  { %v1966_v19 = vadd.f32 %v1954_v61, %v1950_v38 }
 0x842   :  { %v1917_v25 = vpop.f32.mrf.mxu1 }
 0x843   :  { %v1955_v63 = vmul.f32 %v4780_v48, %v1917_v25 }
 0x845   :  { %v1967_v53 = vadd.f32 %v1955_v63, %v1951_v50 }
 0x84a   :  { %v1920_v58 = vpop.f32.mrf.mxu1 }
 0x84b   :  { %v1956_v60 = vmul.f32 %v4805_v43, %v1920_v58  ;;  %v3287_v58 = vld [vmem:[%s5428_s13 + $0x1] ss:$0 sm:$0xff] }
 0x84d   :  { %v1968_v7 = vadd.f32 %v1956_v60, %v1952_v6 }
 0x852   :  { %v1923_v13 = vpop.f32.mrf.mxu1 }
 0x853   :  { %v1957_v28 = vmul.f32 %v4830_v4, %v1923_v13 }
 0x855   :  { %v1969_v42 = vadd.f32 %v1957_v28, %v1953_v15 }
 0x85a   :  { %v1926_v33 = vpop.f32.mrf.mxu1 }
 0x85b   :  { %v1958_v3 = vmul.f32 %v4768_v9, %v1926_v33 }
 0x85d   :  { %v1970_v34 = vadd.f32 %v1966_v19, %v1958_v3 }
 0x862   :  { %v1929_v22 = vpop.f32.mrf.mxu1 }
 0x863   :  { %v1959_v26 = vmul.f32 %v4792_v23, %v1929_v22 }
 0x865   :  { %v1971_v2 = vadd.f32 %v1967_v53, %v1959_v26 }
 0x86a   :  { %v1932_v8 = vpop.f32.mrf.mxu1 }
 0x86b   :  { %v1960_v52 = vmul.f32 %v4817_v62, %v1932_v8 }
 0x86d   :  { %v1972_v27 = vadd.f32 %v1968_v7, %v1960_v52  ;;  %v3192_v52 = vld [vmem:[%s5423_s8 + $0x48] sm:$0xff] }
 0x891   :  { %v1935_v59 = vpop.f32.mrf.mxu1 }
 0x892   :  { %v1961_v5 = vmul.f32 %v4842_v21, %v1935_v59 }
 0x894   :  { %v1973_v31 = vadd.f32 %v1969_v42, %v1961_v5 }
 0x899   :  { %v1938_v18 = vpop.f32.mrf.mxu1 }
 0x89a   :  { %v1962_v0 = vmul.f32 %v4774_v45, %v1938_v18 }
 0x89c   :  { %v1974_v41 = vadd.f32 %v1970_v34, %v1962_v0 }
 0x89e   :  { %3187 = vmatmul.msk.f32.vlgmr.msra.gmra.mxu2 %vm241_vm3, %v1974_v41 }
 0x8a1   :  { %v1941_v10 = vpop.f32.mrf.mxu1 }
 0x8a2   :  { %v1963_v32 = vmul.f32 %v4799_v40, %v1941_v10 }
 0x8a4   :  { %v1975_v1 = vadd.f32 %v1971_v2, %v1963_v32 }
 0x8a6   :  { %3188 = vmatmul.msk.f32.gmra.mxu2 %vm241_vm3, %v1975_v1  ;;  %v3193_v1 = vld [vmem:[%s5423_s8 + $0x50] sm:$0xff] }
 0x8a9   :  { %v1944_v17 = vpop.f32.mrf.mxu1 }
 0x8aa   :  { %v1964_v55 = vmul.f32 %v4824_v36, %v1944_v17 }
 0x8ac   :  { %v1976_v14 = vadd.f32 %v1972_v27, %v1964_v55 }
 0x8ae   :  { %3189 = vmatmul.msk.f32.gmra.mxu2 %vm241_vm3, %v1976_v14 }
 0x8b1   :  { %v1947_v54 = vpop.f32.mrf.mxu1 }
 0x8b2   :  { %v1965_v25 = vmul.f32 %v4849_v35, %v1947_v54 }
 0x8b4   :  { %v1977_v24 = vadd.f32 %v1973_v31, %v1965_v25  ;;  %v3191_v25 = vld [vmem:[%s5423_s8 + $0x40] sm:$0xff] }
 0x8b6   :  { %3190 = vmatmul.msk.f32.gmra.mxu2 %vm241_vm3, %v1977_v24 }
 0x921   :  { %v2010_v13 = vpop.f32.mrf.mxu2 }
 0x922   :  { %v2011_v33 = vadd.f32 %v3287_v58, %v2010_v13 }
 0x924   :  { %v2022_v22 = vadd.f32 %v2011_v33, %v4470_v56 }
 0x926   :  { %v2026_v8 = vsel %vm241_vm3, %v2022_v22, 0.0 }
 0x927   :  { %2027 = vadd.xlane.f32.xlu0 %v2026_v8 }
 0x929   :  { %v2013_v59 = vpop.f32.mrf.mxu2 }
 0x92a   :  { %v2014_v61 = vadd.f32 %v3287_v58, %v2013_v59 }
 0x92c   :  { %v2023_v38 = vadd.f32 %v2014_v61, %v4474_v20 }
 0x92e   :  { %v2029_v3 = vsel %vm241_vm3, %v2023_v38, 0.0 }
 0x92f   :  { %2030 = vadd.xlane.f32.xlu1 %v2029_v3 }
 0x931   :  { %v2016_v19 = vpop.f32.mrf.mxu2 }
 0x932   :  { %v2017_v18 = vadd.f32 %v3287_v58, %v2016_v19 }
 0x934   :  { %v2024_v34 = vadd.f32 %v2017_v18, %v4480_v37 }
 0x936   :  { %v2032_v0 = vsel %vm241_vm3, %v2024_v34, 0.0 }
 0x937   :  { %2033 = vadd.xlane.f32.xlu2 %v2032_v0 }
 0x939   :  { %v2019_v63 = vpop.f32.mrf.mxu2 }
 0x93a   :  { %v2020_v41 = vadd.f32 %v3287_v58, %v2019_v63 }
 0x93c   :  { %v2025_v56 = vadd.f32 %v2020_v41, %v4486_v30  ;;  %v3194_v30 = vld [vmem:[%s5423_s8 + $0x58] sm:$0xff] }
 0x93d   :  { %2173 = vmatpush.msra.mxu3 %v3194_v30 }
 0x93e   :  { %v2035_v50 = vsel %vm241_vm3, %v2025_v56, 0.0 }
 0x93f   :  { %2036 = vadd.xlane.f32.xlu0 %v2035_v50  ;;  %2174 = vmatpush.msra.mxu3 %v3193_v1 }
 0x941   :  { %2175 = vmatpush.msra.mxu3 %v3192_v52 }
 0x943   :  { %2176 = vmatpush.msra.mxu3 %v3191_v25 }
 0x99a   :  { %v2028_v26 = vpop.xlane.xlu0 %2027 }
 0x99b   :  { %v2038_v20 = vmul.f32 %v2028_v26, %v4441_v39 }
 0x99d   :  { %v2042_v53 = vsub.f32 %v2022_v22, %v2038_v20 }
 0x99f   :  { %v2046_v10 = vmul.f32 %v2042_v53, %v2042_v53 }
 0x9a1   :  { %v2050_v2 = vsel %vm241_vm3, %v2046_v10, 0.0  ;;  %v3289_v10 = vld [vmem:[#allocation8 + $0x1] ss:$0 sm:$0xff] }
 0x9a2   :  { %2051 = vadd.xlane.f32.xlu1 %v2050_v2  ;;  %v2031_v32 = vpop.xlane.xlu1 %2030 }
 0x9a3   :  { %v2039_v37 = vmul.f32 %v2031_v32, %v4441_v39 }
 0x9a5   :  { %v4867_v60 = vsub.f32 %v2023_v38, %v2039_v37 }
 0x9a7   :  { %v2047_v6 = vmul.f32 %v4867_v60, %v4867_v60 }
 0x9a9   :  { %v2053_v7 = vsel %vm241_vm3, %v2047_v6, 0.0 }
 0x9aa   :  { %v2034_v17 = vpop.xlane.xlu2 %2033  ;;  %2054 = vadd.xlane.f32.xlu2 %v2053_v7 }
 0x9ab   :  { %v2040_v27 = vmul.f32 %v2034_v17, %v4441_v39 }
 0x9ad   :  { %v4882_v55 = vsub.f32 %v2024_v34, %v2040_v27 }
 0x9af   :  { %v2048_v28 = vmul.f32 %v4882_v55, %v4882_v55 }
 0x9b1   :  { %v2056_v14 = vsel %vm241_vm3, %v2048_v28, 0.0 }
 0x9b2   :  { %2057 = vadd.xlane.f32.xlu0 %v2056_v14  ;;  %v2037_v15 = vpop.xlane.xlu0 %2036 }
 0x9b3   :  { %v2041_v5 = vmul.f32 %v2037_v15, %v4441_v39 }
 0x9b5   :  { %v4888_v42 = vsub.f32 %v2025_v56, %v2041_v5  ;;  %v3288_v56 = vld [vmem:[%s5429_s14 + $0x1] ss:$0 sm:$0xff] }
 0x9b7   :  { %v2049_v54 = vmul.f32 %v4888_v42, %v4888_v42 }
 0x9b9   :  { %v2059_v31 = vsel %vm241_vm3, %v2049_v54, 0.0 }
 0x9ba   :  { %2060 = vadd.xlane.f32.xlu1 %v2059_v31 }
 0x9c2   :  { %2208 = vrot.lane.b32.xlu2 %v3962_v44, %s3755_s6 }
 0x9c6   :  { %2206 = vrot.lane.b32.xlu0 %v3974_v51, %s3755_s6 }
 0xa15   :  { %v2052_v24 = vpop.xlane.xlu1 %2051 }
 0xa16   :  { %v2062_v58 = vmul.f32 %v2052_v24, %v4441_v39 }
 0xa18   :  { %v2066_v13 = vadd.f32 1e-05, %v2062_v58 }
 0xa1a   :  { %3432 = vrsqrt.f32 %v2066_v13  ;;  %vm2076_vm7 = vweird.f32 %v2066_v13 }
 0xa1d   :  { %v2055_v33 = vpop.xlane.xlu2 %2054 }
 0xa1e   :  { %v2063_v22 = vmul.f32 %v2055_v33, %v4441_v39 }
 0xa20   :  { %v3433_v8 = vpop.eup %3432  ;;  %v2067_v59 = vadd.f32 1e-05, %v2063_v22 }
 0xa21   :  { %v2071_v61 = vmul.f32 %v3433_v8, %v2066_v13  ;;  %vm2077_vm6 = vweird.f32 %v3433_v8 }
 0xa22   :  { %3434 = vrsqrt.f32 %v2067_v59  ;;  %vm2078_vm8 = vmor %vm2076_vm7, %vm2077_vm6  ;;  %vm2086_vm10 = vweird.f32 %v2067_v59 }
 0xa23   :  { %v2072_v44 = vmul.f32 %v3433_v8, %v2071_v61 }
 0xa25   :  { %v2073_v38 = vmul.f32 0.5, %v2072_v44  ;;  %v2058_v51 = vpop.xlane.xlu0 %2057  ;;  %v2209_v3 = vpop.permute.xlu2 %2208 }
 0xa26   :  { %v2064_v19 = vmul.f32 %v2058_v51, %v4441_v39  ;;  %3206 = vmatpush.xpose.msk.msrb.mxu2 %vm241_vm3, %v2209_v3 }
 0xa27   :  { %v2074_v18 = vsub.f32 1.5, %v2073_v38 }
 0xa28   :  { %v3435_v34 = vpop.eup %3434  ;;  %v2068_v0 = vadd.f32 1e-05, %v2064_v19 }
 0xa29   :  { %v2075_v63 = vmul.f32 %v3433_v8, %v2074_v18  ;;  %v2081_v41 = vmul.f32 %v3435_v34, %v2067_v59  ;;  %vm2087_vm9 = vweird.f32 %v3435_v34 }
 0xa2a   :  { %3436 = vrsqrt.f32 %v2068_v0  ;;  %vm2088_vm11 = vmor %vm2086_vm10, %vm2087_vm9  ;;  %vm2096_vm13 = vweird.f32 %v2068_v0 }
 0xa2b   :  { %v2079_v50 = vsel %vm2078_vm8, %v3433_v8, %v2075_v63  ;;  %v2082_v26 = vmul.f32 %v3435_v34, %v2081_v41 }
 0xa2c   :  { %v2110_v20 = vmul.f32 %v2079_v50, %v2042_v53 }
 0xa2d   :  { %v2083_v2 = vmul.f32 0.5, %v2082_v26  ;;  %v2061_v32 = vpop.xlane.xlu1 %2060 }
 0xa2e   :  { %v2117_v37 = vmul.f32 %v3288_v56, %v2110_v20  ;;  %v2065_v30 = vmul.f32 %v2061_v32, %v4441_v39 }
 0xa2f   :  { %v2084_v1 = vsub.f32 1.5, %v2083_v2 }
 0xa30   :  { %v3437_v6 = vpop.eup %3436  ;;  %v2069_v52 = vadd.f32 1e-05, %v2065_v30  ;;  %v4906_v7 = vadd.f32 %v3289_v10, %v2117_v37 }
 0xa31   :  { %v2085_v17 = vmul.f32 %v3435_v34, %v2084_v1  ;;  %v2091_v27 = vmul.f32 %v3437_v6, %v2068_v0  ;;  %vm2097_vm12 = vweird.f32 %v3437_v6 }
 0xa32   :  { %3438 = vrsqrt.f32 %v2069_v52  ;;  %3202 = vmatmul.msk.f32.vlgmr.msra.gmra.mxu3 %vm241_vm3, %v4906_v7  ;;  %vm2098_vm14 = vmor %vm2096_vm13, %vm2097_vm12  ;;  %vm2106_vm0 = vweird.f32 %v2069_v52 }
 0xa33   :  { %v2089_v53 = vsel %vm2088_vm11, %v3435_v34, %v2085_v17  ;;  %v2092_v28 = vmul.f32 %v3437_v6, %v2091_v27 }
 0xa34   :  { %v2111_v14 = vmul.f32 %v2089_v53, %v4867_v60 }
 0xa35   :  { %v2093_v15 = vmul.f32 0.5, %v2092_v28  ;;  %v3562_v28 = vld [vmem:[%s5417_s2 + $0x10] sm:$0xff] }
 0xa36   :  { %v2118_v5 = vmul.f32 %v3288_v56, %v2111_v14 }
 0xa37   :  { %v2094_v54 = vsub.f32 1.5, %v2093_v15 }
 0xa38   :  { %v3439_v31 = vpop.eup %3438  ;;  %v2207_v25 = vpop.permute.xlu0 %2206  ;;  %v4911_v24 = vadd.f32 %v3289_v10, %v2118_v5 }
 0xa39   :  { %v2095_v58 = vmul.f32 %v3437_v6, %v2094_v54  ;;  %v2101_v13 = vmul.f32 %v3439_v31, %v2069_v52  ;;  %3207 = vmatpush.xpose.msk.msrb.mxu2 %vm241_vm3, %v2207_v25  ;;  %vm2107_vm15 = vweird.f32 %v3439_v31 }
 0xa3a   :  { %3203 = vmatmul.msk.f32.gmra.mxu3 %vm241_vm3, %v4911_v24  ;;  %vm2108_vm1 = vmor %vm2106_vm0, %vm2107_vm15 }
 0xa3b   :  { %v2099_v33 = vsel %vm2098_vm14, %v3437_v6, %v2095_v58  ;;  %v2102_v22 = vmul.f32 %v3439_v31, %v2101_v13 }
 0xa3c   :  { %v2112_v60 = vmul.f32 %v2099_v33, %v4882_v55  ;;  %v3290_v55 = vld [vmem:[%s5424_s9 + $0x2] ss:$0 sm:$0xff] }
 0xa3d   :  { %v2103_v8 = vmul.f32 0.5, %v2102_v22  ;;  %v3564_v22 = vld [vmem:[%s5417_s2 + $0x20] sm:$0xff] }
 0xa3e   :  { %v2119_v59 = vmul.f32 %v3288_v56, %v2112_v60 }
 0xa3f   :  { %v2104_v61 = vsub.f32 1.5, %v2103_v8 }
 0xa40   :  { %v4917_v44 = vadd.f32 %v3289_v10, %v2119_v59 }
 0xa41   :  { %v2105_v38 = vmul.f32 %v3439_v31, %v2104_v61 }
 0xa42   :  { %3204 = vmatmul.msk.f32.gmra.mxu3 %vm241_vm3, %v4917_v44 }
 0xa43   :  { %v2109_v51 = vsel %vm2108_vm1, %v3439_v31, %v2105_v38  ;;  %v3563_v31 = vld [vmem:[%s5417_s2 + $0x18] sm:$0xff]  ;;  %v3565_v38 = vld [vmem:[%s5417_s2 + $0x28] sm:$0xff] }
 0xa44   :  { %v2113_v3 = vmul.f32 %v2109_v51, %v4888_v42 }
 0xa46   :  { %v2120_v19 = vmul.f32 %v3288_v56, %v2113_v3 }
 0xa48   :  { %v4922_v18 = vadd.f32 %v3289_v10, %v2120_v19 }
 0xa4a   :  { %3205 = vmatmul.msk.f32.gmra.mxu3 %vm241_vm3, %v4922_v18 }
 0xab5   :  { %v2178_v34 = vpop.f32.mrf.mxu3 }
 0xab6   :  { %v2179_v0 = vadd.f32 %v3290_v55, %v2178_v34  ;;  %v3566_v34 = vld [vmem:[%s5417_s2 + $0x30] sm:$0xff] }
 0xab8   :  { %v2190_v63 = vmul.f32 %v4762_v11, %v2179_v0  ;;  %v2194_v11 = vmul.f32 %v4756_v29, %v2179_v0 }
 0xaba   :  { %3208 = vmatmul.msk.f32.vlgmr.msrb.gmra.mxu2 %vm241_vm3, %v2190_v63 }
 0xabd   :  { %v2181_v41 = vpop.f32.mrf.mxu3 }
 0xabe   :  { %v2182_v50 = vadd.f32 %v3290_v55, %v2181_v41 }
 0xac0   :  { %v2191_v42 = vmul.f32 %v4786_v57, %v2182_v50  ;;  %v2195_v57 = vmul.f32 %v4780_v48, %v2182_v50  ;;  %v2199_v29 = vmul.f32 %v4792_v23, %v2182_v50 }
 0xac2   :  { %3209 = vmatmul.msk.f32.gmra.mxu2 %vm241_vm3, %v2191_v42  ;;  %v3567_v42 = vld [vmem:[%s5417_s2 + $0x38] sm:$0xff] }
 0xac5   :  { %v2184_v56 = vpop.f32.mrf.mxu3 }
 0xac6   :  { %v2185_v26 = vadd.f32 %v3290_v55, %v2184_v56 }
 0xac8   :  { %v2192_v20 = vmul.f32 %v4811_v12, %v2185_v26  ;;  %v2196_v37 = vmul.f32 %v4805_v43, %v2185_v26  ;;  %v2200_v48 = vmul.f32 %v4817_v62, %v2185_v26  ;;  %v2204_v23 = vmul.f32 %v4824_v36, %v2185_v26 }
 0xaca   :  { %3210 = vmatmul.msk.f32.gmra.mxu2 %vm241_vm3, %v2192_v20 }
 0xacd   :  { %v2187_v10 = vpop.f32.mrf.mxu3 }
 0xace   :  { %v2188_v2 = vadd.f32 %v3290_v55, %v2187_v10 }
 0xad0   :  { %v2193_v32 = vmul.f32 %v4836_v16, %v2188_v2  ;;  %v2197_v12 = vmul.f32 %v4830_v4, %v2188_v2  ;;  %v2198_v16 = vmul.f32 %v4768_v9, %v2179_v0  ;;  %v2201_v43 = vmul.f32 %v4842_v21, %v2188_v2 }
 0xad1   :  { %v2202_v4 = vmul.f32 %v4774_v45, %v2179_v0  ;;  %v2203_v9 = vmul.f32 %v4799_v40, %v2182_v50  ;;  %v2205_v62 = vmul.f32 %v4849_v35, %v2188_v2  ;;  %v3560_v45 = vld [vmem:[%s5417_s2] sm:$0xff]  ;;  %v3561_v35 = vld [vmem:[%s5417_s2 + $0x8] sm:$0xff] }
 0xad2   :  { %3211 = vmatmul.msk.f32.gmra.mxu2 %vm241_vm3, %v2193_v32  ;;  %v3568_v2 = vld [vmem:[%s5417_s2 + $0x40] sm:$0xff] }
 0xada   :  { %3212 = vmatmul.msk.f32.gmra.mxu2 %vm241_vm3, %v2194_v11 }
 0xae2   :  { %3213 = vmatmul.msk.f32.gmra.mxu2 %vm241_vm3, %v2195_v57 }
 0xaea   :  { %3214 = vmatmul.msk.f32.gmra.mxu2 %vm241_vm3, %v2196_v37 }
 0xaf2   :  { %3215 = vmatmul.msk.f32.gmra.mxu2 %vm241_vm3, %v2197_v12  ;;  %v3569_v12 = vld [vmem:[%s5417_s2 + $0x48] sm:$0xff] }
 0xafa   :  { %3216 = vmatmul.msk.f32.gmra.mxu2 %vm241_vm3, %v2198_v16 }
 0xb02   :  { %3217 = vmatmul.msk.f32.gmra.mxu2 %vm241_vm3, %v2199_v29 }
 0xb0a   :  { %3218 = vmatmul.msk.f32.gmra.mxu2 %vm241_vm3, %v2200_v48 }
 0xb12   :  { %3219 = vmatmul.msk.f32.gmra.mxu2 %vm241_vm3, %v2201_v43 }
 0xb1a   :  { %3220 = vmatmul.msk.f32.gmra.mxu2 %vm241_vm3, %v2202_v4  ;;  %v3570_v4 = vld [vmem:[%s5417_s2 + $0x50] sm:$0xff] }
 0xb22   :  { %3221 = vmatmul.msk.f32.gmra.mxu2 %vm241_vm3, %v2203_v9 }
 0xb2a   :  { %3222 = vmatmul.msk.f32.gmra.mxu2 %vm241_vm3, %v2204_v23 }
 0xb32   :  { %3223 = vmatmul.msk.f32.gmra.mxu2 %vm241_vm3, %v2205_v62 }
 0xb3d   :  { %v2279_v30 = vpop.f32.mrf.mxu2 }
 0xb3e   :  { %v2327_v21 = vmul.f32 0.35355338, %v2279_v30 }
 0xb40   :  { %v4964_v1 = vadd.f32 %v3560_v45, %v2327_v21  ;;  %v3571_v21 = vld [vmem:[%s5417_s2 + $0x58] sm:$0xff] }
 0xb42   :  { %v2359_v40 = vsel %vm533_vm4, %v4964_v1, -inf }
 0xb43   :  { %2360 = vmax.xlane.f32.xlu1 %v2359_v40 }
 0xb45   :  { %v2282_v6 = vpop.f32.mrf.mxu2 }
 0xb46   :  { %v2328_v36 = vmul.f32 0.35355338, %v2282_v6 }
 0xb48   :  { %v4971_v52 = vadd.f32 %v3561_v35, %v2328_v36 }
 0xb4a   :  { %v2362_v17 = vsel %vm533_vm4, %v4971_v52, -inf }
 0xb4b   :  { %2363 = vmax.xlane.f32.xlu1 %v2362_v17 }
 0xb4d   :  { %v2285_v27 = vpop.f32.mrf.mxu2 }
 0xb4e   :  { %v2329_v53 = vmul.f32 0.35355338, %v2285_v27 }
 0xb50   :  { %v4978_v14 = vadd.f32 %v3562_v28, %v2329_v53 }
 0xb52   :  { %v2365_v15 = vsel %vm533_vm4, %v4978_v14, -inf }
 0xb53   :  { %2366 = vmax.xlane.f32.xlu1 %v2365_v15 }
 0xb55   :  { %v2288_v5 = vpop.f32.mrf.mxu2 }
 0xb56   :  { %v2330_v54 = vmul.f32 0.35355338, %v2288_v5 }
 0xb58   :  { %v4985_v25 = vadd.f32 %v3563_v31, %v2330_v54 }
 0xb5a   :  { %v2368_v58 = vsel %vm533_vm4, %v4985_v25, -inf }
 0xb5b   :  { %2369 = vmax.xlane.f32.xlu0 %v2368_v58 }
 0xb5d   :  { %v2291_v13 = vpop.f32.mrf.mxu2 }
 0xb5e   :  { %v2331_v33 = vmul.f32 0.35355338, %v2291_v13 }
 0xb60   :  { %v4992_v60 = vadd.f32 %v3564_v22, %v2331_v33 }
 0xb62   :  { %v2371_v8 = vsel %vm533_vm4, %v4992_v60, -inf }
 0xb63   :  { %2372 = vmax.xlane.f32.xlu2 %v2371_v8 }
 0xb65   :  { %v2294_v59 = vpop.f32.mrf.mxu2 }
 0xb66   :  { %v2332_v61 = vmul.f32 0.35355338, %v2294_v59 }
 0xb68   :  { %v4999_v51 = vadd.f32 %v3565_v38, %v2332_v61 }
 0xb6a   :  { %v2374_v3 = vsel %vm533_vm4, %v4999_v51, -inf }
 0xb6b   :  { %2375 = vmax.xlane.f32.xlu1 %v2374_v3 }
 0xb6d   :  { %v2297_v19 = vpop.f32.mrf.mxu2 }
 0xb6e   :  { %v2333_v55 = vmul.f32 0.35355338, %v2297_v19 }
 0xb70   :  { %v5006_v0 = vadd.f32 %v3566_v34, %v2333_v55 }
 0xb72   :  { %v2377_v63 = vsel %vm533_vm4, %v5006_v0, -inf }
 0xb73   :  { %2378 = vmax.xlane.f32.xlu1 %v2377_v63 }
 0xb75   :  { %v2300_v41 = vpop.f32.mrf.mxu2 }
 0xb76   :  { %v2334_v50 = vmul.f32 0.35355338, %v2300_v41 }
 0xb78   :  { %v5013_v56 = vadd.f32 %v3567_v42, %v2334_v50 }
 0xb7a   :  { %v2380_v26 = vsel %vm533_vm4, %v5013_v56, -inf }
 0xb7b   :  { %2381 = vmax.xlane.f32.xlu1 %v2380_v26 }
 0xb7d   :  { %v2303_v20 = vpop.f32.mrf.mxu2 }
 0xb7e   :  { %v2335_v10 = vmul.f32 0.35355338, %v2303_v20 }
 0xb80   :  { %v5020_v32 = vadd.f32 %v3568_v2, %v2335_v10 }
 0xb82   :  { %v2383_v11 = vsel %vm533_vm4, %v5020_v32, -inf }
 0xb83   :  { %2384 = vmax.xlane.f32.xlu2 %v2383_v11 }
 0xb85   :  { %v2306_v57 = vpop.f32.mrf.mxu2 }
 0xb86   :  { %v2336_v37 = vmul.f32 0.35355338, %v2306_v57  ;;  %v3572_v57 = vld [vmem:[%s5417_s2 + $0x68] sm:$0xff] }
 0xb88   :  { %v5027_v16 = vadd.f32 %v3569_v12, %v2336_v37 }
 0xb8a   :  { %v2386_v29 = vsel %vm533_vm4, %v5027_v16, -inf }
 0xb8b   :  { %2387 = vmax.xlane.f32.xlu2 %v2386_v29 }
 0xb8d   :  { %v2309_v48 = vpop.f32.mrf.mxu2 }
 0xb8e   :  { %v2337_v43 = vmul.f32 0.35355338, %v2309_v48 }
 0xb90   :  { %v5034_v9 = vadd.f32 %v3570_v4, %v2337_v43  ;;  %v3573_v43 = vld [vmem:[%s5417_s2 + $0x70] sm:$0xff] }
 0xb92   :  { %v2389_v23 = vsel %vm533_vm4, %v5034_v9, -inf }
 0xb93   :  { %2390 = vmax.xlane.f32.xlu2 %v2389_v23 }
 0xb95   :  { %v2312_v62 = vpop.f32.mrf.mxu2 }
 0xb96   :  { %v2338_v30 = vmul.f32 0.35355338, %v2312_v62 }
 0xb98   :  { %v5041_v45 = vadd.f32 %v3571_v21, %v2338_v30 }
 0xb9a   :  { %v2392_v40 = vsel %vm533_vm4, %v5041_v45, -inf }
 0xb9b   :  { %2393 = vmax.xlane.f32.xlu2 %v2392_v40 }
 0xb9d   :  { %v2315_v38 = vpop.f32.mrf.mxu2 }
 0xba5   :  { %v2318_v50 = vpop.f32.mrf.mxu2 }
 0xba6   :  { %v2340_v20 = vmul.f32 0.35355338, %v2318_v50 }
 0xba8   :  { %v5083_v46 = vadd.f32 %v3572_v57, %v2340_v20 }
 0xbaa   :  { %v2398_v12 = vsel %vm533_vm4, %v5083_v46, -inf }
 0xbad   :  { %v2321_v2 = vpop.f32.mrf.mxu2 }
 0xbae   :  { %v2341_v37 = vmul.f32 0.35355338, %v2321_v2 }
 0xbb0   :  { %v5095_v4 = vadd.f32 %v3573_v43, %v2341_v37 }
 0xbb2   :  { %v2401_v40 = vsel %vm533_vm4, %v5095_v4, -inf }
 0xbb6   :  { %v2361_v6 = vpop.xlane.xlu1 %2360 }
 0xbb7   :  { %v2407_v36 = vsub.f32 %v4964_v1, %v2361_v6 }
 0xbb9   :  { %v2423_v35 = vmul.f32 1.442695, %v2407_v36  ;;  %v3574_v36 = vld [vmem:[%s5417_s2 + $0x78] sm:$0xff] }
 0xbbb   :  { %3440 = vpow2.f32 %v2423_v35 }
 0xbbe   :  { %v2364_v17 = vpop.xlane.xlu1 %2363 }
 0xbbf   :  { %v2408_v27 = vsub.f32 %v4971_v52, %v2364_v17 }
 0xbc1   :  { %v5047_v53 = vpop.eup %3440  ;;  %v2425_v28 = vmul.f32 1.442695, %v2408_v27 }
 0xbc2   :  { %v2455_v15 = vsel %vm533_vm4, %v5047_v53, 0.0 }
 0xbc3   :  { %3442 = vpow2.f32 %v2425_v28  ;;  %2456 = vadd.xlane.f32.xlu1 %v2455_v15 }
 0xbc6   :  { %v2367_v5 = vpop.xlane.xlu1 %2366 }
 0xbc7   :  { %v2409_v54 = vsub.f32 %v4978_v14, %v2367_v5 }
 0xbc9   :  { %v5052_v31 = vpop.eup %3442  ;;  %v2427_v58 = vmul.f32 1.442695, %v2409_v54  ;;  %v2339_v54 = vmul.f32 0.35355338, %v2315_v38 }
 0xbca   :  { %v2458_v1 = vsel %vm533_vm4, %v5052_v31, 0.0 }
 0xbcb   :  { %3444 = vpow2.f32 %v2427_v58  ;;  %2459 = vadd.xlane.f32.xlu1 %v2458_v1 }
 0xbce   :  { %v2370_v52 = vpop.xlane.xlu0 %2369 }
 0xbcf   :  { %v2410_v13 = vsub.f32 %v4985_v25, %v2370_v52 }
 0xbd1   :  { %v5057_v33 = vpop.eup %3444  ;;  %v2429_v22 = vmul.f32 1.442695, %v2410_v13 }
 0xbd2   :  { %v2461_v8 = vsel %vm533_vm4, %v5057_v33, 0.0 }
 0xbd3   :  { %3446 = vpow2.f32 %v2429_v22  ;;  %2462 = vadd.xlane.f32.xlu0 %v2461_v8 }
 0xbd6   :  { %v2373_v14 = vpop.xlane.xlu2 %2372 }
 0xbd7   :  { %v2411_v59 = vsub.f32 %v4992_v60, %v2373_v14 }
 0xbd9   :  { %v5062_v61 = vpop.eup %3446  ;;  %v2431_v3 = vmul.f32 1.442695, %v2411_v59 }
 0xbda   :  { %v2464_v19 = vsel %vm533_vm4, %v5062_v61, 0.0 }
 0xbdb   :  { %3448 = vpow2.f32 %v2431_v3  ;;  %2465 = vadd.xlane.f32.xlu0 %v2464_v19 }
 0xbde   :  { %v2376_v25 = vpop.xlane.xlu1 %2375 }
 0xbdf   :  { %v2412_v55 = vsub.f32 %v4999_v51, %v2376_v25 }
 0xbe1   :  { %v5067_v34 = vpop.eup %3448  ;;  %v2433_v63 = vmul.f32 1.442695, %v2412_v55 }
 0xbe2   :  { %v2467_v41 = vsel %vm533_vm4, %v5067_v34, 0.0 }
 0xbe3   :  { %3450 = vpow2.f32 %v2433_v63  ;;  %2468 = vadd.xlane.f32.xlu0 %v2467_v41 }
 0xbe4   :  { %3276 = vrot.lane.b32.xlu1 %v3275_v49, %s3754_s23  ;;  %s3758_s23 = smov 8  }
 0xbe6   :  { %v2379_v60 = vpop.xlane.xlu1 %2378 }
 0xbe7   :  { %v2413_v42 = vsub.f32 %v5006_v0, %v2379_v60 }
 0xbe9   :  { %v5076_v26 = vpop.eup %3450  ;;  %v2435_v51 = vmul.f32 1.442695, %v2413_v42 }
 0xbea   :  { %v2470_v10 = vsel %vm533_vm4, %v5076_v26, 0.0 }
 0xbeb   :  { %3452 = vpow2.f32 %v2435_v51  ;;  %2471 = vadd.xlane.f32.xlu0 %v2470_v10 }
 0xbee   :  { %v2382_v11 = vpop.xlane.xlu1 %2381 }
 0xbef   :  { %v2414_v47 = vsub.f32 %v5013_v56, %v2382_v11  ;;  %v2324_v56 = vpop.f32.mrf.mxu2 }
 0xbf0   :  { %v2342_v21 = vmul.f32 0.35355338, %v2324_v56 }
 0xbf1   :  { %v5086_v49 = vpop.eup %3452  ;;  %v2437_v0 = vmul.f32 1.442695, %v2414_v47 }
 0xbf2   :  { %v2473_v29 = vsel %vm533_vm4, %v5086_v49, 0.0  ;;  %v5107_v35 = vadd.f32 %v3574_v36, %v2342_v21 }
 0xbf3   :  { %3454 = vpow2.f32 %v2437_v0  ;;  %2399 = vmax.xlane.f32.xlu0 %v2398_v12  ;;  %2474 = vadd.xlane.f32.xlu2 %v2473_v29 }
 0xbf4   :  { %v2404_v15 = vsel %vm533_vm4, %v5107_v35, -inf }
 0xbf6   :  { %v2385_v48 = vpop.xlane.xlu2 %2384 }
 0xbf7   :  { %v2415_v23 = vsub.f32 %v5020_v32, %v2385_v48 }
 0xbf9   :  { %v5098_v62 = vpop.eup %3454  ;;  %v2439_v30 = vmul.f32 1.442695, %v2415_v23 }
 0xbfa   :  { %v2476_v6 = vsel %vm533_vm4, %v5098_v62, 0.0 }
 0xbfb   :  { %3456 = vpow2.f32 %v2439_v30  ;;  %2402 = vmax.xlane.f32.xlu0 %v2401_v40  ;;  %2477 = vadd.xlane.f32.xlu2 %v2476_v6 }
 0xbfe   :  { %v2388_v32 = vpop.xlane.xlu2 %2387 }
 0xbff   :  { %v2416_v17 = vsub.f32 %v5027_v16, %v2388_v32  ;;  %v3575_v16 = vld [vmem:[%s5417_s2 + $0x60] sm:$0xff] }
 0xc00   :  { %v5122_v22 = vadd.f32 %v3575_v16, %v2339_v54 }
 0xc01   :  { %v5110_v27 = vpop.eup %3456  ;;  %v2441_v28 = vmul.f32 1.442695, %v2416_v17 }
 0xc02   :  { %v2479_v5 = vsel %vm533_vm4, %v5110_v27, 0.0  ;;  %v2395_v14 = vsel %vm533_vm4, %v5122_v22, -inf }
 0xc03   :  { %3458 = vpow2.f32 %v2441_v28  ;;  %2405 = vmax.xlane.f32.xlu0 %v2404_v15  ;;  %2480 = vadd.xlane.f32.xlu2 %v2479_v5 }
 0xc06   :  { %v2391_v58 = vpop.xlane.xlu2 %2390 }
 0xc07   :  { %v2417_v1 = vsub.f32 %v5034_v9, %v2391_v58 }
 0xc09   :  { %v5117_v52 = vpop.eup %3458  ;;  %v2443_v13 = vmul.f32 1.442695, %v2417_v1 }
 0xc0a   :  { %v2482_v8 = vsel %vm533_vm4, %v5117_v52, 0.0 }
 0xc0b   :  { %3460 = vpow2.f32 %v2443_v13  ;;  %2483 = vadd.xlane.f32.xlu2 %v2482_v8 }
 0xc0e   :  { %v2394_v59 = vpop.xlane.xlu2 %2393  ;;  %2396 = vmax.xlane.f32.xlu1 %v2395_v14 }
 0xc0f   :  { %v2418_v9 = vsub.f32 %v5041_v45, %v2394_v59 }
 0xc11   :  { %v5129_v38 = vpop.eup %3460  ;;  %v2445_v3 = vmul.f32 1.442695, %v2418_v9 }
 0xc12   :  { %v2485_v19 = vsel %vm533_vm4, %v5129_v38, 0.0 }
 0xc13   :  { %3462 = vpow2.f32 %v2445_v3  ;;  %2486 = vadd.xlane.f32.xlu0 %v2485_v19 }
 0xc19   :  { %v5133_v25 = vpop.eup %3462 }
 0xc1a   :  { %v2488_v55 = vsel %vm533_vm4, %v5133_v25, 0.0 }
 0xc1b   :  { %2489 = vadd.xlane.f32.xlu2 %v2488_v55 }
 0xc36   :  { %v2457_v63 = vpop.xlane.xlu1 %2456 }
 0xc37   :  { %3464 = vrcp.f32 %v2457_v63  ;;  %v2514_v0 = vand.u32 2147483648, %v2457_v63  ;;  %vm2508_vm5 = vweird.f32 %v2457_v63  ;;  %v2512_v37 = vand.u32 2147483647, %v2457_v63 }
 0xc39   :  { %v2515_v43 = vor.u32 1.1754944e-38, %v2514_v0  ;;  %vm2513_vm7 = vcmp.eq.f32.partialorder %v2512_v37, 8.507059e+37 }
 0xc3d   :  { %v3465_v50 = vpop.eup %3464 }
 0xc3e   :  { %v2460_v41 = vpop.xlane.xlu1 %2459  ;;  %v2504_v45 = vmul.f32 %v3465_v50, %v2457_v63  ;;  %vm2509_vm2 = vweird.f32 %v3465_v50 }
 0xc3f   :  { %3466 = vrcp.f32 %v2460_v41  ;;  %vm2510_vm6 = vmor %vm2508_vm5, %vm2509_vm2  ;;  %v2528_v32 = vand.u32 2147483648, %v2460_v41  ;;  %vm2522_vm9 = vweird.f32 %v2460_v41  ;;  %v2526_v15 = vand.u32 2147483647, %v2460_v41 }
 0xc40   :  { %v2505_v42 = vsub.f32 1.0, %v2504_v45 }
 0xc41   :  { %v2529_v1 = vor.u32 1.1754944e-38, %v2528_v32  ;;  %vm2527_vm11 = vcmp.eq.f32.partialorder %v2526_v15, 8.507059e+37 }
 0xc42   :  { %v2506_v20 = vmul.f32 %v3465_v50, %v2505_v42 }
 0xc44   :  { %v2507_v11 = vadd.f32 %v3465_v50, %v2506_v20 }
 0xc45   :  { %v3467_v51 = vpop.eup %3466 }
 0xc46   :  { %v5137_v60 = vpop.xlane.xlu0 %2462  ;;  %v2518_v10 = vmul.f32 %v3467_v51, %v2460_v41  ;;  %v2511_v12 = vsel %vm2510_vm6, %v3465_v50, %v2507_v11  ;;  %vm2523_vm8 = vweird.f32 %v3467_v51 }
 0xc47   :  { %3468 = vrcp.f32 %v5137_v60  ;;  %v2516_v30 = vsel %vm2513_vm7, %v2515_v43, %v2511_v12  ;;  %vm2524_vm10 = vmor %vm2522_vm9, %vm2523_vm8  ;;  %v2542_v59 = vand.u32 2147483648, %v5137_v60  ;;  %vm2536_vm13 = vweird.f32 %v5137_v60 }
 0xc48   :  { %v2519_v57 = vsub.f32 1.0, %v2518_v10  ;;  %v2727_v28 = vmul.f32 %v5047_v53, %v2516_v30  ;;  %v2540_v3 = vand.u32 2147483647, %v5137_v60 }
 0xc49   :  { %v2543_v41 = vor.u32 1.1754944e-38, %v2542_v59 }
 0xc4a   :  { %v2520_v29 = vmul.f32 %v3467_v51, %v2519_v57  ;;  %vm2541_vm15 = vcmp.eq.f32.partialorder %v2540_v3, 8.507059e+37 }
 0xc4c   :  { %v2521_v6 = vadd.f32 %v3467_v51, %v2520_v29 }
 0xc4d   :  { %v3469_v47 = vpop.eup %3468 }
 0xc4e   :  { %v5140_v2 = vpop.xlane.xlu0 %2465  ;;  %v2532_v48 = vmul.f32 %v3469_v47, %v5137_v60  ;;  %v2525_v58 = vsel %vm2524_vm10, %v3467_v51, %v2521_v6  ;;  %vm2537_vm12 = vweird.f32 %v3469_v47 }
 0xc4f   :  { %3470 = vrcp.f32 %v5140_v2  ;;  %v2530_v16 = vsel %vm2527_vm11, %v2529_v1, %v2525_v58  ;;  %vm2538_vm14 = vmor %vm2536_vm13, %vm2537_vm12  ;;  %v2556_v11 = vand.u32 2147483648, %v5140_v2  ;;  %vm2550_vm1 = vweird.f32 %v5140_v2 }
 0xc50   :  { %v2533_v40 = vsub.f32 1.0, %v2532_v48  ;;  %v2728_v9 = vmul.f32 %v5052_v31, %v2530_v16 }
 0xc51   :  { %v2557_v12 = vor.u32 1.1754944e-38, %v2556_v11 }
 0xc52   :  { %v2534_v5 = vmul.f32 %v3469_v47, %v2533_v40 }
 0xc54   :  { %v2535_v14 = vadd.f32 %v3469_v47, %v2534_v5 }
 0xc55   :  { %v3471_v36 = vpop.eup %3470 }
 0xc56   :  { %v5144_v56 = vpop.xlane.xlu0 %2468  ;;  %v3277_v23 = vpop.permute.xlu1 %3276  ;;  %v2546_v54 = vmul.f32 %v3471_v36, %v5140_v2  ;;  %v2539_v63 = vsel %vm2538_vm14, %v3469_v47, %v2535_v14  ;;  %vm2551_vm0 = vweird.f32 %v3471_v36  ;;  %v2554_v47 = vand.u32 2147483647, %v5140_v2 }
 0xc57   :  { %v3278_v21 = vunpack.i.l.bf16 %v3277_v23  ;;  %v3279_v17 = vunpack.i.h.bf16 %v3277_v23  ;;  %3472 = vrcp.f32 %v5144_v56  ;;  %v2544_v31 = vsel %vm2541_vm15, %v2543_v41, %v2539_v63  ;;  %vm2552_vm2 = vmor %vm2550_vm1, %vm2551_vm0 }
 0xc58   :  { %v2547_v8 = vsub.f32 1.0, %v2546_v54  ;;  %v2729_v57 = vmul.f32 %v5057_v33, %v2544_v31  ;;  %vm2555_vm5 = vcmp.eq.f32.partialorder %v2554_v47, 8.507059e+37  ;;  %v2570_v6 = vand.u32 2147483648, %v5144_v56 }
 0xc59   :  { %2813 = vmatpush.msrb.mxu3 %v3278_v21  ;;  %vm2564_vm7 = vweird.f32 %v5144_v56  ;;  %v2568_v32 = vand.u32 2147483647, %v5144_v56 }
 0xc5a   :  { %v2548_v19 = vmul.f32 %v3471_v36, %v2547_v8  ;;  %v2571_v5 = vor.u32 1.1754944e-38, %v2570_v6 }
 0xc5b   :  { %2814 = vmatpush.msrb.mxu3 %v3279_v17  ;;  %vm2569_vm9 = vcmp.eq.f32.partialorder %v2568_v32, 8.507059e+37 }
 0xc5c   :  { %3224 = vmatmul.msk.f32.vlgmr.msrb.gmra.mxu3 %vm533_vm4, %v2727_v28  ;;  %v2549_v20 = vadd.f32 %v3471_v36, %v2548_v19 }
 0xc5d   :  { %v5152_v53 = vpop.eup %3472 }
 0xc5e   :  { %v5150_v13 = vpop.xlane.xlu0 %2471  ;;  %v2560_v55 = vmul.f32 %v5152_v53, %v5144_v56  ;;  %v2553_v37 = vsel %vm2552_vm2, %v3471_v36, %v2549_v20  ;;  %vm2565_vm6 = vweird.f32 %v5152_v53 }
 0xc5f   :  { %3474 = vrcp.f32 %v5150_v13  ;;  %v2558_v33 = vsel %vm2555_vm5, %v2557_v12, %v2553_v37  ;;  %vm2566_vm8 = vmor %vm2564_vm7, %vm2565_vm6  ;;  %v2584_v8 = vand.u32 2147483648, %v5150_v13  ;;  %vm2578_vm11 = vweird.f32 %v5150_v13 }
 0xc60   :  { %v2561_v51 = vsub.f32 1.0, %v2560_v55  ;;  %v2582_v59 = vand.u32 2147483647, %v5150_v13 }
 0xc61   :  { %v2585_v55 = vor.u32 1.1754944e-38, %v2584_v8 }
 0xc62   :  { %vm2583_vm13 = vcmp.eq.f32.partialorder %v2582_v59, 8.507059e+37 }
 0xc64   :  { %3225 = vmatmul.msk.f32.gmra.mxu3 %vm533_vm4, %v2728_v9 }
 0xc65   :  { %v5165_v10 = vpop.eup %3474 }
 0xc66   :  { %v2400_v50 = vpop.xlane.xlu0 %2399  ;;  %v5162_v45 = vpop.xlane.xlu2 %2474  ;;  %v2574_v0 = vmul.f32 %v5165_v10, %v5150_v13  ;;  %vm2579_vm10 = vweird.f32 %v5165_v10 }
 0xc67   :  { %v2420_v42 = vsub.f32 %v5083_v46, %v2400_v50  ;;  %v2562_v46 = vmul.f32 %v5152_v53, %v2561_v51  ;;  %vm2580_vm12 = vmor %vm2578_vm11, %vm2579_vm10  ;;  %v2598_v51 = vand.u32 2147483648, %v5162_v45  ;;  %vm2592_vm15 = vweird.f32 %v5162_v45 }
 0xc68   :  { %v2575_v23 = vsub.f32 1.0, %v2574_v0  ;;  %v2596_v11 = vand.u32 2147483647, %v5162_v45 }
 0xc69   :  { %v2449_v60 = vmul.f32 1.442695, %v2420_v42  ;;  %v2563_v21 = vadd.f32 %v5152_v53, %v2562_v46  ;;  %v2599_v0 = vor.u32 1.1754944e-38, %v2598_v51 }
 0xc6a   :  { %v2576_v17 = vmul.f32 %v5165_v10, %v2575_v23  ;;  %vm2597_vm1 = vcmp.eq.f32.partialorder %v2596_v11, 8.507059e+37 }
 0xc6b   :  { %3476 = vpow2.f32 %v2449_v60  ;;  %v2567_v15 = vsel %vm2566_vm8, %v5152_v53, %v2563_v21 }
 0xc6c   :  { %3478 = vrcp.f32 %v5162_v45  ;;  %3226 = vmatmul.msk.f32.gmra.mxu3 %vm533_vm4, %v2729_v57  ;;  %v2572_v58 = vsel %vm2569_vm9, %v2571_v5, %v2567_v15  ;;  %v2577_v1 = vadd.f32 %v5165_v10, %v2576_v17 }
 0xc6d   :  { %v2731_v53 = vmul.f32 %v5067_v34, %v2572_v58 }
 0xc6e   :  { %v2403_v29 = vpop.xlane.xlu0 %2402  ;;  %v5176_v48 = vpop.xlane.xlu2 %2477  ;;  %v2581_v19 = vsel %vm2580_vm12, %v5165_v10, %v2577_v1 }
 0xc6f   :  { %v2421_v43 = vsub.f32 %v5095_v4, %v2403_v29  ;;  %v2730_v4 = vmul.f32 %v5062_v61, %v2558_v33  ;;  %v2586_v41 = vsel %vm2583_vm13, %v2585_v55, %v2581_v19  ;;  %vm2606_vm5 = vweird.f32 %v5176_v48 }
 0xc70   :  { %v2732_v10 = vmul.f32 %v5076_v26, %v2586_v41  ;;  %v2610_v23 = vand.u32 2147483647, %v5176_v48 }
 0xc71   :  { %v5179_v2 = vpop.eup %3476  ;;  %v2451_v30 = vmul.f32 1.442695, %v2421_v43  ;;  %v2612_v43 = vand.u32 2147483648, %v5176_v48 }
 0xc72   :  { %v5183_v40 = vpop.eup %3478  ;;  %v2494_v36 = vsel %vm533_vm4, %v5179_v2, 0.0  ;;  %vm2611_vm7 = vcmp.eq.f32.partialorder %v2610_v23, 8.507059e+37 }
 0xc73   :  { %3480 = vpow2.f32 %v2451_v30  ;;  %2495 = vadd.xlane.f32.xlu1 %v2494_v36  ;;  %v2588_v28 = vmul.f32 %v5183_v40, %v5162_v45  ;;  %vm2593_vm14 = vweird.f32 %v5183_v40 }
 0xc74   :  { %3482 = vrcp.f32 %v5176_v48  ;;  %3227 = vmatmul.msk.f32.gmra.mxu3 %vm533_vm4, %v2730_v4  ;;  %vm2594_vm0 = vmor %vm2592_vm15, %vm2593_vm14  ;;  %v2613_v4 = vor.u32 1.1754944e-38, %v2612_v43 }
 0xc75   :  { %v2589_v56 = vsub.f32 1.0, %v2588_v28 }
 0xc76   :  { %v5197_v54 = vpop.xlane.xlu2 %2480  ;;  %v2406_v63 = vpop.xlane.xlu0 %2405 }
 0xc77   :  { %3484 = vrcp.f32 %v5197_v54  ;;  %v2590_v9 = vmul.f32 %v5183_v40, %v2589_v56  ;;  %v2422_v20 = vsub.f32 %v5107_v35, %v2406_v63  ;;  %v2626_v5 = vand.u32 2147483648, %v5197_v54 }
 0xc78   :  { %vm2620_vm9 = vweird.f32 %v5197_v54  ;;  %v2624_v58 = vand.u32 2147483647, %v5197_v54 }
 0xc79   :  { %v5199_v61 = vpop.eup %3480  ;;  %v2591_v42 = vadd.f32 %v5183_v40, %v2590_v9  ;;  %v2453_v35 = vmul.f32 1.442695, %v2422_v20 }
 0xc7a   :  { %v5203_v16 = vpop.eup %3482  ;;  %v2497_v14 = vsel %vm533_vm4, %v5199_v61, 0.0  ;;  %vm2625_vm11 = vcmp.eq.f32.partialorder %v2624_v58, 8.507059e+37 }
 0xc7b   :  { %2498 = vadd.xlane.f32.xlu2 %v2497_v14  ;;  %v2602_v3 = vmul.f32 %v5203_v16, %v5176_v48  ;;  %vm2607_vm2 = vweird.f32 %v5203_v16 }
 0xc7c   :  { %3228 = vmatmul.msk.f32.gmra.mxu3 %vm533_vm4, %v2731_v53  ;;  %vm2608_vm6 = vmor %vm2606_vm5, %vm2607_vm2  ;;  %v2627_v53 = vor.u32 1.1754944e-38, %v2626_v5 }
 0xc7d   :  { %v2603_v50 = vsub.f32 1.0, %v2602_v3  ;;  %v5221_v31 = vpop.eup %3484 }
 0xc7e   :  { %v5217_v34 = vpop.xlane.xlu2 %2483  ;;  %v2616_v46 = vmul.f32 %v5221_v31, %v5197_v54  ;;  %vm2621_vm8 = vweird.f32 %v5221_v31 }
 0xc7f   :  { %3486 = vrcp.f32 %v5217_v34  ;;  %v2604_v47 = vmul.f32 %v5203_v16, %v2603_v50  ;;  %vm2622_vm10 = vmor %vm2620_vm9, %vm2621_vm8  ;;  %v2640_v3 = vand.u32 2147483648, %v5217_v34  ;;  %vm2634_vm13 = vweird.f32 %v5217_v34 }
 0xc80   :  { %v2617_v37 = vsub.f32 1.0, %v2616_v46  ;;  %v2638_v19 = vand.u32 2147483647, %v5217_v34 }
 0xc81   :  { %v2397_v13 = vpop.xlane.xlu1 %2396  ;;  %v2605_v12 = vadd.f32 %v5203_v16, %v2604_v47 }
 0xc82   :  { %v2419_v60 = vsub.f32 %v5122_v22, %v2397_v13  ;;  %v2595_v22 = vsel %vm2594_vm0, %v5183_v40, %v2591_v42  ;;  %v2618_v21 = vmul.f32 %v5221_v31, %v2617_v37  ;;  %v2641_v13 = vor.u32 1.1754944e-38, %v2640_v3 }
 0xc83   :  { %v2600_v26 = vsel %vm2597_vm1, %v2599_v0, %v2595_v22  ;;  %v2609_v36 = vsel %vm2608_vm6, %v5203_v16, %v2605_v12  ;;  %vm2639_vm15 = vcmp.eq.f32.partialorder %v2638_v19, 8.507059e+37  ;;  %v3199_v12 = vld [vmem:[%s5427_s12 + $0x58] sm:$0xff] }
 0xc84   :  { %v2447_v57 = vmul.f32 1.442695, %v2419_v60  ;;  %3229 = vmatmul.msk.f32.gmra.mxu3 %vm533_vm4, %v2732_v10  ;;  %v2733_v33 = vmul.f32 %v5086_v49, %v2600_v26  ;;  %v2614_v49 = vsel %vm2611_vm7, %v2613_v4, %v2609_v36  ;;  %v2619_v32 = vadd.f32 %v5221_v31, %v2618_v21  ;;  %2919 = vmatpush.msra.mxu0 %v3199_v12 }
 0xc85   :  { %v3487_v29 = vpop.eup %3486  ;;  %v2734_v56 = vmul.f32 %v5098_v62, %v2614_v49 }
 0xc86   :  { %3488 = vpow2.f32 %v2447_v57  ;;  %v5235_v45 = vpop.xlane.xlu0 %2486  ;;  %v2630_v40 = vmul.f32 %v3487_v29, %v5217_v34  ;;  %v2623_v14 = vsel %vm2622_vm10, %v5221_v31, %v2619_v32  ;;  %vm2635_vm12 = vweird.f32 %v3487_v29 }
 0xc87   :  { %3490 = vpow2.f32 %v2453_v35  ;;  %v2628_v59 = vsel %vm2625_vm11, %v2627_v53, %v2623_v14  ;;  %vm2636_vm14 = vmor %vm2634_vm13, %vm2635_vm12  ;;  %v2654_v60 = vand.u32 2147483648, %v5235_v45  ;;  %vm2648_vm1 = vweird.f32 %v5235_v45 }
 0xc88   :  { %3492 = vrcp.f32 %v5235_v45  ;;  %v2631_v17 = vsub.f32 1.0, %v2630_v40  ;;  %v2735_v55 = vmul.f32 %v5110_v27, %v2628_v59  ;;  %v2652_v34 = vand.u32 2147483647, %v5235_v45 }
 0xc89   :  { %v2655_v11 = vor.u32 1.1754944e-38, %v2654_v60  ;;  %v3196_v60 = vld [vmem:[%s5427_s12 + $0x40] sm:$0xff] }
 0xc8a   :  { %v2632_v1 = vmul.f32 %v3487_v29, %v2631_v17  ;;  %vm2653_vm5 = vcmp.eq.f32.partialorder %v2652_v34, 8.507059e+37 }
 0xc8c   :  { %v5243_v30 = vpop.eup %3488  ;;  %3230 = vmatmul.msk.f32.gmra.mxu3 %vm533_vm4, %v2733_v33  ;;  %v2633_v9 = vadd.f32 %v3487_v29, %v2632_v1 }
 0xc8d   :  { %v2491_v6 = vsel %vm533_vm4, %v5243_v30, 0.0  ;;  %v5252_v48 = vpop.eup %3490 }
 0xc8e   :  { %2492 = vadd.xlane.f32.xlu0 %v2491_v6  ;;  %v2490_v28 = vpop.xlane.xlu2 %2489  ;;  %v3493_v15 = vpop.eup %3492  ;;  %v2500_v8 = vsel %vm533_vm4, %v5252_v48, 0.0  ;;  %v2637_v50 = vsel %vm2636_vm14, %v3487_v29, %v2633_v9 }
 0xc8f   :  { %3494 = vrcp.f32 %v2490_v28  ;;  %v2644_v16 = vmul.f32 %v3493_v15, %v5235_v45  ;;  %v2642_v42 = vsel %vm2639_vm15, %v2641_v13, %v2637_v50  ;;  %vm2649_vm0 = vweird.f32 %v3493_v15 }
 0xc90   :  { %v2736_v27 = vmul.f32 %v5117_v52, %v2642_v42  ;;  %vm2650_vm2 = vmor %vm2648_vm1, %vm2649_vm0  ;;  %v2668_v46 = vand.u32 2147483648, %v2490_v28  ;;  %vm2662_vm7 = vweird.f32 %v2490_v28  ;;  %v2666_v22 = vand.u32 2147483647, %v2490_v28  ;;  %v3197_v42 = vld [vmem:[%s5427_s12 + $0x48] sm:$0xff] }
 0xc91   :  { %v2645_v54 = vsub.f32 1.0, %v2644_v16 }
 0xc92   :  { %v2669_v52 = vor.u32 1.1754944e-38, %v2668_v46  ;;  %vm2667_vm9 = vcmp.eq.f32.partialorder %v2666_v22, 8.507059e+37 }
 0xc93   :  { %v2646_v63 = vmul.f32 %v3493_v15, %v2645_v54 }
 0xc94   :  { %3231 = vmatmul.msk.f32.gmra.mxu3 %vm533_vm4, %v2734_v56 }
 0xc95   :  { %v3495_v62 = vpop.eup %3494  ;;  %v2647_v31 = vadd.f32 %v3493_v15, %v2646_v63 }
 0xc96   :  { %2501 = vadd.xlane.f32.xlu0 %v2500_v8  ;;  %v2658_v41 = vmul.f32 %v3495_v62, %v2490_v28  ;;  %vm2663_vm6 = vweird.f32 %v3495_v62 }
 0xc97   :  { %v2651_v10 = vsel %vm2650_vm2, %v3493_v15, %v2647_v31  ;;  %vm2664_vm8 = vmor %vm2662_vm7, %vm2663_vm6 }
 0xc98   :  { %v2659_v51 = vsub.f32 1.0, %v2658_v41  ;;  %v2656_v57 = vsel %vm2653_vm5, %v2655_v11, %v2651_v10 }
 0xc99   :  { %v2737_v0 = vmul.f32 %v5129_v38, %v2656_v57 }
 0xc9a   :  { %v2660_v20 = vmul.f32 %v3495_v62, %v2659_v51 }
 0xc9c   :  { %3232 = vmatmul.msk.f32.gmra.mxu3 %vm533_vm4, %v2735_v55  ;;  %v2661_v47 = vadd.f32 %v3495_v62, %v2660_v20 }
 0xc9e   :  { %v2665_v35 = vsel %vm2664_vm8, %v3495_v62, %v2661_v47 }
 0xc9f   :  { %v2670_v26 = vsel %vm2667_vm9, %v2669_v52, %v2665_v35 }
 0xca0   :  { %v2738_v37 = vmul.f32 %v5133_v25, %v2670_v26 }
 0xca4   :  { %3233 = vmatmul.msk.f32.gmra.mxu3 %vm533_vm4, %v2736_v27 }
 0xcac   :  { %3234 = vmatmul.msk.f32.gmra.mxu3 %vm533_vm4, %v2737_v0 }
 0xcb4   :  { %3235 = vmatmul.msk.f32.gmra.mxu3 %vm533_vm4, %v2738_v37 }
 0xcdf   :  { %v2816_v20 = vpop.f32.mrf.mxu3 }
 0xce6   :  { %v2496_v45 = vpop.xlane.xlu1 %2495 }
 0xce7   :  { %3496 = vrcp.f32 %v2496_v45  ;;  %v2696_v8 = vand.u32 2147483648, %v2496_v45  ;;  %vm2690_vm15 = vweird.f32 %v2496_v45  ;;  %v2694_v53 = vand.u32 2147483647, %v2496_v45  ;;  %v2819_v35 = vpop.f32.mrf.mxu3 }
 0xce9   :  { %v2697_v3 = vor.u32 1.1754944e-38, %v2696_v8  ;;  %vm2695_vm1 = vcmp.eq.f32.partialorder %v2694_v53, 8.507059e+37 }
 0xced   :  { %v3497_v29 = vpop.eup %3496 }
 0xcee   :  { %v2499_v38 = vpop.xlane.xlu2 %2498  ;;  %v2686_v33 = vmul.f32 %v3497_v29, %v2496_v45  ;;  %vm2691_vm12 = vweird.f32 %v3497_v29 }
 0xcef   :  { %vm2692_vm0 = vmor %vm2690_vm15, %vm2691_vm12  ;;  %v2710_v41 = vand.u32 2147483648, %v2499_v38  ;;  %vm2704_vm5 = vweird.f32 %v2499_v38  ;;  %v2708_v50 = vand.u32 2147483647, %v2499_v38  ;;  %v2822_v52 = vpop.f32.mrf.mxu3 }
 0xcf0   :  { %v2687_v21 = vsub.f32 1.0, %v2686_v33 }
 0xcf1   :  { %v2711_v34 = vor.u32 1.1754944e-38, %v2710_v41  ;;  %vm2709_vm7 = vcmp.eq.f32.partialorder %v2708_v50, 8.507059e+37 }
 0xcf2   :  { %v2688_v4 = vmul.f32 %v3497_v29, %v2687_v21 }
 0xcf4   :  { %v2689_v58 = vadd.f32 %v3497_v29, %v2688_v4 }
 0xcf6   :  { %v2693_v62 = vsel %vm2692_vm0, %v3497_v29, %v2689_v58  ;;  %v3581_v58 = vld [vmem:[%s5418_s3 + $0x8] sm:$0xff] }
 0xcf7   :  { %v2698_v19 = vsel %vm2695_vm1, %v2697_v3, %v2693_v62  ;;  %v2825_v26 = vpop.f32.mrf.mxu3 }
 0xcf8   :  { %v2740_v13 = vmul.f32 %v5179_v2, %v2698_v19  ;;  %v3585_v19 = vld [vmem:[%s5418_s3 + $0x10] sm:$0xff] }
 0xcff   :  { %v2828_v37 = vpop.f32.mrf.mxu3 }
 0xd01   :  { %v2493_v43 = vpop.xlane.xlu0 %2492 }
 0xd02   :  { %3498 = vrcp.f32 %v2493_v43  ;;  %v2682_v49 = vand.u32 2147483648, %v2493_v43  ;;  %v2680_v28 = vand.u32 2147483647, %v2493_v43  ;;  %vm2676_vm11 = vweird.f32 %v2493_v43 }
 0xd03   :  { %3500 = vrcp.f32 %v2499_v38 }
 0xd04   :  { %v2683_v5 = vor.u32 1.1754944e-38, %v2682_v49  ;;  %vm2681_vm14 = vcmp.eq.f32.partialorder %v2680_v28, 8.507059e+37  ;;  %v3580_v28 = vld [vmem:[%s5418_s3 + $0x28] sm:$0xff] }
 0xd07   :  { %v2831_v45 = vpop.f32.mrf.mxu3 }
 0xd08   :  { %v3499_v23 = vpop.eup %3498 }
 0xd09   :  { %v2672_v40 = vmul.f32 %v3499_v23, %v2493_v43  ;;  %v5282_v6 = vpop.xlane.xlu0 %2501  ;;  %v3501_v25 = vpop.eup %3500  ;;  %vm2677_vm10 = vweird.f32 %v3499_v23 }
 0xd0a   :  { %3502 = vrcp.f32 %v5282_v6  ;;  %v2700_v32 = vmul.f32 %v3501_v25, %v2499_v38  ;;  %vm2678_vm13 = vmor %vm2676_vm11, %vm2677_vm10  ;;  %vm2705_vm2 = vweird.f32 %v3501_v25  ;;  %v2724_v10 = vand.u32 2147483648, %v5282_v6 }
 0xd0b   :  { %v2673_v36 = vsub.f32 1.0, %v2672_v40  ;;  %vm2706_vm6 = vmor %vm2704_vm5, %vm2705_vm2  ;;  %vm2718_vm9 = vweird.f32 %v5282_v6  ;;  %v2722_v11 = vand.u32 2147483647, %v5282_v6 }
 0xd0c   :  { %v2701_v56 = vsub.f32 1.0, %v2700_v32  ;;  %v2725_v46 = vor.u32 1.1754944e-38, %v2724_v10  ;;  %v3579_v32 = vld [vmem:[%s5418_s3 + $0x60] sm:$0xff] }
 0xd0d   :  { %v2674_v17 = vmul.f32 %v3499_v23, %v2673_v36  ;;  %vm2723_vm11 = vcmp.eq.f32.partialorder %v2722_v11, 8.507059e+37 }
 0xd0e   :  { %v2702_v9 = vmul.f32 %v3501_v25, %v2701_v56  ;;  %v2865_v56 = vmul.f32 %v3581_v58, %v2819_v35  ;;  %v3291_v35 = vld [vmem:[%s5428_s13 + $0x2] ss:$0 sm:$0xff] }
 0xd0f   :  { %v2675_v15 = vadd.f32 %v3499_v23, %v2674_v17  ;;  %v2834_v12 = vpop.f32.mrf.mxu3 }
 0xd10   :  { %v3503_v16 = vpop.eup %3502  ;;  %v2703_v55 = vadd.f32 %v3501_v25, %v2702_v9 }
 0xd11   :  { %v2679_v1 = vsel %vm2678_vm13, %v3499_v23, %v2675_v15  ;;  %v2714_v54 = vmul.f32 %v3503_v16, %v5282_v6  ;;  %vm2719_vm8 = vweird.f32 %v3503_v16  ;;  %v3576_v23 = vld [vmem:[%s5418_s3 + $0x20] sm:$0xff]  ;;  %v2869_v15 = vmul.f32 %v3580_v28, %v2831_v45 }
 0xd12   :  { %v2684_v14 = vsel %vm2681_vm14, %v2683_v5, %v2679_v1  ;;  %v2707_v51 = vsel %vm2706_vm6, %v3501_v25, %v2703_v55  ;;  %vm2720_vm10 = vmor %vm2718_vm9, %vm2719_vm8  ;;  %v2868_v21 = vmul.f32 %v3576_v23, %v2828_v37  ;;  %v3578_v6 = vld [vmem:[%s5418_s3 + $0x40] sm:$0xff]  ;;  %v3582_v1 = vld [vmem:[%s5418_s3 + $0x48] sm:$0xff]  ;;  %v2866_v55 = vmul.f32 %v3585_v19, %v2822_v52 }
 0xd13   :  { %v2739_v59 = vmul.f32 %v5243_v30, %v2684_v14  ;;  %v2715_v63 = vsub.f32 1.0, %v2714_v54  ;;  %v3198_v30 = vld [vmem:[%s5427_s12 + $0x50] sm:$0xff]  ;;  %v2712_v2 = vsel %vm2709_vm7, %v2711_v34, %v2707_v51  ;;  %v2881_v8 = vadd.f32 %v2869_v15, %v2865_v56  ;;  %v3588_v51 = vld [vmem:[%s5418_s3 + $0x38] sm:$0xff] }
 0xd14   :  { %2920 = vmatpush.msra.mxu0 %v3198_v30  ;;  %v2741_v57 = vmul.f32 %v5199_v61, %v2712_v2  ;;  %v3584_v54 = vld [vmem:[%s5418_s3 + $0x30] sm:$0xff]  ;;  %v3589_v2 = vld [vmem:[%s5418_s3 + $0x18] sm:$0xff] }
 0xd15   :  { %3236 = vmatmul.msk.f32.gmra.mxu3 %vm533_vm4, %v2739_v59  ;;  %v2716_v31 = vmul.f32 %v3503_v16, %v2715_v63  ;;  %v3583_v59 = vld [vmem:[%s5418_s3 + $0x68] sm:$0xff]  ;;  %v2870_v62 = vmul.f32 %v3584_v54, %v2834_v12  ;;  %v3586_v63 = vld [vmem:[%s5418_s3 + $0x50] sm:$0xff] }
 0xd16   :  { %2921 = vmatpush.msra.mxu0 %v3197_v42  ;;  %v3587_v42 = vld [vmem:[%s5418_s3 + $0x70] sm:$0xff] }
 0xd17   :  { %v2717_v27 = vadd.f32 %v3503_v16, %v2716_v31  ;;  %v2837_v29 = vpop.f32.mrf.mxu3  ;;  %v2882_v50 = vadd.f32 %v2870_v62, %v2866_v55 }
 0xd18   :  { %2922 = vmatpush.msra.mxu0 %v3196_v60  ;;  %v2871_v60 = vmul.f32 %v3588_v51, %v2837_v29 }
 0xd19   :  { %v2721_v47 = vsel %vm2720_vm10, %v3503_v16, %v2717_v27  ;;  %v2867_v27 = vmul.f32 %v3589_v2, %v2825_v26 }
 0xd1a   :  { %v2726_v22 = vsel %vm2723_vm11, %v2725_v46, %v2721_v47  ;;  %v3591_v46 = vld [vmem:[%s5418_s3 + $0x78] sm:$0xff] }
 0xd1b   :  { %v2742_v0 = vmul.f32 %v5252_v48, %v2726_v22  ;;  %v3577_v48 = vld [vmem:[%s5418_s3] sm:$0xff]  ;;  %v2883_v11 = vadd.f32 %v2871_v60, %v2867_v27 }
 0xd1c   :  { %v2864_v40 = vmul.f32 %v3577_v48, %v2816_v20  ;;  %v3590_v20 = vld [vmem:[%s5418_s3 + $0x58] sm:$0xff]  ;;  %s3756_s3 = smov [#allocation11]   ;;  %v3292_v27 = vld [vmem:[%s5429_s14 + $0x2] ss:$0 sm:$0xff]  ;;  %s3759_s14 = smov [#allocation10]  }
 0xd1d   :  { %3237 = vmatmul.msk.f32.gmra.mxu3 %vm533_vm4, %v2740_v13  ;;  %s3063_s13 = sshll.u32 %s3756_s3, 4  ;;  %s3050_s4 = sshll.u32 %s3759_s14, 4  ;;  %s3064_s13 = int_to_ptr.vmem [resolvable:$true] %s3063_s13  ;;  %s3051_s4 = int_to_ptr.vmem [resolvable:$true] %s3050_s4 }
 0xd1e   :  { %v2880_v36 = vadd.f32 %v2868_v21, %v2864_v40  ;;  %3071 = dma.vmem_to_hbm [thread:$0]  %s3064_s13, 256, %s3066_s28, [#allocation12], %s3757_s11, %s3757_s11, %s3758_s23  }
 0xd1f   :  { %v2840_v38 = vpop.f32.mrf.mxu3 }
 0xd20   :  { %v2872_v25 = vmul.f32 %v3578_v6, %v2840_v38 }
 0xd22   :  { %v2884_v49 = vadd.f32 %v2880_v36, %v2872_v25 }
 0xd25   :  { %3238 = vmatmul.msk.f32.gmra.mxu3 %vm533_vm4, %v2741_v57 }
 0xd27   :  { %v2843_v61 = vpop.f32.mrf.mxu3 }
 0xd28   :  { %v2873_v16 = vmul.f32 %v3582_v1, %v2843_v61 }
 0xd2a   :  { %v2885_v53 = vadd.f32 %v2881_v8, %v2873_v16 }
 0xd2d   :  { %3239 = vmatmul.msk.f32.gmra.mxu3 %vm533_vm4, %v2742_v0 }
 0xd2f   :  { %v2846_v43 = vpop.f32.mrf.mxu3 }
 0xd30   :  { %v2874_v41 = vmul.f32 %v3586_v63, %v2846_v43 }
 0xd32   :  { %v2886_v30 = vadd.f32 %v2882_v50, %v2874_v41 }
 0xd37   :  { %v2849_v33 = vpop.f32.mrf.mxu3 }
 0xd38   :  { %v2875_v10 = vmul.f32 %v3590_v20, %v2849_v33 }
 0xd3a   :  { %v2887_v47 = vadd.f32 %v2883_v11, %v2875_v10  ;;  %v3293_v11 = vld [vmem:[#allocation8 + $0x2] ss:$0 sm:$0xff] }
 0xd98   :  { %v2852_v4 = vpop.f32.mrf.mxu3 }
 0xd99   :  { %v2876_v17 = vmul.f32 %v3579_v32, %v2852_v4 }
 0xd9b   :  { %v2888_v5 = vadd.f32 %v2884_v49, %v2876_v17 }
 0xd9d   :  { %3240 = vmatmul.msk.f32.vlgmr.msra.gmra.mxu0 %vm241_vm3, %v2888_v5 }
 0xda0   :  { %v2855_v14 = vpop.f32.mrf.mxu3 }
 0xda1   :  { %v2877_v9 = vmul.f32 %v3583_v59, %v2855_v14 }
 0xda3   :  { %v2889_v3 = vadd.f32 %v2885_v53, %v2877_v9 }
 0xda5   :  { %3241 = vmatmul.msk.f32.gmra.mxu0 %vm241_vm3, %v2889_v3 }
 0xda8   :  { %v2858_v13 = vpop.f32.mrf.mxu3 }
 0xda9   :  { %v2878_v31 = vmul.f32 %v3587_v42, %v2858_v13 }
 0xdab   :  { %v2890_v34 = vadd.f32 %v2886_v30, %v2878_v31 }
 0xdad   :  { %3242 = vmatmul.msk.f32.gmra.mxu0 %vm241_vm3, %v2890_v34 }
 0xdb0   :  { %v2861_v57 = vpop.f32.mrf.mxu3 }
 0xdb1   :  { %v2879_v22 = vmul.f32 %v3591_v46, %v2861_v57 }
 0xdb3   :  { %v2891_v0 = vadd.f32 %v2887_v47, %v2879_v22 }
 0xdb5   :  { %3243 = vmatmul.msk.f32.gmra.mxu0 %vm241_vm3, %v2891_v0 }
 0xe1a   :  { %v2924_v52 = vpop.f32.mrf.mxu0 }
 0xe1b   :  { %v2925_v26 = vadd.f32 %v3291_v35, %v2924_v52 }
 0xe1d   :  { %v2936_v37 = vadd.f32 %v2925_v26, %v4906_v7 }
 0xe1f   :  { %v2940_v45 = vsel %vm241_vm3, %v2936_v37, 0.0 }
 0xe20   :  { %2941 = vadd.xlane.f32.xlu1 %v2940_v45 }
 0xe22   :  { %v2927_v12 = vpop.f32.mrf.mxu0 }
 0xe23   :  { %v2928_v29 = vadd.f32 %v3291_v35, %v2927_v12 }
 0xe25   :  { %v2937_v38 = vadd.f32 %v2928_v29, %v4911_v24 }
 0xe27   :  { %v2943_v61 = vsel %vm241_vm3, %v2937_v38, 0.0 }
 0xe28   :  { %2944 = vadd.xlane.f32.xlu2 %v2943_v61 }
 0xe2a   :  { %v2930_v43 = vpop.f32.mrf.mxu0 }
 0xe2b   :  { %v2931_v33 = vadd.f32 %v3291_v35, %v2930_v43 }
 0xe2d   :  { %v2938_v23 = vadd.f32 %v2931_v33, %v4917_v44 }
 0xe2f   :  { %v2946_v21 = vsel %vm241_vm3, %v2938_v23, 0.0 }
 0xe30   :  { %2947 = vadd.xlane.f32.xlu0 %v2946_v21 }
 0xe32   :  { %v2933_v48 = vpop.f32.mrf.mxu0 }
 0xe33   :  { %v2934_v40 = vadd.f32 %v3291_v35, %v2933_v48 }
 0xe35   :  { %v2939_v7 = vadd.f32 %v2934_v40, %v4922_v18 }
 0xe37   :  { %v2949_v6 = vsel %vm241_vm3, %v2939_v7, 0.0 }
 0xe38   :  { %2950 = vadd.xlane.f32.xlu1 %v2949_v6 }
 0xe93   :  { %v2942_v25 = vpop.xlane.xlu1 %2941 }
 0xe94   :  { %v2952_v24 = vmul.f32 %v2942_v25, %v4441_v39 }
 0xe96   :  { %v2956_v36 = vsub.f32 %v2936_v37, %v2952_v24 }
 0xe98   :  { %v2960_v4 = vmul.f32 %v2956_v36, %v2956_v36 }
 0xe9a   :  { %v2964_v49 = vsel %vm241_vm3, %v2960_v4, 0.0 }
 0xe9b   :  { %2965 = vadd.xlane.f32.xlu2 %v2964_v49  ;;  %v2945_v32 = vpop.xlane.xlu2 %2944 }
 0xe9c   :  { %v2953_v44 = vmul.f32 %v2945_v32, %v4441_v39 }
 0xe9e   :  { %v5372_v17 = vsub.f32 %v2937_v38, %v2953_v44 }
 0xea0   :  { %v2961_v28 = vmul.f32 %v5372_v17, %v5372_v17 }
 0xea2   :  { %v2967_v18 = vsel %vm241_vm3, %v2961_v28, 0.0 }
 0xea3   :  { %2968 = vadd.xlane.f32.xlu0 %v2967_v18  ;;  %v2948_v15 = vpop.xlane.xlu0 %2947 }
 0xea4   :  { %v2954_v5 = vmul.f32 %v2948_v15, %v4441_v39 }
 0xea6   :  { %v5378_v58 = vsub.f32 %v2938_v23, %v2954_v5 }
 0xea8   :  { %v2962_v56 = vmul.f32 %v5378_v58, %v5378_v58 }
 0xeaa   :  { %v2970_v1 = vsel %vm241_vm3, %v2962_v56, 0.0 }
 0xeab   :  { %2971 = vadd.xlane.f32.xlu1 %v2970_v1  ;;  %v2951_v16 = vpop.xlane.xlu1 %2950 }
 0xeac   :  { %v2955_v8 = vmul.f32 %v2951_v16, %v4441_v39 }
 0xeae   :  { %v5384_v14 = vsub.f32 %v2939_v7, %v2955_v8 }
 0xeb0   :  { %v2963_v53 = vmul.f32 %v5384_v14, %v5384_v14 }
 0xeb2   :  { %v2973_v59 = vsel %vm241_vm3, %v2963_v53, 0.0 }
 0xeb3   :  { %2974 = vadd.xlane.f32.xlu2 %v2973_v59 }
 0xf0e   :  { %v2966_v9 = vpop.xlane.xlu2 %2965 }
 0xf0f   :  { %v2976_v54 = vmul.f32 %v2966_v9, %v4441_v39 }
 0xf11   :  { %v2980_v62 = vadd.f32 1e-05, %v2976_v54 }
 0xf13   :  { %3504 = vrsqrt.f32 %v2980_v62  ;;  %vm2990_vm12 = vweird.f32 %v2980_v62 }
 0xf16   :  { %v2969_v3 = vpop.xlane.xlu0 %2968 }
 0xf17   :  { %v2977_v19 = vmul.f32 %v2969_v3, %v4441_v39 }
 0xf19   :  { %v3505_v55 = vpop.eup %3504  ;;  %v2981_v63 = vadd.f32 1e-05, %v2977_v19 }
 0xf1a   :  { %v2985_v41 = vmul.f32 %v3505_v55, %v2980_v62  ;;  %vm2991_vm4 = vweird.f32 %v3505_v55 }
 0xf1b   :  { %3506 = vrsqrt.f32 %v2981_v63  ;;  %vm2992_vm13 = vmor %vm2990_vm12, %vm2991_vm4  ;;  %vm3000_vm15 = vweird.f32 %v2981_v63 }
 0xf1c   :  { %v2986_v50 = vmul.f32 %v3505_v55, %v2985_v41 }
 0xf1e   :  { %v2987_v13 = vmul.f32 0.5, %v2986_v50  ;;  %v2972_v30 = vpop.xlane.xlu1 %2971 }
 0xf1f   :  { %v2978_v42 = vmul.f32 %v2972_v30, %v4441_v39 }
 0xf20   :  { %v2988_v31 = vsub.f32 1.5, %v2987_v13 }
 0xf21   :  { %v3507_v51 = vpop.eup %3506  ;;  %v2982_v60 = vadd.f32 1e-05, %v2978_v42 }
 0xf22   :  { %v2989_v34 = vmul.f32 %v3505_v55, %v2988_v31  ;;  %v2995_v2 = vmul.f32 %v3507_v51, %v2981_v63  ;;  %vm3001_vm14 = vweird.f32 %v3507_v51 }
 0xf23   :  { %3508 = vrsqrt.f32 %v2982_v60  ;;  %vm3002_vm0 = vmor %vm3000_vm15, %vm3001_vm14  ;;  %vm3010_vm2 = vweird.f32 %v2982_v60 }
 0xf24   :  { %v2993_v20 = vsel %vm2992_vm13, %v3505_v55, %v2989_v34  ;;  %v2996_v10 = vmul.f32 %v3507_v51, %v2995_v2 }
 0xf25   :  { %v3024_v57 = vmul.f32 %v2993_v20, %v2956_v36 }
 0xf26   :  { %v2997_v47 = vmul.f32 0.5, %v2996_v10  ;;  %v2975_v46 = vpop.xlane.xlu2 %2974 }
 0xf27   :  { %v3031_v22 = vmul.f32 %v3292_v27, %v3024_v57  ;;  %v2979_v0 = vmul.f32 %v2975_v46, %v4441_v39 }
 0xf28   :  { %v2998_v35 = vsub.f32 1.5, %v2997_v47 }
 0xf29   :  { %v3509_v52 = vpop.eup %3508  ;;  %v3038_v26 = vadd.f32 %v3293_v11, %v3031_v22  ;;  %v2983_v37 = vadd.f32 1e-05, %v2979_v0 }
 0xf2a   :  { %v2999_v45 = vmul.f32 %v3507_v51, %v2998_v35  ;;  %v3005_v12 = vmul.f32 %v3509_v52, %v2982_v60  ;;  %vm3011_vm1 = vweird.f32 %v3509_v52 }
 0xf2b   :  { %3042 = vst.msk [vmem:[#allocation10] sm:$0xff] %vm241_vm3, %v3038_v26  ;;  %3510 = vrsqrt.f32 %v2983_v37  ;;  %vm3012_vm5 = vmor %vm3010_vm2, %vm3011_vm1  ;;  %vm3020_vm7 = vweird.f32 %v2983_v37 }
 0xf2c   :  { %v3003_v29 = vsel %vm3002_vm0, %v3507_v51, %v2999_v45  ;;  %v3006_v38 = vmul.f32 %v3509_v52, %v3005_v12 }
 0xf2d   :  { %v3025_v61 = vmul.f32 %v3003_v29, %v5372_v17 }
 0xf2e   :  { %v3007_v43 = vmul.f32 0.5, %v3006_v38 }
 0xf2f   :  { %v3032_v33 = vmul.f32 %v3292_v27, %v3025_v61 }
 0xf30   :  { %v3008_v23 = vsub.f32 1.5, %v3007_v43 }
 0xf31   :  { %v3511_v39 = vpop.eup %3510  ;;  %v3039_v21 = vadd.f32 %v3293_v11, %v3032_v33 }
 0xf32   :  { %v3009_v48 = vmul.f32 %v3509_v52, %v3008_v23  ;;  %v3015_v40 = vmul.f32 %v3511_v39, %v2983_v37  ;;  %vm3021_vm6 = vweird.f32 %v3511_v39 }
 0xf33   :  { %3043 = vst.msk [vmem:[#allocation10 + $0x8] sm:$0xff] %vm241_vm3, %v3039_v21  ;;  %vm3022_vm8 = vmor %vm3020_vm7, %vm3021_vm6 }
 0xf34   :  { %v3013_v7 = vsel %vm3012_vm5, %v3509_v52, %v3009_v48  ;;  %v3016_v6 = vmul.f32 %v3511_v39, %v3015_v40 }
 0xf35   :  { %v3026_v25 = vmul.f32 %v3013_v7, %v5378_v58 }
 0xf36   :  { %v3017_v24 = vmul.f32 0.5, %v3016_v6 }
 0xf37   :  { %v3033_v36 = vmul.f32 %v3292_v27, %v3026_v25 }
 0xf38   :  { %v3018_v4 = vsub.f32 1.5, %v3017_v24 }
 0xf39   :  { %v3040_v49 = vadd.f32 %v3293_v11, %v3033_v36 }
 0xf3a   :  { %v3019_v32 = vmul.f32 %v3511_v39, %v3018_v4 }
 0xf3b   :  { %3044 = vst.msk [vmem:[#allocation10 + $0x10] sm:$0xff] %vm241_vm3, %v3040_v49 }
 0xf3c   :  { %v3023_v44 = vsel %vm3022_vm8, %v3511_v39, %v3019_v32 }
 0xf3d   :  { %v3027_v17 = vmul.f32 %v3023_v44, %v5384_v14 }
 0xf3f   :  { %v3034_v28 = vmul.f32 %v3292_v27, %v3027_v17 }
 0xf41   :  { %v3041_v18 = vadd.f32 %v3293_v11, %v3034_v28 }
 0xf43   :  { %3045 = vst.msk [vmem:[#allocation10 + $0x18] sm:$0xff] %vm241_vm3, %v3041_v18 }
 0xf44   :  { %3058 = dma.vmem_to_hbm [thread:$0]  %s3051_s4, 512, %s3053_s0, [#allocation4], %s3757_s11, %s3757_s11, %s3758_s23  }
 0xf45   :  { %3742 = dma.done.wait [#allocation4], 512  }
 0xf46   :  { %3743 = vsyncadd [#allocation4], 4294966784 }
 0xf47   :  { %3744 = dma.done.wait [#allocation12], 256  }
 0xf48   :  { %3745 = vsyncadd [#allocation12], 4294967040 }
 0xf49   :  { %3080 = vsyncpa [#allocation3], 1 }
 0xf4a   :  { %3081 = vsyncpa [#allocation6], 1 }
 0xf4b   :  { %3082 = vsyncpa [#allocation9], 1 }
 0xf4c   :  { %3083 = vsyncpa [#allocation4], 1 }
 0xf4d   :  { %3084 = vsyncpa [#allocation12], 1 }

</bundles_post_ra>
